<compile_context>
chip_gen: v6e
topology: v6e:2x2x1
jax: 0.10.0
libtpu: 0.0.40
codegen_flags: <defaults>
</compile_context>

<pallas_src>
import functools

import numpy as np
import jax
import jax.numpy as jnp
from jax.experimental import pallas as pl
from jax.experimental.pallas import tpu as pltpu


# ---------------------------------------------------------------------------
# Hyper-parameters (the PyTorch module reads a global `AP`).
# fov=3, convolution_size=2 => the conv/pool chain ends at a 1x1 map, as the
# .view() in ObservationEncoder requires.
# ---------------------------------------------------------------------------
class AP:
    num_observation_in_dim = 4
    num_observation_hidden_channels = 32      # N (divisible by 4)
    goal_embedding_size = 8
    goal_in_dim = 3
    memory_dim = 32
    message_feature_dim = 32
    transformer_ff_dim = 64
    transformer_num_layers = 1
    transformer_num_heads = 2
    transformer_kdim = 16
    transformer_vdim = 16
    output_hidden_dim = 32
    num_actions = 5
    convolution_size = 2
    fov = 3


_VMEM = pl.BlockSpec(memory_space=pltpu.MemorySpace.VMEM)
_SMEM = pl.BlockSpec(memory_space=pltpu.MemorySpace.SMEM)

_WIDE_W = 640     # lane width of the "wide" weight slab (>= 576, multiple of 128)
_NARROW_W = 128   # lane width of the "narrow" weight slab
_OUT_W = 128      # lane-dense packed output width


# ---------------------------------------------------------------------------
# Host-side precompute: conv -> dense matmul (exact), pool-friendly layout
# ---------------------------------------------------------------------------
def _conv_as_dense(w, bvec, h_in, w_in, pad, pool_permute):
    """w: (K,K,Cin,Cout) np.f32, bvec: (Cout,). Returns (mat, bias_row, h_next, w_next).

    mat maps a row-major (h,w,c)-flattened input to a row-major (h,w,c)
    flattened conv output (cross-correlation, zero padding = `pad`).
    If pool_permute, output columns are reordered into 4 contiguous quarters
    (one per 2x2-window tap), each quarter in pooled (i,j,c) order, so a
    MaxPool2d(2) becomes max of four contiguous lane slices in the kernel.
    """
    K, _, cin, cout = w.shape
    h_out = h_in + 2 * pad - K + 1
    w_out = w_in + 2 * pad - K + 1
    mat = np.zeros((h_in * w_in * cin, h_out * w_out * cout), np.float32)
    for ho in range(h_out):
        for wo in range(w_out):
            col0 = (ho * w_out + wo) * cout
            for kh in range(K):
                for kw in range(K):
                    hi, wi = ho - pad + kh, wo - pad + kw
                    if 0 <= hi < h_in and 0 <= wi < w_in:
                        row0 = (hi * w_in + wi) * cin
                        mat[row0:row0 + cin, col0:col0 + cout] += w[kh, kw]
    bias = np.tile(bvec.astype(np.float32), h_out * w_out)
    if pool_permute:
        assert h_out % 2 == 0 and w_out % 2 == 0
        hp, wp = h_out // 2, w_out // 2
        perm = []
        for ph in range(2):
            for pw in range(2):
                for i in range(hp):
                    for j in range(wp):
                        src = ((2 * i + ph) * w_out + (2 * j + pw)) * cout
                        perm.extend(range(src, src + cout))
        perm = np.asarray(perm, np.int64)
        mat = mat[:, perm]
        bias = bias[perm]
        h_out, w_out = hp, wp           # spatial dims the NEXT conv will see
    return mat, bias[None, :], h_out, w_out


def _sinusoid_table(n_position, d_hid):
    pos = np.arange(n_position)[:, None].astype(np.float64)
    hid = np.arange(d_hid)[None, :]
    table = pos / np.power(10000.0, 2 * (hid // 2) / d_hid)
    table[:, 0::2] = np.sin(table[:, 0::2])
    table[:, 1::2] = np.cos(table[:, 1::2])
    return table.astype(np.float32)            # (n_position, d_hid)


# ---------------------------------------------------------------------------
# Host-side slab packer: many small weights -> one lane-dense 2-D buffer
# ---------------------------------------------------------------------------
class _SlabPacker:
    """Packs (rows, cols<=width) f32 arrays into one (R, width) slab.

    Every entry starts at a 16-row boundary (bf16 sublane-pair aligned) and at
    lane 0, so in-kernel recovery is a cheap static slice of the slab ref.
    """

    def __init__(self, width, row_align=16):
        self.width = width
        self.align = row_align
        self.chunks = []
        self.layout = {}
        self.nrows = 0

    def add(self, name, arr):
        arr = np.asarray(arr, np.float32)
        if arr.ndim == 1:
            arr = arr[None, :]
        r, c = arr.shape
        assert c <= self.width, (name, arr.shape, self.width)
        buf = np.zeros((r, self.width), np.float32)
        buf[:, :c] = arr
        self.chunks.append(buf)
        self.layout[name] = (self.nrows, r, c)
        self.nrows += r
        pad = (-self.nrows) % self.align
        if pad:
            self.chunks.append(np.zeros((pad, self.width), np.float32))
            self.nrows += pad

    def finish(self, dtype=jnp.bfloat16):
        slab = np.concatenate(self.chunks, axis=0)
        return jnp.asarray(slab, dtype=dtype), self.layout


# ---------------------------------------------------------------------------
# The single fused kernel
# ---------------------------------------------------------------------------
def _scrimp_fused_kernel(breal_ref, data_ref, wide_ref, narrow_ref, out_ref, *,
                         layout_wide, layout_narrow, num_layers, n_head, d_k,
                         d_v, memory_dim, n_actions, msg_dim, n_obs_feat,
                         goal_in):
    f32 = jnp.float32
    bf16 = jnp.bfloat16

    def wv(name):                                           # wide bf16 slab entry
        off, r, c = layout_wide[name]
        return wide_ref[off:off + r, 0:c]

    def nv(name):                                           # narrow bf16 slab entry
        off, r, c = layout_narrow[name]
        return narrow_ref[off:off + r, 0:c]

    def wb(name):
        return wv(name).astype(f32)

    def nb(name):
        return nv(name).astype(f32)

    def mm(a, b):                                           # bf16 x bf16 -> f32 (native MXU)
        return jnp.dot(a.astype(bf16), b.astype(bf16), preferred_element_type=f32)

    def layernorm(v, g, b, eps=1e-6):                       # reference uses eps=1e-06
        mu = jnp.mean(v, axis=-1, keepdims=True)
        vc = v - mu
        var = jnp.mean(vc * vc, axis=-1, keepdims=True)
        return vc * jax.lax.rsqrt(var + eps) * g.astype(f32) + b.astype(f32)

    def gru_gate(x, y, wf, b3, ug):
        # zi = y@[Wr|Wz|Wg] + x@[Ur|Uz|0] + fused biases, via one fused matmul
        d = x.shape[1]
        zi = mm(jnp.concatenate([y, x], axis=1), wf) + b3.astype(f32)
        r = jax.nn.sigmoid(zi[:, :d])
        z = jax.nn.sigmoid(zi[:, d:2 * d])
        h = jnp.tanh(zi[:, 2 * d:] + mm(r * x, ug))
        return (1.0 - z) * x + z * h

    def pool4(v):                                           # MaxPool2d(2): 4 lane quarters
        q = v.shape[1] // 4
        return jnp.maximum(jnp.maximum(v[:, :q], v[:, q:2 * q]),
                           jnp.maximum(v[:, 2 * q:3 * q], v[:, 3 * q:]))

    # ------------------ unpack the single data slab ------------------
    data = data_ref[...]                                    # (Bp, 167) f32
    o = 0
    obs = data[:, o:o + n_obs_feat]; o += n_obs_feat
    goal = data[:, o:o + goal_in]; o += goal_in
    h0 = data[:, o:o + memory_dim]; o += memory_dim
    c0 = data[:, o:o + memory_dim]; o += memory_dim
    msg = data[:, o:o + msg_dim]; o += msg_dim
    pos = data[:, o:o + msg_dim]

    # ------------------ observation encoder ------------------
    x = jnp.maximum(mm(obs, nv("c1m")) + nb("c1b"), 0.0)    # conv(+relu) = one matmul
    x = jnp.maximum(mm(x, wv("c2m")) + wb("c2b"), 0.0)
    x = pool4(jnp.maximum(mm(x, wv("c3m")) + wb("c3b"), 0.0))
    x = jnp.maximum(mm(x, wv("c4m")) + wb("c4b"), 0.0)
    x = jnp.maximum(mm(x, wv("c5m")) + wb("c5b"), 0.0)
    x = pool4(jnp.maximum(mm(x, wv("c6m")) + wb("c6b"), 0.0))
    # conv7 + goal embedding fused into one block-diagonal matmul, both relu'd
    x = jnp.maximum(mm(jnp.concatenate([x, goal], axis=1), nv("c7g_m"))
                    + nb("c7g_b"), 0.0)                     # (Bp, N)

    h1 = jnp.maximum(mm(x, nv("mlp1_w")) + nb("mlp1_b"), 0.0)
    x = jnp.maximum(mm(h1, nv("mlp2_w")) + nb("mlp2_b") + x, 0.0)   # relu(mlp(x) + x)

    # LSTMCell: one fused [x|h0] @ [Wih;Whh] matmul, gate order i,f,g,o
    gates = mm(jnp.concatenate([x, h0], axis=1), nv("lstm_w")) + nb("lstm_b")
    H = memory_dim
    i_g = jax.nn.sigmoid(gates[:, 0:H])
    f_g = jax.nn.sigmoid(gates[:, H:2 * H])
    g_g = jnp.tanh(gates[:, 2 * H:3 * H])
    o_g = jax.nn.sigmoid(gates[:, 3 * H:4 * H])
    c_new = f_g * c0 + i_g * g_g
    h_new = o_g * jnp.tanh(c_new)

    # ------------------ communication block ------------------
    n_real = breal_ref[0]                                   # live-agent count (SMEM scalar)
    m = msg + pos                                           # positional encoding
    L = m.shape[0]
    col = jax.lax.broadcasted_iota(jnp.int32, (L, L), 1)
    key_mask = col < n_real                                 # mask padded agents as keys
    hk = n_head * d_k
    for li in range(num_layers):
        p = f"l{li}_"
        y = layernorm(m, nv(p + "ln1_g"), nv(p + "ln1_b"))
        qkv = mm(y, nv(p + "wqkv"))                         # 1/sqrt(d_k) folded into Q cols
        head_outs = []
        for hd in range(n_head):                            # heads as static lane slices
            qh = qkv[:, hd * d_k:(hd + 1) * d_k]
            kh = qkv[:, hk + hd * d_k:hk + (hd + 1) * d_k]
            vh = qkv[:, 2 * hk + hd * d_v:2 * hk + (hd + 1) * d_v]
            s = jax.lax.dot_general(qh.astype(jnp.bfloat16), kh.astype(jnp.bfloat16),
                                    (((1,), (1,)), ((), ())),
                                    preferred_element_type=f32)
            s = jnp.where(key_mask, s, -1e30)
            s = s - jnp.max(s, axis=-1, keepdims=True)
            e = jnp.exp(s)
            attn_w = e / jnp.sum(e, axis=-1, keepdims=True)  # exact softmax
            head_outs.append(mm(attn_w, vh))
        attn = mm(jnp.concatenate(head_outs, axis=1), nv(p + "wo"))

        m1 = gru_gate(m, attn, nv(p + "g1_w"), nv(p + "g1_b"), nv(p + "g1_ug"))
        y2 = layernorm(m1, nv(p + "ln2_g"), nv(p + "ln2_b"))
        ff = mm(jnp.maximum(mm(y2, nv(p + "ff1_w")) + nb(p + "ff1_b"), 0.0),
                nv(p + "ff2_w")) + nb(p + "ff2_b")
        m = gru_gate(m1, ff, nv(p + "g2_w"), nv(p + "g2_b"), nv(p + "g2_ug"))
    # TODO(synk): saved_attention host-side numpy stash (stateful side-effect) not reproduced.

    # ------------------ output heads (packed, lane-dense) ------------------
    fc_in = jnp.concatenate([m, h_new, x], axis=1)          # [message, memory, observation]
    head_h = jnp.maximum(mm(fc_in, nv("fc_w")) + nb("fc_b"), 0.0)
    yh = mm(head_h, nv("heads_w")) + nb("heads_b")          # [policy|ev|iv|blk|msg] = (Bp, 40)
    blk_col = n_actions + 2
    cidx = jax.lax.broadcasted_iota(jnp.int32, yh.shape, 1)
    yh = jnp.where(cidx == blk_col, jax.nn.sigmoid(yh), yh)  # in-place masked sigmoid

    pieces = [yh, h_new, c_new]
    total = yh.shape[1] + 2 * memory_dim
    pad = out_ref.shape[1] - total
    if pad > 0:
        pieces.append(jnp.zeros((L, pad), f32))
    out_ref[...] = jnp.concatenate(pieces, axis=1)


# ---------------------------------------------------------------------------
# JAX wrapper (glue only: layout, row padding, output slicing)
# ---------------------------------------------------------------------------
def scrimp_forward(params, obs, goal, state, message, *, layout_wide, layout_narrow):
    B = obs.shape[0]
    Bpad = ((B + 7) // 8) * 8                               # pad agents to full sublanes
    fov, cin = AP.fov, AP.num_observation_in_dim
    n_act, mem, msg_d = AP.num_actions, AP.memory_dim, AP.message_feature_dim

    obs_flat = jnp.transpose(obs.astype(jnp.float32), (0, 2, 3, 1)).reshape(B, fov * fov * cin)
    h0, c0 = state
    pos = params["pos_table"][:B]

    # One packed per-step data slab: [obs | goal | h | c | message | pos]
    data = jnp.concatenate(
        [obs_flat, goal.astype(jnp.float32), h0.astype(jnp.float32),
         c0.astype(jnp.float32), message.astype(jnp.float32), pos], axis=1)
    data = jnp.pad(data, ((0, Bpad - B), (0, 0)))
    breal = jnp.full((1,), B, jnp.int32)

    kern = functools.partial(
        _scrimp_fused_kernel,
        layout_wide=layout_wide,
        layout_narrow=layout_narrow,
        num_layers=AP.transformer_num_layers,
        n_head=AP.transformer_num_heads,
        d_k=AP.transformer_kdim,
        d_v=AP.transformer_vdim,
        memory_dim=mem,
        n_actions=n_act,
        msg_dim=msg_d,
        n_obs_feat=fov * fov * cin,
        goal_in=AP.goal_in_dim,
    )

    out = pl.pallas_call(
        kern,
        out_shape=jax.ShapeDtypeStruct((Bpad, _OUT_W), jnp.float32),
        in_specs=[_SMEM, _VMEM, _VMEM, _VMEM],
        out_specs=_VMEM,
    )(breal, data, params["wide"], params["narrow"])

    o = out[:B]
    policy = o[:, :n_act]
    ev = o[:, n_act:n_act + 1]
    iv = o[:, n_act + 1:n_act + 2]
    blocking = o[:, n_act + 2:n_act + 3]                    # already sigmoided in-kernel
    msg_out = o[:, n_act + 3:n_act + 3 + msg_d]
    hid = o[:, n_act + 3 + msg_d:n_act + 3 + msg_d + mem]
    cell = o[:, n_act + 3 + msg_d + mem:n_act + 3 + msg_d + 2 * mem]
    return {"policy_logits": policy,
            "extrinsic_value": ev,
            "intrinsic_value": iv,
            "blocking": blocking,
            "messages": msg_out,
            "state": (hid, cell)}


def make_scrimp_net(layout_wide, layout_narrow):
    @jax.jit
    def fwd(params, obs, goal, state, message):
        return scrimp_forward(params, obs, goal, state, message,
                              layout_wide=layout_wide, layout_narrow=layout_narrow)
    return fwd


# ---------------------------------------------------------------------------
# Deterministic synthetic parameter initialization + slab packing
# ---------------------------------------------------------------------------
def init_params(key):
    keys = iter(jax.random.split(key, 160))

    def w(*shape, scale=0.1):
        return np.asarray(scale * jax.random.normal(next(keys), shape, dtype=jnp.float32))

    def b(*shape):
        return np.asarray(0.01 * jax.random.normal(next(keys), shape, dtype=jnp.float32))

    N = AP.num_observation_hidden_channels
    K = AP.convolution_size
    D = AP.message_feature_dim
    mem = AP.memory_dim

    conv_defs = [                                           # (k, cin, cout, pad, pooled-after)
        (K, AP.num_observation_in_dim, N // 4, 1, False),
        (K, N // 4, N // 4, 1, False),
        (K, N // 4, N // 4, 1, True),
        (K, N // 4, N // 2, 1, False),
        (K, N // 2, N // 2, 1, False),
        (K, N // 2, N // 2, 1, True),
        (AP.fov, N // 2, N - AP.goal_embedding_size, 0, False),
    ]
    conv_mats, conv_biases = [], []
    h_cur = w_cur = AP.fov
    for (k, ci, co, pad, pooled) in conv_defs:
        mat, brow, h_cur, w_cur = _conv_as_dense(w(k, k, ci, co), b(co),
                                                 h_cur, w_cur, pad, pooled)
        conv_mats.append(mat)
        conv_biases.append(brow)
    assert h_cur == 1 and w_cur == 1, "conv/pool chain must end at 1x1"

    goal_w = w(AP.goal_in_dim, AP.goal_embedding_size)
    goal_b = b(1, AP.goal_embedding_size)
    # conv7 + goal embedding as one block-diagonal weight (inputs [conv6_out | goal])
    c7m, c7b = conv_mats[6], conv_biases[6]
    c7g_m = np.zeros((c7m.shape[0] + AP.goal_in_dim, c7m.shape[1] + AP.goal_embedding_size),
                     np.float32)
    c7g_m[:c7m.shape[0], :c7m.shape[1]] = c7m
    c7g_m[c7m.shape[0]:, c7m.shape[1]:] = goal_w
    c7g_b = np.concatenate([c7b, goal_b], axis=1)

    mlp1_w, mlp1_b = w(N, N), b(1, N)
    mlp2_w, mlp2_b = w(N, N), b(1, N)

    lstm_wih = w(N, 4 * mem)
    lstm_whh = w(mem, 4 * mem)
    lstm_w = np.concatenate([lstm_wih, lstm_whh], axis=0)   # rows match [x | h0]
    lstm_b = b(1, 4 * mem)                                  # b_ih + b_hh folded (synthetic)

    def gru_params(d):
        wr, ur, wz, uz, wg, ug = (w(d, d) for _ in range(6))
        bwr, bur, bwz, buz, bwg, bug = (b(d) for _ in range(6))
        bg = np.full((d,), 2.0, np.float32)                 # torch init: bg = 2
        w3 = np.concatenate([wr, wz, wg], axis=1)           # applied to y
        u_pad = np.concatenate([ur, uz, np.zeros((d, d), np.float32)], axis=1)  # applied to x
        wf = np.concatenate([w3, u_pad], axis=0)            # rows match [y | x]
        b3 = np.concatenate([bwr + bur, bwz + buz - bg, bwg + bug])[None, :]
        return wf, b3, ug

    inv_temp = 1.0 / float(AP.transformer_kdim) ** 0.5
    hk = AP.transformer_num_heads * AP.transformer_kdim
    hv = AP.transformer_num_heads * AP.transformer_vdim

    layers = []
    for _ in range(AP.transformer_num_layers):
        wq, wk, wvv = w(D, hk), w(D, hk), w(D, hv)
        wqkv = np.concatenate([wq * inv_temp, wk, wvv], axis=1)   # temperature folded into Q
        layers.append({
            "ln1_g": np.ones((1, D), np.float32), "ln1_b": np.zeros((1, D), np.float32),
            "wqkv": wqkv, "wo": w(hv, D),
            "g1": gru_params(D),
            "ln2_g": np.ones((1, D), np.float32), "ln2_b": np.zeros((1, D), np.float32),
            "ff1_w": w(D, AP.transformer_ff_dim), "ff1_b": b(1, AP.transformer_ff_dim),
            "ff2_w": w(AP.transformer_ff_dim, D), "ff2_b": b(1, D),
            "g2": gru_params(D),
        })

    oh = AP.output_hidden_dim
    heads_in = N + mem + D
    fc_w, fc_b = w(heads_in, oh), b(1, oh)
    heads_w = np.concatenate([w(oh, AP.num_actions), w(oh, 1), w(oh, 1), w(oh, 1),
                              w(oh, D)], axis=1)
    heads_b = np.concatenate([b(AP.num_actions), b(1), b(1), b(1), b(D)])[None, :]

    # -------- pack everything into two bf16 slabs (2 weight DMAs total) ----
    wide = _SlabPacker(_WIDE_W)
    for i in range(1, 6):                                   # conv2..conv6 (the big ones)
        wide.add(f"c{i + 1}m", conv_mats[i])
        wide.add(f"c{i + 1}b", conv_biases[i])
    wide_slab, layout_wide = wide.finish(jnp.bfloat16)

    narrow = _SlabPacker(_NARROW_W)
    narrow.add("c1m", conv_mats[0]); narrow.add("c1b", conv_biases[0])
    narrow.add("c7g_m", c7g_m); narrow.add("c7g_b", c7g_b)
    narrow.add("mlp1_w", mlp1_w); narrow.add("mlp1_b", mlp1_b)
    narrow.add("mlp2_w", mlp2_w); narrow.add("mlp2_b", mlp2_b)
    narrow.add("lstm_w", lstm_w); narrow.add("lstm_b", lstm_b)
    for li, lp in enumerate(layers):
        p = f"l{li}_"
        narrow.add(p + "ln1_g", lp["ln1_g"]); narrow.add(p + "ln1_b", lp["ln1_b"])
        narrow.add(p + "wqkv", lp["wqkv"]); narrow.add(p + "wo", lp["wo"])
        narrow.add(p + "g1_w", lp["g1"][0]); narrow.add(p + "g1_b", lp["g1"][1])
        narrow.add(p + "g1_ug", lp["g1"][2])
        narrow.add(p + "ln2_g", lp["ln2_g"]); narrow.add(p + "ln2_b", lp["ln2_b"])
        narrow.add(p + "ff1_w", lp["ff1_w"]); narrow.add(p + "ff1_b", lp["ff1_b"])
        narrow.add(p + "ff2_w", lp["ff2_w"]); narrow.add(p + "ff2_b", lp["ff2_b"])
        narrow.add(p + "g2_w", lp["g2"][0]); narrow.add(p + "g2_b", lp["g2"][1])
        narrow.add(p + "g2_ug", lp["g2"][2])
    narrow.add("fc_w", fc_w); narrow.add("fc_b", fc_b)
    narrow.add("heads_w", heads_w); narrow.add("heads_b", heads_b)
    narrow_slab, layout_narrow = narrow.finish(jnp.bfloat16)

    params = {"wide": wide_slab, "narrow": narrow_slab,
              "pos_table": jnp.asarray(_sinusoid_table(1024, D))}
    return params, layout_wide, layout_narrow


# ---------------------------------------------------------------------------
if __name__ == "__main__":
    master = jax.random.PRNGKey(0)
    k_params, kx, kg, kh, kc, km = jax.random.split(master, 6)
    params, layout_wide, layout_narrow = init_params(k_params)
    scrimp_net = make_scrimp_net(layout_wide, layout_narrow)

    B = 4
    obs = jax.random.normal(kx, (B, AP.num_observation_in_dim, AP.fov, AP.fov),
                            dtype=jnp.float32)
    goal = jax.random.normal(kg, (B, AP.goal_in_dim), dtype=jnp.float32)
    h0 = jax.random.normal(kh, (B, AP.memory_dim), dtype=jnp.float32)
    c0 = jax.random.normal(kc, (B, AP.memory_dim), dtype=jnp.float32)
    message = jax.random.normal(km, (B, AP.message_feature_dim), dtype=jnp.float32)

    out = scrimp_net(params, obs, goal, (h0, c0), message)
    out = jax.block_until_ready(out)

    assert out["policy_logits"].shape == (B, AP.num_actions)
    assert out["extrinsic_value"].shape == (B, 1)
    assert out["intrinsic_value"].shape == (B, 1)
    assert out["blocking"].shape == (B, 1)
    assert out["messages"].shape == (B, AP.message_feature_dim)
    assert out["state"][0].shape == (B, AP.memory_dim)
    assert out["state"][1].shape == (B, AP.memory_dim)
    assert bool(jnp.all(jnp.isfinite(out["policy_logits"])))
    assert bool(jnp.all(jnp.isfinite(out["messages"])))
    assert bool(jnp.all((out["blocking"] >= 0.0) & (out["blocking"] <= 1.0)))

    print("KERNEL_OK")
</pallas_src>

<mosaic_0001>
module attributes {stable_mosaic.version = 11 : i64} {
  func.func @_scrimp_fused_kernel(%arg0: memref<1xi32, #tpu.memory_space<smem>>, %arg1: memref<8x167xf32, #tpu.memory_space<vmem>>, %arg2: memref<1152x640xbf16, #tpu.memory_space<vmem>>, %arg3: memref<1056x128xbf16, #tpu.memory_space<vmem>>, %arg4: memref<8x128xf32, #tpu.memory_space<vmem>>) attributes {dimension_semantics = [], scalar_prefetch = 0 : i64, scratch_operands = 0 : i64, tpu.core_type = #tpu.core_type<tc>} {
    %c0 = arith.constant 0 : index
    %c0_0 = arith.constant 0 : index
    %0 = vector.load %arg1[%c0, %c0_0] : memref<8x167xf32, #tpu.memory_space<vmem>>, vector<8x167xf32>
    %1 = vector.extract_strided_slice %0 {offsets = [0, 0], sizes = [8, 36], strides = [1, 1]} : vector<8x167xf32> to vector<8x36xf32>
    %2 = vector.extract_strided_slice %0 {offsets = [0, 36], sizes = [8, 3], strides = [1, 1]} : vector<8x167xf32> to vector<8x3xf32>
    %3 = vector.extract_strided_slice %0 {offsets = [0, 39], sizes = [8, 32], strides = [1, 1]} : vector<8x167xf32> to vector<8x32xf32>
    %4 = vector.extract_strided_slice %0 {offsets = [0, 71], sizes = [8, 32], strides = [1, 1]} : vector<8x167xf32> to vector<8x32xf32>
    %5 = vector.extract_strided_slice %0 {offsets = [0, 103], sizes = [8, 32], strides = [1, 1]} : vector<8x167xf32> to vector<8x32xf32>
    %6 = vector.extract_strided_slice %0 {offsets = [0, 135], sizes = [8, 32], strides = [1, 1]} : vector<8x167xf32> to vector<8x32xf32>
    %c0_1 = arith.constant 0 : index
    %c0_2 = arith.constant 0 : index
    %7 = vector.load %arg3[%c0_1, %c0_2] : memref<1056x128xbf16, #tpu.memory_space<vmem>>, vector<36x128xbf16>
    %8 = arith.truncf %1 : vector<8x36xf32> to vector<8x36xbf16>
    %cst = arith.constant dense<0.000000e+00> : vector<8x128xf32>
    %9 = tpu.matmul %8, %7, %cst {dimension_numbers = #tpu.dot_dimension_numbers<[1], [0], [0], [1], [0, 0, 1, 1], [], []>} : vector<8x36xbf16>, vector<36x128xbf16>, vector<8x128xf32> -> vector<8x128xf32>
    %c48 = arith.constant 48 : index
    %c0_3 = arith.constant 0 : index
    %10 = vector.load %arg3[%c48, %c0_3] : memref<1056x128xbf16, #tpu.memory_space<vmem>>, vector<1x128xbf16>
    %11 = arith.extf %10 : vector<1x128xbf16> to vector<1x128xf32>
    %12 = vector.broadcast %11 : vector<1x128xf32> to vector<8x128xf32>
    %13 = arith.addf %9, %12 : vector<8x128xf32>
    %cst_4 = arith.constant 0.000000e+00 : f32
    %14 = vector.broadcast %cst_4 : f32 to vector<8x128xf32>
    %15 = arith.maximumf %13, %14 : vector<8x128xf32>
    %c0_5 = arith.constant 0 : index
    %c0_6 = arith.constant 0 : index
    %16 = vector.load %arg2[%c0_5, %c0_6] : memref<1152x640xbf16, #tpu.memory_space<vmem>>, vector<128x200xbf16>
    %17 = arith.truncf %15 : vector<8x128xf32> to vector<8x128xbf16>
    %cst_7 = arith.constant dense<0.000000e+00> : vector<8x200xf32>
    %18 = tpu.matmul %17, %16, %cst_7 {dimension_numbers = #tpu.dot_dimension_numbers<[1], [0], [0], [1], [0, 0, 1, 1], [], []>} : vector<8x128xbf16>, vector<128x200xbf16>, vector<8x200xf32> -> vector<8x200xf32>
    %c128 = arith.constant 128 : index
    %c0_8 = arith.constant 0 : index
    %19 = vector.load %arg2[%c128, %c0_8] : memref<1152x640xbf16, #tpu.memory_space<vmem>>, vector<1x200xbf16>
    %20 = arith.extf %19 : vector<1x200xbf16> to vector<1x200xf32>
    %21 = vector.broadcast %20 : vector<1x200xf32> to vector<8x200xf32>
    %22 = arith.addf %18, %21 : vector<8x200xf32>
    %cst_9 = arith.constant 0.000000e+00 : f32
    %23 = vector.broadcast %cst_9 : f32 to vector<8x200xf32>
    %24 = arith.maximumf %22, %23 : vector<8x200xf32>
    %c144 = arith.constant 144 : index
    %c0_10 = arith.constant 0 : index
    %25 = vector.load %arg2[%c144, %c0_10] : memref<1152x640xbf16, #tpu.memory_space<vmem>>, vector<200x288xbf16>
    %26 = arith.truncf %24 : vector<8x200xf32> to vector<8x200xbf16>
    %cst_11 = arith.constant dense<0.000000e+00> : vector<8x288xf32>
    %27 = tpu.matmul %26, %25, %cst_11 {dimension_numbers = #tpu.dot_dimension_numbers<[1], [0], [0], [1], [0, 0, 1, 1], [], []>} : vector<8x200xbf16>, vector<200x288xbf16>, vector<8x288xf32> -> vector<8x288xf32>
    %c352 = arith.constant 352 : index
    %c0_12 = arith.constant 0 : index
    %28 = vector.load %arg2[%c352, %c0_12] : memref<1152x640xbf16, #tpu.memory_space<vmem>>, vector<1x288xbf16>
    %29 = arith.extf %28 : vector<1x288xbf16> to vector<1x288xf32>
    %30 = vector.broadcast %29 : vector<1x288xf32> to vector<8x288xf32>
    %31 = arith.addf %27, %30 : vector<8x288xf32>
    %cst_13 = arith.constant 0.000000e+00 : f32
    %32 = vector.broadcast %cst_13 : f32 to vector<8x288xf32>
    %33 = arith.maximumf %31, %32 : vector<8x288xf32>
    %34 = vector.extract_strided_slice %33 {offsets = [0, 0], sizes = [8, 72], strides = [1, 1]} : vector<8x288xf32> to vector<8x72xf32>
    %35 = vector.extract_strided_slice %33 {offsets = [0, 72], sizes = [8, 72], strides = [1, 1]} : vector<8x288xf32> to vector<8x72xf32>
    %36 = arith.maximumf %34, %35 : vector<8x72xf32>
    %37 = vector.extract_strided_slice %33 {offsets = [0, 144], sizes = [8, 72], strides = [1, 1]} : vector<8x288xf32> to vector<8x72xf32>
    %38 = vector.extract_strided_slice %33 {offsets = [0, 216], sizes = [8, 72], strides = [1, 1]} : vector<8x288xf32> to vector<8x72xf32>
    %39 = arith.maximumf %37, %38 : vector<8x72xf32>
    %40 = arith.maximumf %36, %39 : vector<8x72xf32>
    %c368 = arith.constant 368 : index
    %c0_14 = arith.constant 0 : index
    %41 = vector.load %arg2[%c368, %c0_14] : memref<1152x640xbf16, #tpu.memory_space<vmem>>, vector<72x256xbf16>
    %42 = arith.truncf %40 : vector<8x72xf32> to vector<8x72xbf16>
    %cst_15 = arith.constant dense<0.000000e+00> : vector<8x256xf32>
    %43 = tpu.matmul %42, %41, %cst_15 {dimension_numbers = #tpu.dot_dimension_numbers<[1], [0], [0], [1], [0, 0, 1, 1], [], []>} : vector<8x72xbf16>, vector<72x256xbf16>, vector<8x256xf32> -> vector<8x256xf32>
    %c448 = arith.constant 448 : index
    %c0_16 = arith.constant 0 : index
    %44 = vector.load %arg2[%c448, %c0_16] : memref<1152x640xbf16, #tpu.memory_space<vmem>>, vector<1x256xbf16>
    %45 = arith.extf %44 : vector<1x256xbf16> to vector<1x256xf32>
    %46 = vector.broadcast %45 : vector<1x256xf32> to vector<8x256xf32>
    %47 = arith.addf %43, %46 : vector<8x256xf32>
    %cst_17 = arith.constant 0.000000e+00 : f32
    %48 = vector.broadcast %cst_17 : f32 to vector<8x256xf32>
    %49 = arith.maximumf %47, %48 : vector<8x256xf32>
    %c464 = arith.constant 464 : index
    %c0_18 = arith.constant 0 : index
    %50 = vector.load %arg2[%c464, %c0_18] : memref<1152x640xbf16, #tpu.memory_space<vmem>>, vector<256x400xbf16>
    %51 = arith.truncf %49 : vector<8x256xf32> to vector<8x256xbf16>
    %cst_19 = arith.constant dense<0.000000e+00> : vector<8x400xf32>
    %52 = tpu.matmul %51, %50, %cst_19 {dimension_numbers = #tpu.dot_dimension_numbers<[1], [0], [0], [1], [0, 0, 1, 1], [], []>} : vector<8x256xbf16>, vector<256x400xbf16>, vector<8x400xf32> -> vector<8x400xf32>
    %c720 = arith.constant 720 : index
    %c0_20 = arith.constant 0 : index
    %53 = vector.load %arg2[%c720, %c0_20] : memref<1152x640xbf16, #tpu.memory_space<vmem>>, vector<1x400xbf16>
    %54 = arith.extf %53 : vector<1x400xbf16> to vector<1x400xf32>
    %55 = vector.broadcast %54 : vector<1x400xf32> to vector<8x400xf32>
    %56 = arith.addf %52, %55 : vector<8x400xf32>
    %cst_21 = arith.constant 0.000000e+00 : f32
    %57 = vector.broadcast %cst_21 : f32 to vector<8x400xf32>
    %58 = arith.maximumf %56, %57 : vector<8x400xf32>
    %c736 = arith.constant 736 : index
    %c0_22 = arith.constant 0 : index
    %59 = vector.load %arg2[%c736, %c0_22] : memref<1152x640xbf16, #tpu.memory_space<vmem>>, vector<400x576xbf16>
    %60 = arith.truncf %58 : vector<8x400xf32> to vector<8x400xbf16>
    %cst_23 = arith.constant dense<0.000000e+00> : vector<8x576xf32>
    %61 = tpu.matmul %60, %59, %cst_23 {dimension_numbers = #tpu.dot_dimension_numbers<[1], [0], [0], [1], [0, 0, 1, 1], [], []>} : vector<8x400xbf16>, vector<400x576xbf16>, vector<8x576xf32> -> vector<8x576xf32>
    %c1136 = arith.constant 1136 : index
    %c0_24 = arith.constant 0 : index
    %62 = vector.load %arg2[%c1136, %c0_24] : memref<1152x640xbf16, #tpu.memory_space<vmem>>, vector<1x576xbf16>
    %63 = arith.extf %62 : vector<1x576xbf16> to vector<1x576xf32>
    %64 = vector.broadcast %63 : vector<1x576xf32> to vector<8x576xf32>
    %65 = arith.addf %61, %64 : vector<8x576xf32>
    %cst_25 = arith.constant 0.000000e+00 : f32
    %66 = vector.broadcast %cst_25 : f32 to vector<8x576xf32>
    %67 = arith.maximumf %65, %66 : vector<8x576xf32>
    %68 = vector.extract_strided_slice %67 {offsets = [0, 0], sizes = [8, 144], strides = [1, 1]} : vector<8x576xf32> to vector<8x144xf32>
    %69 = vector.extract_strided_slice %67 {offsets = [0, 144], sizes = [8, 144], strides = [1, 1]} : vector<8x576xf32> to vector<8x144xf32>
    %70 = arith.maximumf %68, %69 : vector<8x144xf32>
    %71 = vector.extract_strided_slice %67 {offsets = [0, 288], sizes = [8, 144], strides = [1, 1]} : vector<8x576xf32> to vector<8x144xf32>
    %72 = vector.extract_strided_slice %67 {offsets = [0, 432], sizes = [8, 144], strides = [1, 1]} : vector<8x576xf32> to vector<8x144xf32>
    %73 = arith.maximumf %71, %72 : vector<8x144xf32>
    %74 = arith.maximumf %70, %73 : vector<8x144xf32>
    %75 = tpu.concatenate %74, %2 in 1 : vector<8x144xf32>, vector<8x3xf32> -> vector<8x147xf32>
    %c64 = arith.constant 64 : index
    %c0_26 = arith.constant 0 : index
    %76 = vector.load %arg3[%c64, %c0_26] : memref<1056x128xbf16, #tpu.memory_space<vmem>>, vector<147x32xbf16>
    %77 = arith.truncf %75 : vector<8x147xf32> to vector<8x147xbf16>
    %cst_27 = arith.constant dense<0.000000e+00> : vector<8x32xf32>
    %78 = tpu.matmul %77, %76, %cst_27 {dimension_numbers = #tpu.dot_dimension_numbers<[1], [0], [0], [1], [0, 0, 1, 1], [], []>} : vector<8x147xbf16>, vector<147x32xbf16>, vector<8x32xf32> -> vector<8x32xf32>
    %c224 = arith.constant 224 : index
    %c0_28 = arith.constant 0 : index
    %79 = vector.load %arg3[%c224, %c0_28] : memref<1056x128xbf16, #tpu.memory_space<vmem>>, vector<1x32xbf16>
    %80 = arith.extf %79 : vector<1x32xbf16> to vector<1x32xf32>
    %81 = vector.broadcast %80 : vector<1x32xf32> to vector<8x32xf32>
    %82 = arith.addf %78, %81 : vector<8x32xf32>
    %cst_29 = arith.constant 0.000000e+00 : f32
    %83 = vector.broadcast %cst_29 : f32 to vector<8x32xf32>
    %84 = arith.maximumf %82, %83 : vector<8x32xf32>
    %c240 = arith.constant 240 : index
    %c0_30 = arith.constant 0 : index
    %85 = vector.load %arg3[%c240, %c0_30] : memref<1056x128xbf16, #tpu.memory_space<vmem>>, vector<32x32xbf16>
    %86 = arith.truncf %84 : vector<8x32xf32> to vector<8x32xbf16>
    %cst_31 = arith.constant dense<0.000000e+00> : vector<8x32xf32>
    %87 = tpu.matmul %86, %85, %cst_31 {dimension_numbers = #tpu.dot_dimension_numbers<[1], [0], [0], [1], [0, 0, 1, 1], [], []>} : vector<8x32xbf16>, vector<32x32xbf16>, vector<8x32xf32> -> vector<8x32xf32>
    %c272 = arith.constant 272 : index
    %c0_32 = arith.constant 0 : index
    %88 = vector.load %arg3[%c272, %c0_32] : memref<1056x128xbf16, #tpu.memory_space<vmem>>, vector<1x32xbf16>
    %89 = arith.extf %88 : vector<1x32xbf16> to vector<1x32xf32>
    %90 = vector.broadcast %89 : vector<1x32xf32> to vector<8x32xf32>
    %91 = arith.addf %87, %90 : vector<8x32xf32>
    %cst_33 = arith.constant 0.000000e+00 : f32
    %92 = vector.broadcast %cst_33 : f32 to vector<8x32xf32>
    %93 = arith.maximumf %91, %92 : vector<8x32xf32>
    %c288 = arith.constant 288 : index
    %c0_34 = arith.constant 0 : index
    %94 = vector.load %arg3[%c288, %c0_34] : memref<1056x128xbf16, #tpu.memory_space<vmem>>, vector<32x32xbf16>
    %95 = arith.truncf %93 : vector<8x32xf32> to vector<8x32xbf16>
    %cst_35 = arith.constant dense<0.000000e+00> : vector<8x32xf32>
    %96 = tpu.matmul %95, %94, %cst_35 {dimension_numbers = #tpu.dot_dimension_numbers<[1], [0], [0], [1], [0, 0, 1, 1], [], []>} : vector<8x32xbf16>, vector<32x32xbf16>, vector<8x32xf32> -> vector<8x32xf32>
    %c320 = arith.constant 320 : index
    %c0_36 = arith.constant 0 : index
    %97 = vector.load %arg3[%c320, %c0_36] : memref<1056x128xbf16, #tpu.memory_space<vmem>>, vector<1x32xbf16>
    %98 = arith.extf %97 : vector<1x32xbf16> to vector<1x32xf32>
    %99 = vector.broadcast %98 : vector<1x32xf32> to vector<8x32xf32>
    %100 = arith.addf %96, %99 : vector<8x32xf32>
    %101 = arith.addf %100, %84 : vector<8x32xf32>
    %cst_37 = arith.constant 0.000000e+00 : f32
    %102 = vector.broadcast %cst_37 : f32 to vector<8x32xf32>
    %103 = arith.maximumf %101, %102 : vector<8x32xf32>
    %104 = tpu.concatenate %103, %3 in 1 : vector<8x32xf32>, vector<8x32xf32> -> vector<8x64xf32>
    %c336 = arith.constant 336 : index
    %c0_38 = arith.constant 0 : index
    %105 = vector.load %arg3[%c336, %c0_38] : memref<1056x128xbf16, #tpu.memory_space<vmem>>, vector<64x128xbf16>
    %106 = arith.truncf %104 : vector<8x64xf32> to vector<8x64xbf16>
    %cst_39 = arith.constant dense<0.000000e+00> : vector<8x128xf32>
    %107 = tpu.matmul %106, %105, %cst_39 {dimension_numbers = #tpu.dot_dimension_numbers<[1], [0], [0], [1], [0, 0, 1, 1], [], []>} : vector<8x64xbf16>, vector<64x128xbf16>, vector<8x128xf32> -> vector<8x128xf32>
    %c400 = arith.constant 400 : index
    %c0_40 = arith.constant 0 : index
    %108 = vector.load %arg3[%c400, %c0_40] : memref<1056x128xbf16, #tpu.memory_space<vmem>>, vector<1x128xbf16>
    %109 = arith.extf %108 : vector<1x128xbf16> to vector<1x128xf32>
    %110 = vector.broadcast %109 : vector<1x128xf32> to vector<8x128xf32>
    %111 = arith.addf %107, %110 : vector<8x128xf32>
    %112 = vector.extract_strided_slice %111 {offsets = [0, 0], sizes = [8, 32], strides = [1, 1]} : vector<8x128xf32> to vector<8x32xf32>
    %113 = arith.negf %112 : vector<8x32xf32>
    %114 = math.exp %113 : vector<8x32xf32>
    %cst_41 = arith.constant 1.000000e+00 : f32
    %115 = vector.broadcast %cst_41 : f32 to vector<8x32xf32>
    %116 = arith.addf %115, %114 : vector<8x32xf32>
    %117 = arith.divf %115, %116 : vector<8x32xf32>
    %118 = vector.extract_strided_slice %111 {offsets = [0, 32], sizes = [8, 32], strides = [1, 1]} : vector<8x128xf32> to vector<8x32xf32>
    %119 = arith.negf %118 : vector<8x32xf32>
    %120 = math.exp %119 : vector<8x32xf32>
    %cst_42 = arith.constant 1.000000e+00 : f32
    %121 = vector.broadcast %cst_42 : f32 to vector<8x32xf32>
    %122 = arith.addf %121, %120 : vector<8x32xf32>
    %123 = arith.divf %121, %122 : vector<8x32xf32>
    %124 = vector.extract_strided_slice %111 {offsets = [0, 64], sizes = [8, 32], strides = [1, 1]} : vector<8x128xf32> to vector<8x32xf32>
    %125 = math.tanh %124 : vector<8x32xf32>
    %126 = vector.extract_strided_slice %111 {offsets = [0, 96], sizes = [8, 32], strides = [1, 1]} : vector<8x128xf32> to vector<8x32xf32>
    %127 = arith.negf %126 : vector<8x32xf32>
    %128 = math.exp %127 : vector<8x32xf32>
    %cst_43 = arith.constant 1.000000e+00 : f32
    %129 = vector.broadcast %cst_43 : f32 to vector<8x32xf32>
    %130 = arith.addf %129, %128 : vector<8x32xf32>
    %131 = arith.divf %129, %130 : vector<8x32xf32>
    %132 = arith.mulf %123, %4 : vector<8x32xf32>
    %133 = arith.mulf %117, %125 : vector<8x32xf32>
    %134 = arith.addf %132, %133 : vector<8x32xf32>
    %135 = math.tanh %134 : vector<8x32xf32>
    %136 = arith.mulf %131, %135 : vector<8x32xf32>
    %c0_44 = arith.constant 0 : index
    %137 = memref.load %arg0[%c0_44] : memref<1xi32, #tpu.memory_space<smem>>
    %138 = arith.addf %5, %6 : vector<8x32xf32>
    %139 = tpu.iota {dimensions = array<i32: 1>} : vector<8x8xi32>
    %140 = vector.broadcast %137 : i32 to vector<8x8xi32>
    %141 = arith.cmpi slt, %139, %140 : vector<8x8xi32>
    %c416 = arith.constant 416 : index
    %c0_45 = arith.constant 0 : index
    %142 = vector.load %arg3[%c416, %c0_45] : memref<1056x128xbf16, #tpu.memory_space<vmem>>, vector<1x32xbf16>
    %c432 = arith.constant 432 : index
    %c0_46 = arith.constant 0 : index
    %143 = vector.load %arg3[%c432, %c0_46] : memref<1056x128xbf16, #tpu.memory_space<vmem>>, vector<1x32xbf16>
    %cst_47 = arith.constant dense<0.000000e+00> : vector<8xf32>
    %144 = vector.multi_reduction <add>, %138, %cst_47 [1] : vector<8x32xf32> to vector<8xf32>
    %145 = vector.shape_cast %144 : vector<8xf32> to vector<8x1xf32>
    %cst_48 = arith.constant 3.200000e+01 : f32
    %146 = vector.broadcast %cst_48 : f32 to vector<8x1xf32>
    %147 = arith.divf %145, %146 : vector<8x1xf32>
    %148 = vector.broadcast %147 : vector<8x1xf32> to vector<8x32xf32>
    %149 = arith.subf %138, %148 : vector<8x32xf32>
    %150 = arith.mulf %149, %149 : vector<8x32xf32>
    %cst_49 = arith.constant dense<0.000000e+00> : vector<8xf32>
    %151 = vector.multi_reduction <add>, %150, %cst_49 [1] : vector<8x32xf32> to vector<8xf32>
    %152 = vector.shape_cast %151 : vector<8xf32> to vector<8x1xf32>
    %cst_50 = arith.constant 3.200000e+01 : f32
    %153 = vector.broadcast %cst_50 : f32 to vector<8x1xf32>
    %154 = arith.divf %152, %153 : vector<8x1xf32>
    %cst_51 = arith.constant 9.99999997E-7 : f32
    %155 = vector.broadcast %cst_51 : f32 to vector<8x1xf32>
    %156 = arith.addf %154, %155 : vector<8x1xf32>
    %157 = math.rsqrt %156 : vector<8x1xf32>
    %158 = vector.broadcast %157 : vector<8x1xf32> to vector<8x32xf32>
    %159 = arith.mulf %149, %158 : vector<8x32xf32>
    %160 = arith.extf %142 : vector<1x32xbf16> to vector<1x32xf32>
    %161 = vector.broadcast %160 : vector<1x32xf32> to vector<8x32xf32>
    %162 = arith.mulf %159, %161 : vector<8x32xf32>
    %163 = arith.extf %143 : vector<1x32xbf16> to vector<1x32xf32>
    %164 = vector.broadcast %163 : vector<1x32xf32> to vector<8x32xf32>
    %165 = arith.addf %162, %164 : vector<8x32xf32>
    %c448_52 = arith.constant 448 : index
    %c0_53 = arith.constant 0 : index
    %166 = vector.load %arg3[%c448_52, %c0_53] : memref<1056x128xbf16, #tpu.memory_space<vmem>>, vector<32x96xbf16>
    %167 = arith.truncf %165 : vector<8x32xf32> to vector<8x32xbf16>
    %cst_54 = arith.constant dense<0.000000e+00> : vector<8x96xf32>
    %168 = tpu.matmul %167, %166, %cst_54 {dimension_numbers = #tpu.dot_dimension_numbers<[1], [0], [0], [1], [0, 0, 1, 1], [], []>} : vector<8x32xbf16>, vector<32x96xbf16>, vector<8x96xf32> -> vector<8x96xf32>
    %169 = vector.extract_strided_slice %168 {offsets = [0, 0], sizes = [8, 16], strides = [1, 1]} : vector<8x96xf32> to vector<8x16xf32>
    %170 = vector.extract_strided_slice %168 {offsets = [0, 32], sizes = [8, 16], strides = [1, 1]} : vector<8x96xf32> to vector<8x16xf32>
    %171 = vector.extract_strided_slice %168 {offsets = [0, 64], sizes = [8, 16], strides = [1, 1]} : vector<8x96xf32> to vector<8x16xf32>
    %172 = arith.truncf %169 : vector<8x16xf32> to vector<8x16xbf16>
    %173 = arith.truncf %170 : vector<8x16xf32> to vector<8x16xbf16>
    %cst_55 = arith.constant dense<0.000000e+00> : vector<8x8xf32>
    %174 = tpu.matmul %172, %173, %cst_55 {dimension_numbers = #tpu.dot_dimension_numbers<[1], [1], [0], [0], [0, 0, 1, 0], [], []>} : vector<8x16xbf16>, vector<8x16xbf16>, vector<8x8xf32> -> vector<8x8xf32>
    %cst_56 = arith.constant -1.000000e+30 : f32
    %175 = vector.broadcast %cst_56 : f32 to vector<8x8xf32>
    %176 = arith.select %141, %174, %175 : vector<8x8xi1>, vector<8x8xf32>
    %cst_57 = arith.constant dense<0xFF800000> : vector<8xf32>
    %177 = vector.multi_reduction <maximumf>, %176, %cst_57 [1] : vector<8x8xf32> to vector<8xf32>
    %178 = vector.shape_cast %177 : vector<8xf32> to vector<8x1xf32>
    %179 = vector.broadcast %178 : vector<8x1xf32> to vector<8x8xf32>
    %180 = arith.subf %176, %179 : vector<8x8xf32>
    %181 = math.exp %180 : vector<8x8xf32>
    %cst_58 = arith.constant dense<0.000000e+00> : vector<8xf32>
    %182 = vector.multi_reduction <add>, %181, %cst_58 [1] : vector<8x8xf32> to vector<8xf32>
    %183 = vector.shape_cast %182 : vector<8xf32> to vector<8x1xf32>
    %184 = vector.broadcast %183 : vector<8x1xf32> to vector<8x8xf32>
    %185 = arith.divf %181, %184 : vector<8x8xf32>
    %186 = arith.truncf %185 : vector<8x8xf32> to vector<8x8xbf16>
    %187 = arith.truncf %171 : vector<8x16xf32> to vector<8x16xbf16>
    %cst_59 = arith.constant dense<0.000000e+00> : vector<8x16xf32>
    %188 = tpu.matmul %186, %187, %cst_59 {dimension_numbers = #tpu.dot_dimension_numbers<[1], [0], [0], [1], [0, 0, 1, 1], [], []>} : vector<8x8xbf16>, vector<8x16xbf16>, vector<8x16xf32> -> vector<8x16xf32>
    %189 = vector.extract_strided_slice %168 {offsets = [0, 16], sizes = [8, 16], strides = [1, 1]} : vector<8x96xf32> to vector<8x16xf32>
    %190 = vector.extract_strided_slice %168 {offsets = [0, 48], sizes = [8, 16], strides = [1, 1]} : vector<8x96xf32> to vector<8x16xf32>
    %191 = vector.extract_strided_slice %168 {offsets = [0, 80], sizes = [8, 16], strides = [1, 1]} : vector<8x96xf32> to vector<8x16xf32>
    %192 = arith.truncf %189 : vector<8x16xf32> to vector<8x16xbf16>
    %193 = arith.truncf %190 : vector<8x16xf32> to vector<8x16xbf16>
    %cst_60 = arith.constant dense<0.000000e+00> : vector<8x8xf32>
    %194 = tpu.matmul %192, %193, %cst_60 {dimension_numbers = #tpu.dot_dimension_numbers<[1], [1], [0], [0], [0, 0, 1, 0], [], []>} : vector<8x16xbf16>, vector<8x16xbf16>, vector<8x8xf32> -> vector<8x8xf32>
    %cst_61 = arith.constant -1.000000e+30 : f32
    %195 = vector.broadcast %cst_61 : f32 to vector<8x8xf32>
    %196 = arith.select %141, %194, %195 : vector<8x8xi1>, vector<8x8xf32>
    %cst_62 = arith.constant dense<0xFF800000> : vector<8xf32>
    %197 = vector.multi_reduction <maximumf>, %196, %cst_62 [1] : vector<8x8xf32> to vector<8xf32>
    %198 = vector.shape_cast %197 : vector<8xf32> to vector<8x1xf32>
    %199 = vector.broadcast %198 : vector<8x1xf32> to vector<8x8xf32>
    %200 = arith.subf %196, %199 : vector<8x8xf32>
    %201 = math.exp %200 : vector<8x8xf32>
    %cst_63 = arith.constant dense<0.000000e+00> : vector<8xf32>
    %202 = vector.multi_reduction <add>, %201, %cst_63 [1] : vector<8x8xf32> to vector<8xf32>
    %203 = vector.shape_cast %202 : vector<8xf32> to vector<8x1xf32>
    %204 = vector.broadcast %203 : vector<8x1xf32> to vector<8x8xf32>
    %205 = arith.divf %201, %204 : vector<8x8xf32>
    %206 = arith.truncf %205 : vector<8x8xf32> to vector<8x8xbf16>
    %207 = arith.truncf %191 : vector<8x16xf32> to vector<8x16xbf16>
    %cst_64 = arith.constant dense<0.000000e+00> : vector<8x16xf32>
    %208 = tpu.matmul %206, %207, %cst_64 {dimension_numbers = #tpu.dot_dimension_numbers<[1], [0], [0], [1], [0, 0, 1, 1], [], []>} : vector<8x8xbf16>, vector<8x16xbf16>, vector<8x16xf32> -> vector<8x16xf32>
    %209 = tpu.concatenate %188, %208 in 1 : vector<8x16xf32>, vector<8x16xf32> -> vector<8x32xf32>
    %c480 = arith.constant 480 : index
    %c0_65 = arith.constant 0 : index
    %210 = vector.load %arg3[%c480, %c0_65] : memref<1056x128xbf16, #tpu.memory_space<vmem>>, vector<32x32xbf16>
    %211 = arith.truncf %209 : vector<8x32xf32> to vector<8x32xbf16>
    %cst_66 = arith.constant dense<0.000000e+00> : vector<8x32xf32>
    %212 = tpu.matmul %211, %210, %cst_66 {dimension_numbers = #tpu.dot_dimension_numbers<[1], [0], [0], [1], [0, 0, 1, 1], [], []>} : vector<8x32xbf16>, vector<32x32xbf16>, vector<8x32xf32> -> vector<8x32xf32>
    %c512 = arith.constant 512 : index
    %c0_67 = arith.constant 0 : index
    %213 = vector.load %arg3[%c512, %c0_67] : memref<1056x128xbf16, #tpu.memory_space<vmem>>, vector<64x96xbf16>
    %c576 = arith.constant 576 : index
    %c0_68 = arith.constant 0 : index
    %214 = vector.load %arg3[%c576, %c0_68] : memref<1056x128xbf16, #tpu.memory_space<vmem>>, vector<1x96xbf16>
    %c592 = arith.constant 592 : index
    %c0_69 = arith.constant 0 : index
    %215 = vector.load %arg3[%c592, %c0_69] : memref<1056x128xbf16, #tpu.memory_space<vmem>>, vector<32x32xbf16>
    %216 = tpu.concatenate %212, %138 in 1 : vector<8x32xf32>, vector<8x32xf32> -> vector<8x64xf32>
    %217 = arith.truncf %216 : vector<8x64xf32> to vector<8x64xbf16>
    %cst_70 = arith.constant dense<0.000000e+00> : vector<8x96xf32>
    %218 = tpu.matmul %217, %213, %cst_70 {dimension_numbers = #tpu.dot_dimension_numbers<[1], [0], [0], [1], [0, 0, 1, 1], [], []>} : vector<8x64xbf16>, vector<64x96xbf16>, vector<8x96xf32> -> vector<8x96xf32>
    %219 = arith.extf %214 : vector<1x96xbf16> to vector<1x96xf32>
    %220 = vector.broadcast %219 : vector<1x96xf32> to vector<8x96xf32>
    %221 = arith.addf %218, %220 : vector<8x96xf32>
    %222 = vector.extract_strided_slice %221 {offsets = [0, 0], sizes = [8, 32], strides = [1, 1]} : vector<8x96xf32> to vector<8x32xf32>
    %223 = arith.negf %222 : vector<8x32xf32>
    %224 = math.exp %223 : vector<8x32xf32>
    %cst_71 = arith.constant 1.000000e+00 : f32
    %225 = vector.broadcast %cst_71 : f32 to vector<8x32xf32>
    %226 = arith.addf %225, %224 : vector<8x32xf32>
    %227 = arith.divf %225, %226 : vector<8x32xf32>
    %228 = vector.extract_strided_slice %221 {offsets = [0, 32], sizes = [8, 32], strides = [1, 1]} : vector<8x96xf32> to vector<8x32xf32>
    %229 = arith.negf %228 : vector<8x32xf32>
    %230 = math.exp %229 : vector<8x32xf32>
    %cst_72 = arith.constant 1.000000e+00 : f32
    %231 = vector.broadcast %cst_72 : f32 to vector<8x32xf32>
    %232 = arith.addf %231, %230 : vector<8x32xf32>
    %233 = arith.divf %231, %232 : vector<8x32xf32>
    %234 = vector.extract_strided_slice %221 {offsets = [0, 64], sizes = [8, 32], strides = [1, 1]} : vector<8x96xf32> to vector<8x32xf32>
    %235 = arith.mulf %227, %138 : vector<8x32xf32>
    %236 = arith.truncf %235 : vector<8x32xf32> to vector<8x32xbf16>
    %cst_73 = arith.constant dense<0.000000e+00> : vector<8x32xf32>
    %237 = tpu.matmul %236, %215, %cst_73 {dimension_numbers = #tpu.dot_dimension_numbers<[1], [0], [0], [1], [0, 0, 1, 1], [], []>} : vector<8x32xbf16>, vector<32x32xbf16>, vector<8x32xf32> -> vector<8x32xf32>
    %238 = arith.addf %234, %237 : vector<8x32xf32>
    %239 = math.tanh %238 : vector<8x32xf32>
    %cst_74 = arith.constant 1.000000e+00 : f32
    %240 = vector.broadcast %cst_74 : f32 to vector<8x32xf32>
    %241 = arith.subf %240, %233 : vector<8x32xf32>
    %242 = arith.mulf %241, %138 : vector<8x32xf32>
    %243 = arith.mulf %233, %239 : vector<8x32xf32>
    %244 = arith.addf %242, %243 : vector<8x32xf32>
    %c624 = arith.constant 624 : index
    %c0_75 = arith.constant 0 : index
    %245 = vector.load %arg3[%c624, %c0_75] : memref<1056x128xbf16, #tpu.memory_space<vmem>>, vector<1x32xbf16>
    %c640 = arith.constant 640 : index
    %c0_76 = arith.constant 0 : index
    %246 = vector.load %arg3[%c640, %c0_76] : memref<1056x128xbf16, #tpu.memory_space<vmem>>, vector<1x32xbf16>
    %cst_77 = arith.constant dense<0.000000e+00> : vector<8xf32>
    %247 = vector.multi_reduction <add>, %244, %cst_77 [1] : vector<8x32xf32> to vector<8xf32>
    %248 = vector.shape_cast %247 : vector<8xf32> to vector<8x1xf32>
    %cst_78 = arith.constant 3.200000e+01 : f32
    %249 = vector.broadcast %cst_78 : f32 to vector<8x1xf32>
    %250 = arith.divf %248, %249 : vector<8x1xf32>
    %251 = vector.broadcast %250 : vector<8x1xf32> to vector<8x32xf32>
    %252 = arith.subf %244, %251 : vector<8x32xf32>
    %253 = arith.mulf %252, %252 : vector<8x32xf32>
    %cst_79 = arith.constant dense<0.000000e+00> : vector<8xf32>
    %254 = vector.multi_reduction <add>, %253, %cst_79 [1] : vector<8x32xf32> to vector<8xf32>
    %255 = vector.shape_cast %254 : vector<8xf32> to vector<8x1xf32>
    %cst_80 = arith.constant 3.200000e+01 : f32
    %256 = vector.broadcast %cst_80 : f32 to vector<8x1xf32>
    %257 = arith.divf %255, %256 : vector<8x1xf32>
    %cst_81 = arith.constant 9.99999997E-7 : f32
    %258 = vector.broadcast %cst_81 : f32 to vector<8x1xf32>
    %259 = arith.addf %257, %258 : vector<8x1xf32>
    %260 = math.rsqrt %259 : vector<8x1xf32>
    %261 = vector.broadcast %260 : vector<8x1xf32> to vector<8x32xf32>
    %262 = arith.mulf %252, %261 : vector<8x32xf32>
    %263 = arith.extf %245 : vector<1x32xbf16> to vector<1x32xf32>
    %264 = vector.broadcast %263 : vector<1x32xf32> to vector<8x32xf32>
    %265 = arith.mulf %262, %264 : vector<8x32xf32>
    %266 = arith.extf %246 : vector<1x32xbf16> to vector<1x32xf32>
    %267 = vector.broadcast %266 : vector<1x32xf32> to vector<8x32xf32>
    %268 = arith.addf %265, %267 : vector<8x32xf32>
    %c656 = arith.constant 656 : index
    %c0_82 = arith.constant 0 : index
    %269 = vector.load %arg3[%c656, %c0_82] : memref<1056x128xbf16, #tpu.memory_space<vmem>>, vector<32x64xbf16>
    %270 = arith.truncf %268 : vector<8x32xf32> to vector<8x32xbf16>
    %cst_83 = arith.constant dense<0.000000e+00> : vector<8x64xf32>
    %271 = tpu.matmul %270, %269, %cst_83 {dimension_numbers = #tpu.dot_dimension_numbers<[1], [0], [0], [1], [0, 0, 1, 1], [], []>} : vector<8x32xbf16>, vector<32x64xbf16>, vector<8x64xf32> -> vector<8x64xf32>
    %c688 = arith.constant 688 : index
    %c0_84 = arith.constant 0 : index
    %272 = vector.load %arg3[%c688, %c0_84] : memref<1056x128xbf16, #tpu.memory_space<vmem>>, vector<1x64xbf16>
    %273 = arith.extf %272 : vector<1x64xbf16> to vector<1x64xf32>
    %274 = vector.broadcast %273 : vector<1x64xf32> to vector<8x64xf32>
    %275 = arith.addf %271, %274 : vector<8x64xf32>
    %cst_85 = arith.constant 0.000000e+00 : f32
    %276 = vector.broadcast %cst_85 : f32 to vector<8x64xf32>
    %277 = arith.maximumf %275, %276 : vector<8x64xf32>
    %c704 = arith.constant 704 : index
    %c0_86 = arith.constant 0 : index
    %278 = vector.load %arg3[%c704, %c0_86] : memref<1056x128xbf16, #tpu.memory_space<vmem>>, vector<64x32xbf16>
    %279 = arith.truncf %277 : vector<8x64xf32> to vector<8x64xbf16>
    %cst_87 = arith.constant dense<0.000000e+00> : vector<8x32xf32>
    %280 = tpu.matmul %279, %278, %cst_87 {dimension_numbers = #tpu.dot_dimension_numbers<[1], [0], [0], [1], [0, 0, 1, 1], [], []>} : vector<8x64xbf16>, vector<64x32xbf16>, vector<8x32xf32> -> vector<8x32xf32>
    %c768 = arith.constant 768 : index
    %c0_88 = arith.constant 0 : index
    %281 = vector.load %arg3[%c768, %c0_88] : memref<1056x128xbf16, #tpu.memory_space<vmem>>, vector<1x32xbf16>
    %282 = arith.extf %281 : vector<1x32xbf16> to vector<1x32xf32>
    %283 = vector.broadcast %282 : vector<1x32xf32> to vector<8x32xf32>
    %284 = arith.addf %280, %283 : vector<8x32xf32>
    %c784 = arith.constant 784 : index
    %c0_89 = arith.constant 0 : index
    %285 = vector.load %arg3[%c784, %c0_89] : memref<1056x128xbf16, #tpu.memory_space<vmem>>, vector<64x96xbf16>
    %c848 = arith.constant 848 : index
    %c0_90 = arith.constant 0 : index
    %286 = vector.load %arg3[%c848, %c0_90] : memref<1056x128xbf16, #tpu.memory_space<vmem>>, vector<1x96xbf16>
    %c864 = arith.constant 864 : index
    %c0_91 = arith.constant 0 : index
    %287 = vector.load %arg3[%c864, %c0_91] : memref<1056x128xbf16, #tpu.memory_space<vmem>>, vector<32x32xbf16>
    %288 = tpu.concatenate %284, %244 in 1 : vector<8x32xf32>, vector<8x32xf32> -> vector<8x64xf32>
    %289 = arith.truncf %288 : vector<8x64xf32> to vector<8x64xbf16>
    %cst_92 = arith.constant dense<0.000000e+00> : vector<8x96xf32>
    %290 = tpu.matmul %289, %285, %cst_92 {dimension_numbers = #tpu.dot_dimension_numbers<[1], [0], [0], [1], [0, 0, 1, 1], [], []>} : vector<8x64xbf16>, vector<64x96xbf16>, vector<8x96xf32> -> vector<8x96xf32>
    %291 = arith.extf %286 : vector<1x96xbf16> to vector<1x96xf32>
    %292 = vector.broadcast %291 : vector<1x96xf32> to vector<8x96xf32>
    %293 = arith.addf %290, %292 : vector<8x96xf32>
    %294 = vector.extract_strided_slice %293 {offsets = [0, 0], sizes = [8, 32], strides = [1, 1]} : vector<8x96xf32> to vector<8x32xf32>
    %295 = arith.negf %294 : vector<8x32xf32>
    %296 = math.exp %295 : vector<8x32xf32>
    %cst_93 = arith.constant 1.000000e+00 : f32
    %297 = vector.broadcast %cst_93 : f32 to vector<8x32xf32>
    %298 = arith.addf %297, %296 : vector<8x32xf32>
    %299 = arith.divf %297, %298 : vector<8x32xf32>
    %300 = vector.extract_strided_slice %293 {offsets = [0, 32], sizes = [8, 32], strides = [1, 1]} : vector<8x96xf32> to vector<8x32xf32>
    %301 = arith.negf %300 : vector<8x32xf32>
    %302 = math.exp %301 : vector<8x32xf32>
    %cst_94 = arith.constant 1.000000e+00 : f32
    %303 = vector.broadcast %cst_94 : f32 to vector<8x32xf32>
    %304 = arith.addf %303, %302 : vector<8x32xf32>
    %305 = arith.divf %303, %304 : vector<8x32xf32>
    %306 = vector.extract_strided_slice %293 {offsets = [0, 64], sizes = [8, 32], strides = [1, 1]} : vector<8x96xf32> to vector<8x32xf32>
    %307 = arith.mulf %299, %244 : vector<8x32xf32>
    %308 = arith.truncf %307 : vector<8x32xf32> to vector<8x32xbf16>
    %cst_95 = arith.constant dense<0.000000e+00> : vector<8x32xf32>
    %309 = tpu.matmul %308, %287, %cst_95 {dimension_numbers = #tpu.dot_dimension_numbers<[1], [0], [0], [1], [0, 0, 1, 1], [], []>} : vector<8x32xbf16>, vector<32x32xbf16>, vector<8x32xf32> -> vector<8x32xf32>
    %310 = arith.addf %306, %309 : vector<8x32xf32>
    %311 = math.tanh %310 : vector<8x32xf32>
    %cst_96 = arith.constant 1.000000e+00 : f32
    %312 = vector.broadcast %cst_96 : f32 to vector<8x32xf32>
    %313 = arith.subf %312, %305 : vector<8x32xf32>
    %314 = arith.mulf %313, %244 : vector<8x32xf32>
    %315 = arith.mulf %305, %311 : vector<8x32xf32>
    %316 = arith.addf %314, %315 : vector<8x32xf32>
    %317 = tpu.concatenate %316, %136, %103 in 1 : vector<8x32xf32>, vector<8x32xf32>, vector<8x32xf32> -> vector<8x96xf32>
    %c896 = arith.constant 896 : index
    %c0_97 = arith.constant 0 : index
    %318 = vector.load %arg3[%c896, %c0_97] : memref<1056x128xbf16, #tpu.memory_space<vmem>>, vector<96x32xbf16>
    %319 = arith.truncf %317 : vector<8x96xf32> to vector<8x96xbf16>
    %cst_98 = arith.constant dense<0.000000e+00> : vector<8x32xf32>
    %320 = tpu.matmul %319, %318, %cst_98 {dimension_numbers = #tpu.dot_dimension_numbers<[1], [0], [0], [1], [0, 0, 1, 1], [], []>} : vector<8x96xbf16>, vector<96x32xbf16>, vector<8x32xf32> -> vector<8x32xf32>
    %c992 = arith.constant 992 : index
    %c0_99 = arith.constant 0 : index
    %321 = vector.load %arg3[%c992, %c0_99] : memref<1056x128xbf16, #tpu.memory_space<vmem>>, vector<1x32xbf16>
    %322 = arith.extf %321 : vector<1x32xbf16> to vector<1x32xf32>
    %323 = vector.broadcast %322 : vector<1x32xf32> to vector<8x32xf32>
    %324 = arith.addf %320, %323 : vector<8x32xf32>
    %cst_100 = arith.constant 0.000000e+00 : f32
    %325 = vector.broadcast %cst_100 : f32 to vector<8x32xf32>
    %326 = arith.maximumf %324, %325 : vector<8x32xf32>
    %c1008 = arith.constant 1008 : index
    %c0_101 = arith.constant 0 : index
    %327 = vector.load %arg3[%c1008, %c0_101] : memref<1056x128xbf16, #tpu.memory_space<vmem>>, vector<32x40xbf16>
    %328 = arith.truncf %326 : vector<8x32xf32> to vector<8x32xbf16>
    %cst_102 = arith.constant dense<0.000000e+00> : vector<8x40xf32>
    %329 = tpu.matmul %328, %327, %cst_102 {dimension_numbers = #tpu.dot_dimension_numbers<[1], [0], [0], [1], [0, 0, 1, 1], [], []>} : vector<8x32xbf16>, vector<32x40xbf16>, vector<8x40xf32> -> vector<8x40xf32>
    %c1040 = arith.constant 1040 : index
    %c0_103 = arith.constant 0 : index
    %330 = vector.load %arg3[%c1040, %c0_103] : memref<1056x128xbf16, #tpu.memory_space<vmem>>, vector<1x40xbf16>
    %331 = arith.extf %330 : vector<1x40xbf16> to vector<1x40xf32>
    %332 = vector.broadcast %331 : vector<1x40xf32> to vector<8x40xf32>
    %333 = arith.addf %329, %332 : vector<8x40xf32>
    %334 = tpu.iota {dimensions = array<i32: 1>} : vector<8x40xi32>
    %c7_i32 = arith.constant 7 : i32
    %335 = vector.broadcast %c7_i32 : i32 to vector<8x40xi32>
    %336 = arith.cmpi eq, %334, %335 : vector<8x40xi32>
    %337 = arith.negf %333 : vector<8x40xf32>
    %338 = math.exp %337 : vector<8x40xf32>
    %cst_104 = arith.constant 1.000000e+00 : f32
    %339 = vector.broadcast %cst_104 : f32 to vector<8x40xf32>
    %340 = arith.addf %339, %338 : vector<8x40xf32>
    %341 = arith.divf %339, %340 : vector<8x40xf32>
    %342 = arith.select %336, %341, %333 : vector<8x40xi1>, vector<8x40xf32>
    %cst_105 = arith.constant 0.000000e+00 : f32
    %343 = vector.broadcast %cst_105 : f32 to vector<8x24xf32>
    %344 = tpu.concatenate %342, %136, %134, %343 in 1 : vector<8x40xf32>, vector<8x32xf32>, vector<8x32xf32>, vector<8x24xf32> -> vector<8x128xf32>
    %c0_106 = arith.constant 0 : index
    %c0_107 = arith.constant 0 : index
    %345 = vector.load %arg4[%c0_106, %c0_107] : memref<8x128xf32, #tpu.memory_space<vmem>>, vector<8x128xf32>
    tpu.vector_store %arg4[%c0_106, %c0_107], %344 {strides = array<i32>} : memref<8x128xf32, #tpu.memory_space<vmem>>, vector<8x128xf32>,
    return
  }
}

</mosaic_0001>

<bundles_post_ra>
// kernel: fwd.1
= control target key start
LH: loop header
LB: loop body
LE: loop exit
PB: predicated region body
PF: predicated region fallthrough
CT: control target
= control target key end

     0   :  { %10 = vsyncpa [#allocation4], 0  ;;  %s5477_s0 = inlined_call_operand.<no memory space> [shape: s32[1], index: 0, kind: input, shape index: {}]   ;;  %s5478_s1 = inlined_call_operand.vmem [shape: f32[8,167], index: 1, kind: input, shape index: {}]   ;;  %s5479_s2 = inlined_call_operand.hbm [shape: bf16[1152,640], index: 2, kind: input, shape index: {}]   ;;  %s5480_s3 = inlined_call_operand.hbm [shape: bf16[1056,128], index: 3, kind: input, shape index: {}]   ;;  %s5481_s4 = inlined_call_operand.vmem [shape: f32[8,128], index: 4, kind: output, shape index: {}]  }
   0x1   :  { %11 = vsyncpa [#allocation6], 0  ;;  %s5073_s15 = smov [#allocation3]  }
   0x2   :  { %s21_s16 = sshll.u32 %s5073_s15, 4  ;;  %s22_s16 = int_to_ptr.vmem [resolvable:$true] %s21_s16 }
   0x3   :  { %s5037_s17 = scalar_lea.vmem %s22_s16, 46080  ;;  %p5042_p1 = scmp.lt.s32.totalorder %s22_s16, %s22_s16 }
   0x4   :  { %p5038_p0 = scmp.ne.s32.totalorder %s22_s16, %s5037_s17  ;;  %p5043_p2 = scmp.lt.s32.totalorder %s5037_s17, %s5037_s17 }
   0x6   :  { %p5044_p3 = por %p5043_p2, %p5042_p1 }
   0x8   :  { %p5045_p4 = pnand %p5044_p3, %p5038_p0 }
   0xa   :  { %5048 = shalt.err (!%p5045_p4)
}
   0xb   :  { %s5074_s18 = smov 320   ;;  %s5075_s19 = smov 20  }
   0xc   :  { %27 = dma.hbm_to_vmem [thread:$0]  %s5479_s2, 46080, %s22_s16, [#allocation4], %s5074_s18, %s5074_s18, %s5075_s19  }
   0xd   :  { %s5076_s22 = smov [#allocation5]  }
   0xe   :  { %s33_s23 = sshll.u32 %s5076_s22, 4  ;;  %s34_s23 = int_to_ptr.vmem [resolvable:$true] %s33_s23 }
   0xf   :  { %s5057_s24 = scalar_lea.vmem %s34_s23, 8448  ;;  %p5062_p6 = scmp.lt.s32.totalorder %s34_s23, %s34_s23 }
  0x10   :  { %p5058_p5 = scmp.ne.s32.totalorder %s34_s23, %s5057_s24  ;;  %p5063_p7 = scmp.lt.s32.totalorder %s5057_s24, %s5057_s24 }
  0x12   :  { %p5064_p8 = por %p5063_p7, %p5062_p6 }
  0x14   :  { %p5065_p9 = pnand %p5064_p8, %p5058_p5 }
  0x16   :  { %5068 = shalt.err (!%p5065_p9)
}
  0x17   :  { %s5077_s25 = smov 64   ;;  %s5078_s26 = smov 4  }
  0x18   :  { %39 = dma.hbm_to_vmem [thread:$0]  %s5480_s3, 8448, %s34_s23, [#allocation6], %s5077_s25, %s5077_s25, %s5078_s26  }
  0x19   :  { %5069 = dma.done.wait [#allocation4], 46080  }
  0x1a   :  { %5070 = vsyncadd [#allocation4], 4294921216 }
  0x1b   :  { %5071 = dma.done.wait [#allocation6], 8448  }
  0x1c   :  { %5072 = vsyncadd [#allocation6], 4294958848  ;;  %v5079_v0 = vmov 0.0   ;;  %vm5080_vm0 = vmmov 0   ;;  %vm80_vm1 = vcmask 1041408   ;;  %v4583_v3 = vld [vmem:[#allocation5 + $0x8] sm:$0xff]   ;;  %v57_v48 = vlaneseq }
  0x1d   :  { %4369 = vmatprep.subr.bf16.mxu0 %v5079_v0  ;;  %4375 = vmatprep.mubr.msk.bf16.mxu0 %vm5080_vm0, %v5079_v0  ;;  %v4581_v1 = vld [vmem:[#allocation5 + $0x10] ss:$0 sps:$4 sm:$0x33]   ;;  %v4587_v5 = vld [vmem:[#allocation3 + $0x118] ss:$20 sps:$4 sm:$0xff]   ;;  %v4584_v7 = vld [vmem:[#allocation5] sm:$0xff]  }
  0x1e   :  { %v82_v2 = vsel %vm80_vm1, %v4581_v1, 0  ;;  %v4585_v4 = vld [vmem:[#allocation3 + $0x11c] ss:$20 sps:$4 sm:$0xff]   ;;  %v4588_v6 = vld [vmem:[#allocation3 + $0xf4] ss:$20 sps:$4 sm:$0xff]   ;;  %v47_v8 = vld [vmem:[%s5478_s1] sm:$0xff] }
  0x1f   :  { %4370 = vmatpush3.bf16.msra.mxu0 %v82_v2  ;;  %233 = vmatprep.subr.bf16.mxu1 %v4585_v4  ;;  %v4590_v9 = vld [vmem:[#allocation3 + $0xf0] ss:$20 sps:$4 sm:$0xff]   ;;  %v4591_v10 = vld [vmem:[#allocation3 + $0xcc] ss:$20 sps:$4 sm:$0xff]   ;;  %v54_v11 = vpack.c.bf16 %v47_v8, %v47_v8  ;;  %vm76_vm2 = vcmask 293888   ;;  %v5081_v23 = vmov 0  }
  0x20   :  { %4371 = vmatprep.subr.bf16.mxu0 %v5079_v0  ;;  %234 = vmatpush1.bf16.msra.mxu1 %v4587_v5  ;;  %v4593_v12 = vld [vmem:[#allocation3 + $0xc8] ss:$20 sps:$4 sm:$0xff]   ;;  %v4594_v13 = vld [vmem:[#allocation3 + $0xa4] ss:$20 sps:$4 sm:$0xff]   ;;  %v4596_v14 = vld [vmem:[#allocation3 + $0xa0] ss:$20 sps:$4 sm:$0xff]  }
  0x21   :  { %235 = vmatprep.subr.bf16.mxu1 %v4588_v6  ;;  %v4597_v15 = vld [vmem:[#allocation3 + $0x7c] ss:$20 sps:$4 sm:$0xff]   ;;  %v4599_v16 = vld [vmem:[#allocation3 + $0x78] ss:$20 sps:$4 sm:$0xff]   ;;  %v4600_v17 = vld [vmem:[#allocation3 + $0x54] ss:$20 sps:$4 sm:$0xff]   ;;  %265 = vmatprep.mubr.bf16.mxu1 %v5081_v23 }
  0x22   :  { %v4602_v18 = vld [vmem:[#allocation3 + $0x50] ss:$20 sps:$4 sm:$0xff]   ;;  %v4603_v19 = vld [vmem:[#allocation3 + $0x2c] ss:$20 sps:$4 sm:$0xff]   ;;  %v4605_v20 = vld [vmem:[#allocation3 + $0x28] ss:$20 sps:$4 sm:$0xff]  }
  0x23   :  { %4372 = vmatpush3.bf16.msra.mxu0 %v4583_v3  ;;  %v4606_v21 = vld [vmem:[#allocation3 + $0x4] ss:$20 sps:$4 sm:$0xff]   ;;  %v4608_v22 = vld [vmem:[#allocation3] ss:$20 sps:$4 sm:$0xff]   ;;  %v4615_v26 = vld [vmem:[#allocation3 + $0x25c] ss:$20 sps:$4 sm:$0xff]  }
  0x24   :  { %4373 = vmatprep.subr.bf16.mxu0 %v5079_v0  ;;  %236 = vmatpush1.bf16.msra.mxu1 %v4590_v9  ;;  %v4609_v24 = vld [vmem:[#allocation3 + $0x280] ss:$20 sps:$4 sm:$0xff]   ;;  %v4611_v25 = vld [vmem:[#allocation3 + $0x284] ss:$20 sps:$4 sm:$0xff]   ;;  %v4621_v31 = vld [vmem:[#allocation3 + $0x208] ss:$20 sps:$4 sm:$0xff]  }
  0x25   :  { %237 = vmatprep.subr.bf16.mxu1 %v4591_v10  ;;  %v4613_v27 = vld [vmem:[#allocation3 + $0x258] ss:$20 sps:$4 sm:$0xff]   ;;  %v4619_v28 = vld [vmem:[#allocation3 + $0x234] ss:$20 sps:$4 sm:$0xff]   ;;  %v4617_v29 = vld [vmem:[#allocation3 + $0x230] ss:$20 sps:$4 sm:$0xff]  }
  0x26   :  { %v4623_v30 = vld [vmem:[#allocation3 + $0x20c] ss:$20 sps:$4 sm:$0xff]   ;;  %v4627_v32 = vld [vmem:[#allocation3 + $0x1e4] ss:$20 sps:$4 sm:$0xff]   ;;  %v4631_v34 = vld [vmem:[#allocation3 + $0x1bc] ss:$20 sps:$4 sm:$0xff]  }
  0x27   :  { %4374 = vmatpush3.bf16.msra.mxu0 %v4584_v7  ;;  %v4625_v33 = vld [vmem:[#allocation3 + $0x1e0] ss:$20 sps:$4 sm:$0xff]   ;;  %v4629_v35 = vld [vmem:[#allocation3 + $0x1b8] ss:$20 sps:$4 sm:$0xff]   ;;  %v4633_v37 = vld [vmem:[#allocation3 + $0x190] ss:$20 sps:$4 sm:$0xff]  }
  0x28   :  { %238 = vmatpush1.bf16.msra.mxu1 %v4593_v12  ;;  %559 = vmatprep.subr.bf16.mxu0 %v4611_v25  ;;  %v4635_v36 = vld [vmem:[#allocation3 + $0x194] ss:$20 sps:$4 sm:$0xff]   ;;  %v4639_v38 = vld [vmem:[#allocation3 + $0x16c] ss:$20 sps:$4 sm:$0xff]   ;;  %vm549_vm3 = vcmask 1043456   ;;  %v58_v49 = vshrl.u32 %v57_v48, 7 }
  0x29   :  { %239 = vmatprep.subr.bf16.mxu1 %v4594_v13  ;;  %v4637_v39 = vld [vmem:[#allocation3 + $0x168] ss:$20 sps:$4 sm:$0xff]   ;;  %v4646_v44 = vld [vmem:[#allocation3 + $0x324] ss:$20 sps:$4 sm:$0xff]   ;;  %v4644_v45 = vld [vmem:[#allocation3 + $0x320] ss:$20 sps:$4 sm:$0xff]  }
  0x2a   :  { %4376 = vmatmul.mubr.msk.bf16.vlgmr.msra.gmra.mxu0 %vm76_vm2, %v54_v11  ;;  %v324_v40 = vld [vmem:[#allocation3 + $0x348] sm:$0xff]  ;;  %v4650_v46 = vld [vmem:[#allocation3 + $0x2fc] ss:$20 sps:$4 sm:$0xff]   ;;  %v55_v50 = vld [vmem:[#allocation5 + $0x18] sm:$0x1]  ;;  %v5145_v52 = vsub.s32 0, %v58_v49 }
  0x2b   :  { %560 = vmatpush1.bf16.msra.mxu0 %v4609_v24  ;;  %v4005_v41 = vcombine.high %v324_v40, %v324_v40  ;;  %v4004_v42 = vcombine.low %v324_v40, %v324_v40  ;;  %v4648_v47 = vld [vmem:[#allocation3 + $0x2f8] ss:$20 sps:$4 sm:$0xff]   ;;  %v56_v51 = vunpack.c.l.bf16 %v55_v50  ;;  %v4612_v59 = vld [vmem:[#allocation3 + $0x288] ss:$20 sps:$4 sm:$0xff]   ;;  %v4616_v62 = vld [vmem:[#allocation3 + $0x260] ss:$20 sps:$4 sm:$0xff]  }
  0x2c   :  { %240 = vmatpush1.bf16.msra.mxu1 %v4596_v14  ;;  %561 = vmatprep.subr.bf16.mxu0 %v4615_v26  ;;  %v4620_v63 = vld [vmem:[#allocation3 + $0x238] ss:$20 sps:$4 sm:$0xff]   ;;  %v4624_v1 = vld [vmem:[#allocation3 + $0x210] ss:$20 sps:$4 sm:$0xff]   ;;  %v4628_v2 = vld [vmem:[#allocation3 + $0x1e8] ss:$20 sps:$4 sm:$0xff]  }
  0x2d   :  { %241 = vmatprep.subr.bf16.mxu1 %v4597_v15  ;;  %v551_v43 = vsel %vm549_vm3, %v4004_v42, 0  ;;  %v60_v53 = vrot.slane %v56_v51, %v5145_v52  ;;  %v4632_v3 = vld [vmem:[#allocation3 + $0x1c0] ss:$20 sps:$4 sm:$0xff]   ;;  %v4636_v4 = vld [vmem:[#allocation3 + $0x198] ss:$20 sps:$4 sm:$0xff]   ;;  %vm545_vm4 = vcmask 588800  }
  0x2e   :  { %v4640_v5 = vld [vmem:[#allocation3 + $0x170] ss:$20 sps:$4 sm:$0xff]   ;;  %v4647_v8 = vld [vmem:[#allocation3 + $0x328] ss:$20 sps:$4 sm:$0xff]   ;;  %v4651_v9 = vld [vmem:[#allocation3 + $0x300] ss:$20 sps:$4 sm:$0xff]  }
  0x2f   :  { %562 = vmatpush1.bf16.msra.mxu0 %v4613_v27  ;;  %v4643_v6 = vld [vmem:[#allocation3 + $0x350] ss:$0 sps:$4 sm:$0xff]   ;;  %v4654_v10 = vld [vmem:[#allocation3 + $0x2d4] ss:$20 sps:$4 sm:$0xff]   ;;  %v4655_v12 = vld [vmem:[#allocation3 + $0x2d8] ss:$20 sps:$4 sm:$0xff]  }
  0x30   :  { %242 = vmatpush1.bf16.msra.mxu1 %v4599_v16  ;;  %563 = vmatprep.subr.bf16.mxu0 %v4619_v28  ;;  %v557_v7 = vsel %vm549_vm3, %v4643_v6, 0  ;;  %v4652_v11 = vld [vmem:[#allocation3 + $0x2d0] ss:$20 sps:$4 sm:$0xff]   ;;  %v4658_v13 = vld [vmem:[#allocation3 + $0x2ac] ss:$20 sps:$4 sm:$0xff]   ;;  %v672_v42 = vld [vmem:[#allocation3 + $0x438] sm:$0xff] }
  0x31   :  { %243 = vmatprep.subr.bf16.mxu1 %v4600_v17  ;;  %v4656_v14 = vld [vmem:[#allocation3 + $0x2a8] ss:$20 sps:$4 sm:$0xff]   ;;  %v4659_v15 = vld [vmem:[#allocation3 + $0x2b0] ss:$20 sps:$4 sm:$0xff]   ;;  %s5082_s29 = smov 56   ;;  %vm649_vm5 = vcmask 457728  }
  0x32   :  { %v142_v16 = vld [vmem:[#allocation3 + $0x140] sm:$0x11]  ;;  %s5083_s30 = smov 112   ;;  %vm2108_vm6 = vcmask 130048   ;;  %s5084_s7 = smov 108   ;;  %vm2489_vm7 = vcmask 1040384  }
  0x33   :  { %564 = vmatpush1.bf16.msra.mxu0 %v4617_v29  ;;  %v143_v17 = vunpack.c.l.bf16 %v142_v16  ;;  %v4676_v6 = vld [vmem:[#allocation3 + $0x5a4] ss:$20 sps:$4 sm:$0xff]   ;;  %vm2367_vm8 = vcmask 916480   ;;  %s5086_s8 = smov 96   ;;  %vm2390_vm9 = vcmask 785408   ;;  %vm2485_vm10 = vcmask 154624  }
  0x34   :  { %244 = vmatpush1.bf16.msra.mxu1 %v4602_v18  ;;  %565 = vmatprep.subr.bf16.mxu0 %v4623_v30  ;;  %v144_v18 = vunpack.c.h.bf16 %v142_v16  ;;  %vm2805_vm11 = vcmask 203776   ;;  %vm2559_vm12 = vcmask 261120   ;;  %s5088_s11 = smov 103   ;;  %s5089_s12 = smov 121   ;;  %vm2715_vm13 = vcmask 523264  }
  0x35   :  { %245 = vmatprep.subr.bf16.mxu1 %v4603_v19  ;;  %v148_v19 = vrot.slane %v143_v17, %v5145_v52  ;;  %s5090_s13 = smov 80   ;;  %vm2975_vm15 = vcmask 64512   ;;  %s5092_s16 = smov 57   ;;  %vm3936_vm2 = vcmask 326656  }
  0x36   :  { %s5093_s17 = smov 16   ;;  %s5094_s18 = smov 32  }
  0x37   :  { %566 = vmatpush1.bf16.msra.mxu0 %v4621_v31  ;;  %s5095_s19 = smov 89   ;;  %s5096_s20 = smov 40  }
  0x38   :  { %246 = vmatpush1.bf16.msra.mxu1 %v4605_v20  ;;  %567 = vmatprep.subr.bf16.mxu0 %v4627_v32  ;;  %v152_v20 = vrot.slane %v144_v18, %v5145_v52  ;;  %v329_v32 = vld [vmem:[#allocation3 + $0x378] sm:$0x1]  ;;  %s5097_s21 = smov 72  }
  0x39   :  { %247 = vmatprep.subr.bf16.mxu1 %v4606_v21 }
  0x3b   :  { %568 = vmatpush1.bf16.msra.mxu0 %v4625_v33  ;;  %v332_v33 = vunpack.c.l.bf16 %v329_v32  ;;  %v4725_v32 = vld [vmem:[#allocation3 + $0x6e8] ss:$20 sps:$4 sm:$0xff]  }
  0x3c   :  { %248 = vmatpush1.bf16.msra.mxu1 %v4608_v22  ;;  %569 = vmatprep.subr.bf16.mxu0 %v4631_v34  ;;  %v328_v34 = vld [vmem:[#allocation3 + $0x370] sm:$0x11] }
  0x3d   :  { %600 = vmatprep.subr.bf16.mxu1 %v5081_v23 }
  0x3f   :  { %570 = vmatpush1.bf16.msra.mxu0 %v4629_v35  ;;  %v331_v35 = vunpack.c.h.bf16 %v328_v34 }
  0x40   :  { %571 = vmatprep.subr.bf16.mxu0 %v4635_v36  ;;  %v344_v36 = vrot.slane %v332_v33, %v5145_v52  ;;  %v4733_v33 = vld [vmem:[#allocation3 + $0x6c4] ss:$20 sps:$4 sm:$0xff]  }
  0x43   :  { %572 = vmatpush1.bf16.msra.mxu0 %v4633_v37  ;;  %v330_v37 = vunpack.c.l.bf16 %v328_v34  ;;  %v4731_v34 = vld [vmem:[#allocation3 + $0x6c0] ss:$20 sps:$4 sm:$0xff]  }
  0x44   :  { %573 = vmatprep.subr.bf16.mxu0 %v4639_v38  ;;  %v340_v38 = vrot.slane %v331_v35, %v5145_v52  ;;  %v4739_v35 = vld [vmem:[#allocation3 + $0x69c] ss:$20 sps:$4 sm:$0xff]  }
  0x45   :  { %v336_v49 = vrot.slane %v330_v37, %v5145_v52  ;;  %v4745_v37 = vld [vmem:[#allocation3 + $0x674] ss:$20 sps:$4 sm:$0xff]  }
  0x47   :  { %574 = vmatpush1.bf16.msra.mxu0 %v4637_v39 }
  0x48   :  { %4007 = vmatprep.subr.msk.bf16.mxu0 %vm549_vm3, %v4005_v41 }
  0x4b   :  { %582 = vmatpush2.bf16.msra.mxu0 %v551_v43 }
  0x4c   :  { %583 = vmatprep.subr.bf16.mxu0 %v4646_v44 }
  0x4f   :  { %584 = vmatpush2.bf16.msra.mxu0 %v4644_v45  ;;  %v4019_v45 = vcombine.high %v672_v42, %v672_v42 }
  0x50   :  { %585 = vmatprep.subr.bf16.mxu0 %v4650_v46  ;;  %v4018_v46 = vcombine.low %v672_v42, %v672_v42  ;;  %v4755_v42 = vld [vmem:[#allocation3 + $0x620] ss:$20 sps:$4 sm:$0xff]  }
  0x53   :  { %586 = vmatpush2.bf16.msra.mxu0 %v4648_v47  ;;  %v4664_v47 = vld [vmem:[#allocation3 + $0x414] ss:$20 sps:$4 sm:$0xff]  }
  0x54   :  { %587 = vmatprep.subr.bf16.mxu0 %v4654_v10 }
  0x57   :  { %588 = vmatpush2.bf16.msra.mxu0 %v4652_v11 }
  0x58   :  { %589 = vmatprep.subr.bf16.mxu0 %v4658_v13  ;;  %v4683_v13 = vld [vmem:[#allocation3 + $0x580] ss:$20 sps:$4 sm:$0xff]  }
  0x5b   :  { %590 = vmatpush2.bf16.msra.mxu0 %v4656_v14 }
  0x5c   :  { %4020 = vmatprep.subr.msk.bf16.mxu0 %vm549_vm3, %v4019_v45 }
  0xea   :  { %v118_v54 = vpop.f32.mrf.mxu0 }
  0xeb   :  { %v119_v55 = vadd.f32 %v118_v54, %v60_v53  ;;  %v734_v54 = vsel %vm549_vm3, %v4018_v46, 0  ;;  %v4674_v46 = vld [vmem:[#allocation3 + $0x5a0] ss:$20 sps:$4 sm:$0xff]  }
  0xec   :  { %v4377_v56 = vpop.f32.mrf.mxu0 }
  0xed   :  { %v124_v57 = vmax.f32 %v119_v55, 0.0 }
  0xee   :  { %v121_v58 = vpop.f32.mrf.mxu0 }
  0xef   :  { %v141_v60 = vpack.c.bf16 %v124_v57, %v124_v57  ;;  %v4662_v57 = vld [vmem:[#allocation3 + $0x410] ss:$20 sps:$4 sm:$0xff]  }
  0xf0   :  { %v4378_v61 = vpop.f32.mrf.mxu0 }
  0xf1   :  { %266 = vmatmul.mubr.bf16.vlgmr.msra.gmra.mxu1 %v141_v60  ;;  %v4667_v60 = vld [vmem:[#allocation3 + $0x3ec] ss:$20 sps:$4 sm:$0xff]  }
  0xf2   :  { %601 = vmatpush1.bf16.msra.mxu1 %v4612_v59 }
  0xf3   :  { %602 = vmatprep.subr.bf16.mxu1 %v5081_v23 }
  0xf6   :  { %603 = vmatpush1.bf16.msra.mxu1 %v4616_v62 }
  0xf7   :  { %604 = vmatprep.subr.bf16.mxu1 %v5081_v23 }
  0xfa   :  { %605 = vmatpush1.bf16.msra.mxu1 %v4620_v63  ;;  %v4665_v63 = vld [vmem:[#allocation3 + $0x3e8] ss:$20 sps:$4 sm:$0xff]  }
  0xfb   :  { %606 = vmatprep.subr.bf16.mxu1 %v5081_v23 }
  0xfe   :  { %607 = vmatpush1.bf16.msra.mxu1 %v4624_v1  ;;  %v4670_v1 = vld [vmem:[#allocation3 + $0x3c4] ss:$20 sps:$4 sm:$0xff]  }
  0xff   :  { %608 = vmatprep.subr.bf16.mxu1 %v5081_v23 }
 0x102   :  { %609 = vmatpush1.bf16.msra.mxu1 %v4628_v2 }
 0x103   :  { %610 = vmatprep.subr.bf16.mxu1 %v5081_v23 }
 0x106   :  { %611 = vmatpush1.bf16.msra.mxu1 %v4632_v3  ;;  %v4668_v3 = vld [vmem:[#allocation3 + $0x3c0] ss:$20 sps:$4 sm:$0xff]  }
 0x107   :  { %612 = vmatprep.subr.bf16.mxu1 %v5081_v23 }
 0x10a   :  { %613 = vmatpush1.bf16.msra.mxu1 %v4636_v4  ;;  %v4673_v4 = vld [vmem:[#allocation3 + $0x39c] ss:$20 sps:$4 sm:$0xff]  }
 0x10b   :  { %614 = vmatprep.subr.bf16.mxu1 %v5081_v23 }
 0x10e   :  { %615 = vmatpush1.bf16.msra.mxu1 %v4640_v5  ;;  %v4671_v5 = vld [vmem:[#allocation3 + $0x398] ss:$20 sps:$4 sm:$0xff]  }
 0x10f   :  { %622 = vmatprep.subr.bf16.mxu1 %v5081_v23 }
 0x112   :  { %623 = vmatpush2.bf16.msra.mxu1 %v557_v7  ;;  %v4677_v7 = vld [vmem:[#allocation3 + $0x5a8] ss:$20 sps:$4 sm:$0xff]  }
 0x113   :  { %624 = vmatprep.subr.bf16.mxu1 %v5081_v23 }
 0x116   :  { %625 = vmatpush2.bf16.msra.mxu1 %v4647_v8  ;;  %v4679_v8 = vld [vmem:[#allocation3 + $0x5ac] ss:$20 sps:$4 sm:$0xff]  }
 0x117   :  { %626 = vmatprep.subr.bf16.mxu1 %v5081_v23 }
 0x11a   :  { %627 = vmatpush2.bf16.msra.mxu1 %v4651_v9  ;;  %v4685_v9 = vld [vmem:[#allocation3 + $0x584] ss:$20 sps:$4 sm:$0xff]  }
 0x11b   :  { %628 = vmatprep.subr.bf16.mxu1 %v5081_v23 }
 0x11e   :  { %629 = vmatpush2.bf16.msra.mxu1 %v4655_v12 }
 0x11f   :  { %630 = vmatprep.subr.bf16.mxu1 %v5081_v23 }
 0x122   :  { %631 = vmatpush2.bf16.msra.mxu1 %v4659_v15  ;;  %v4691_v15 = vld [vmem:[#allocation3 + $0x55c] ss:$20 sps:$4 sm:$0xff]  }
 0x123   :  { %1231 = vmatprep.subr.bf16.mxu1 %v4679_v8  ;;  %v4740_v8 = vld [vmem:[#allocation3 + $0x668] ss:$20 sps:$4 sm:$0xff]  }
 0x1b1   :  { %v267_v21 = vpop.f32.mrf.mxu1 }
 0x1b2   :  { %v268_v22 = vadd.f32 %v267_v21, %v148_v19  ;;  %v4689_v19 = vld [vmem:[#allocation3 + $0x558] ss:$20 sps:$4 sm:$0xff]   ;;  %v4695_v21 = vld [vmem:[#allocation3 + $0x530] ss:$20 sps:$4 sm:$0xff]  }
 0x1b3   :  { %v269_v24 = vpop.f32.mrf.mxu1 }
 0x1b4   :  { %v270_v25 = vadd.f32 %v269_v24, %v152_v20  ;;  %v274_v26 = vmax.f32 %v268_v22, 0.0  ;;  %v4697_v20 = vld [vmem:[#allocation3 + $0x534] ss:$20 sps:$4 sm:$0xff]   ;;  %v4703_v22 = vld [vmem:[#allocation3 + $0x50c] ss:$20 sps:$4 sm:$0xff]  }
 0x1b5   :  { %v271_v27 = vpop.f32.mrf.mxu1  ;;  %v4701_v24 = vld [vmem:[#allocation3 + $0x508] ss:$20 sps:$4 sm:$0xff]  }
 0x1b6   :  { %v275_v28 = vmax.f32 %v270_v25, 0.0  ;;  %v326_v31 = vpack.c.bf16 %v274_v26, %v274_v26  ;;  %v4709_v25 = vld [vmem:[#allocation3 + $0x4e4] ss:$20 sps:$4 sm:$0xff]   ;;  %v4707_v26 = vld [vmem:[#allocation3 + $0x4e0] ss:$20 sps:$4 sm:$0xff]  }
 0x1b7   :  { %v272_v29 = vpop.f32.mrf.mxu1  ;;  %v4715_v27 = vld [vmem:[#allocation3 + $0x4bc] ss:$20 sps:$4 sm:$0xff]  }
 0x1b8   :  { %v327_v30 = vpack.c.bf16 %v275_v28, %v275_v28  ;;  %v4713_v28 = vld [vmem:[#allocation3 + $0x4b8] ss:$20 sps:$4 sm:$0xff]   ;;  %v4721_v29 = vld [vmem:[#allocation3 + $0x494] ss:$20 sps:$4 sm:$0xff]  }
 0x1ba   :  { %4008 = vmatprep.mubr.msk.bf16.mxu0 %vm545_vm4, %v327_v30  ;;  %4009 = vmatprep.mubr.msk.bf16.mxu1 %vm545_vm4, %v327_v30  ;;  %v4719_v30 = vld [vmem:[#allocation3 + $0x490] ss:$20 sps:$4 sm:$0xff]  }
 0x1bb   :  { %592 = vmatmul.mubr.bf16.vlgmr.msra.gmra.mxu0 %v326_v31  ;;  %633 = vmatmul.mubr.bf16.vlgmr.msra.gmra.mxu1 %v326_v31  ;;  %v4727_v31 = vld [vmem:[#allocation3 + $0x6ec] ss:$20 sps:$4 sm:$0xff]  }
 0x1bc   :  { %771 = vmatprep.mubr.bf16.mxu0 %v5081_v23  ;;  %746 = vmatpush1.bf16.msra.mxu0 %v734_v54  ;;  %v4694_v54 = vld [vmem:[#allocation3 + $0x52c] ss:$20 sps:$4 sm:$0xff]  }
 0x1bd   :  { %747 = vmatprep.subr.bf16.mxu0 %v4664_v47  ;;  %1232 = vmatpush1.bf16.msra.mxu1 %v4677_v7  ;;  %v4742_v7 = vld [vmem:[#allocation3 + $0x66c] ss:$20 sps:$4 sm:$0xff]  }
 0x1be   :  { %1233 = vmatprep.subr.bf16.mxu1 %v4685_v9  ;;  %v4748_v9 = vld [vmem:[#allocation3 + $0x644] ss:$20 sps:$4 sm:$0xff]  }
 0x1c0   :  { %748 = vmatpush1.bf16.msra.mxu0 %v4662_v57  ;;  %v4698_v57 = vld [vmem:[#allocation3 + $0x500] ss:$20 sps:$4 sm:$0xff]  }
 0x1c1   :  { %749 = vmatprep.subr.bf16.mxu0 %v4667_v60  ;;  %1234 = vmatpush1.bf16.msra.mxu1 %v4683_v13  ;;  %v4712_v60 = vld [vmem:[#allocation3 + $0x4b4] ss:$20 sps:$4 sm:$0xff]  }
 0x1c2   :  { %1235 = vmatprep.subr.bf16.mxu1 %v4691_v15  ;;  %v4760_v13 = vld [vmem:[#allocation3 + $0x5f4] ss:$20 sps:$4 sm:$0xff]   ;;  %v4758_v15 = vld [vmem:[#allocation3 + $0x5f0] ss:$20 sps:$4 sm:$0xff]  }
 0x1c4   :  { %750 = vmatpush1.bf16.msra.mxu0 %v4665_v63  ;;  %v4716_v63 = vld [vmem:[#allocation3 + $0x488] ss:$20 sps:$4 sm:$0xff]  }
 0x1c5   :  { %751 = vmatprep.subr.bf16.mxu0 %v4670_v1  ;;  %1236 = vmatpush1.bf16.msra.mxu1 %v4689_v19  ;;  %v4724_v1 = vld [vmem:[#allocation3 + $0x6e4] ss:$20 sps:$4 sm:$0xff]   ;;  %v4764_v19 = vld [vmem:[#allocation3 + $0x5c8] ss:$20 sps:$4 sm:$0xff]  }
 0x1c6   :  { %1237 = vmatprep.subr.bf16.mxu1 %v4697_v20  ;;  %v4767_v20 = vld [vmem:[#allocation3 + $0x5d0] ss:$20 sps:$4 sm:$0xff]  }
 0x1c8   :  { %752 = vmatpush1.bf16.msra.mxu0 %v4668_v3  ;;  %v4730_v3 = vld [vmem:[#allocation3 + $0x6bc] ss:$20 sps:$4 sm:$0xff]  }
 0x1c9   :  { %753 = vmatprep.subr.bf16.mxu0 %v4673_v4  ;;  %1238 = vmatpush1.bf16.msra.mxu1 %v4695_v21  ;;  %v4728_v4 = vld [vmem:[#allocation3 + $0x6b8] ss:$20 sps:$4 sm:$0xff]  }
 0x1ca   :  { %1239 = vmatprep.subr.bf16.mxu1 %v4703_v22  ;;  %v4772_v21 = vld [vmem:[#allocation3 + $0x84c] ss:$20 sps:$4 sm:$0xff]  }
 0x1cb   :  { %v4796_v22 = vld [vmem:[#allocation3 + $0xacc] ss:$20 sps:$4 sm:$0xff]  }
 0x1cc   :  { %754 = vmatpush1.bf16.msra.mxu0 %v4671_v5  ;;  %v4736_v5 = vld [vmem:[#allocation3 + $0x694] ss:$20 sps:$4 sm:$0xff]  }
 0x1cd   :  { %1190 = vmatprep.subr.bf16.mxu0 %v4676_v6  ;;  %1240 = vmatpush1.bf16.msra.mxu1 %v4701_v24  ;;  %v4734_v6 = vld [vmem:[#allocation3 + $0x690] ss:$20 sps:$4 sm:$0xff]  }
 0x1ce   :  { %1241 = vmatprep.subr.bf16.mxu1 %v4709_v25  ;;  %v674_v24 = vld [vmem:[#allocation3 + $0x460] sm:$0x11] }
 0x1cf   :  { %v675_v25 = vunpack.c.l.bf16 %v674_v24 }
 0x1d1   :  { %1242 = vmatpush1.bf16.msra.mxu1 %v4707_v26  ;;  %v676_v26 = vunpack.c.h.bf16 %v674_v24  ;;  %v4844_v24 = vld [vmem:[#allocation3 + $0xaf4] ss:$20 sps:$4 sm:$0xff]  }
 0x1d2   :  { %1243 = vmatprep.subr.bf16.mxu1 %v4715_v27  ;;  %v680_v27 = vrot.slane %v675_v25, %v5145_v52  ;;  %v4839_v25 = vld [vmem:[#allocation3 + $0x870] ss:$20 sps:$4 sm:$0xff]  }
 0x1d5   :  { %1244 = vmatpush1.bf16.msra.mxu1 %v4713_v28  ;;  %v684_v28 = vrot.slane %v676_v26, %v5145_v52  ;;  %v4842_v26 = vld [vmem:[#allocation3 + $0xaf0] ss:$20 sps:$4 sm:$0xff]  }
 0x1d6   :  { %1245 = vmatprep.subr.bf16.mxu1 %v4721_v29 }
 0x1d9   :  { %1246 = vmatpush1.bf16.msra.mxu1 %v4719_v30 }
 0x1da   :  { %1247 = vmatprep.subr.bf16.mxu1 %v4727_v31 }
 0x1dd   :  { %1248 = vmatpush2.bf16.msra.mxu1 %v4725_v32 }
 0x1de   :  { %1249 = vmatprep.subr.bf16.mxu1 %v4733_v33 }
 0x1e1   :  { %1250 = vmatpush2.bf16.msra.mxu1 %v4731_v34 }
 0x1e2   :  { %1251 = vmatprep.subr.bf16.mxu1 %v4739_v35 }
 0x27b   :  { %v593_v39 = vpop.f32.mrf.mxu0  ;;  %v634_v40 = vpop.f32.mrf.mxu1 }
 0x27c   :  { %v635_v41 = vadd.f32 %v634_v40, %v344_v36  ;;  %v5171_v61 = vadd.f32 %v593_v39, %v336_v49  ;;  %v4737_v36 = vld [vmem:[#allocation3 + $0x698] ss:$20 sps:$4 sm:$0xff]   ;;  %v4749_v40 = vld [vmem:[#allocation3 + $0x648] ss:$20 sps:$4 sm:$0xff]  }
 0x27d   :  { %v595_v43 = vpop.f32.mrf.mxu0  ;;  %v636_v44 = vpop.f32.mrf.mxu1  ;;  %1252 = vmatpush2.bf16.msra.mxu1 %v4737_v36  ;;  %v4751_v39 = vld [vmem:[#allocation3 + $0x64c] ss:$20 sps:$4 sm:$0xff]   ;;  %v4682_v49 = vld [vmem:[#allocation3 + $0x57c] ss:$20 sps:$4 sm:$0xff]  }
 0x27e   :  { %v596_v50 = vadd.f32 %v595_v43, %v340_v38  ;;  %v642_v55 = vmax.f32 %v635_v41, 0.0  ;;  %v640_v2 = vmax.f32 %v5171_v61, 0.0  ;;  %v4743_v38 = vld [vmem:[#allocation3 + $0x670] ss:$20 sps:$4 sm:$0xff]   ;;  %1253 = vmatprep.subr.bf16.mxu1 %v4745_v37 }
 0x27f   :  { %v597_v51 = vpop.f32.mrf.mxu0  ;;  %v637_v53 = vpop.f32.mrf.mxu1  ;;  %v4757_v41 = vld [vmem:[#allocation3 + $0x624] ss:$20 sps:$4 sm:$0xff]  }
 0x280   :  { %v641_v56 = vmax.f32 %v596_v50, 0.0  ;;  %v4680_v50 = vld [vmem:[#allocation3 + $0x578] ss:$20 sps:$4 sm:$0xff]   ;;  %v4688_v51 = vld [vmem:[#allocation3 + $0x554] ss:$20 sps:$4 sm:$0xff]  }
 0x281   :  { %v598_v58 = vpop.f32.mrf.mxu0  ;;  %v638_v59 = vpop.f32.mrf.mxu1  ;;  %1254 = vmatpush2.bf16.msra.mxu1 %v4743_v38  ;;  %v4686_v53 = vld [vmem:[#allocation3 + $0x550] ss:$20 sps:$4 sm:$0xff]   ;;  %v4770_v38 = vld [vmem:[#allocation3 + $0x848] ss:$20 sps:$4 sm:$0xff]  }
 0x282   :  { %v4556_v62 = vpack.i.bf16 %v642_v55, %v641_v56  ;;  %1255 = vmatprep.subr.bf16.mxu1 %v4751_v39  ;;  %v4692_v55 = vld [vmem:[#allocation3 + $0x528] ss:$20 sps:$4 sm:$0xff]   ;;  %v4704_v59 = vld [vmem:[#allocation3 + $0x4d8] ss:$20 sps:$4 sm:$0xff]   ;;  %v4710_v61 = vld [vmem:[#allocation3 + $0x4b0] ss:$20 sps:$4 sm:$0xff]  }
 0x283   :  { %v4706_v58 = vld [vmem:[#allocation3 + $0x4dc] ss:$20 sps:$4 sm:$0xff]  }
 0x284   :  { %4557 = vrot.lane.b32.xlu0 %v4556_v62, %s5082_s29  ;;  %v4718_v62 = vld [vmem:[#allocation3 + $0x48c] ss:$20 sps:$4 sm:$0xff]   ;;  %v4794_v39 = vld [vmem:[#allocation3 + $0xac8] ss:$20 sps:$4 sm:$0xff]  }
 0x285   :  { %1256 = vmatpush2.bf16.msra.mxu1 %v4749_v40 }
 0x286   :  { %1257 = vmatprep.subr.bf16.mxu1 %v4757_v41  ;;  %v4775_v41 = vld [vmem:[#allocation3 + $0x824] ss:$20 sps:$4 sm:$0xff]  }
 0x288   :  { %645 = vrot.lane.b32.xlu0 %v640_v2, %s5082_s29 }
 0x289   :  { %1258 = vmatpush2.bf16.msra.mxu1 %v4755_v42  ;;  %v4802_v42 = vld [vmem:[#allocation3 + $0xaa4] ss:$20 sps:$4 sm:$0xff]  }
 0x2f6   :  { %v4558_v10 = vpop.permute.xlu0 %4557 }
 0x2f7   :  { %v4560_v11 = vunpack.i.h.bf16 %v4558_v10  ;;  %v4559_v12 = vunpack.i.l.bf16 %v4558_v10  ;;  %v4746_v10 = vld [vmem:[#allocation3 + $0x640] ss:$20 sps:$4 sm:$0xff]  }
 0x2f9   :  { %v656_v14 = vsel %vm649_vm5, %v4559_v12, %v4560_v11  ;;  %v4754_v11 = vld [vmem:[#allocation3 + $0x61c] ss:$20 sps:$4 sm:$0xff]  }
 0x2fa   :  { %v646_v16 = vpop.permute.xlu0 %645  ;;  %v658_v17 = vmax.f32 %v641_v56, %v656_v14  ;;  %v4700_v56 = vld [vmem:[#allocation3 + $0x504] ss:$20 sps:$4 sm:$0xff]   ;;  %v4763_v14 = vld [vmem:[#allocation3 + $0x5fc] ss:$20 sps:$4 sm:$0xff]  }
 0x2fb   :  { %v650_v18 = vsel %vm649_vm5, %v646_v16, %v4559_v12  ;;  %v4752_v12 = vld [vmem:[#allocation3 + $0x618] ss:$20 sps:$4 sm:$0xff]   ;;  %1259 = vmatprep.subr.bf16.mxu1 %v4763_v14 }
 0x2fc   :  { %660 = vrot.lane.b32.xlu1 %v658_v17, %s5083_s30  ;;  %v652_v43 = vmax.f32 %v640_v2, %v650_v18  ;;  %v4722_v2 = vld [vmem:[#allocation3 + $0x6e0] ss:$20 sps:$4 sm:$0xff]   ;;  %v4761_v16 = vld [vmem:[#allocation3 + $0x5f8] ss:$20 sps:$4 sm:$0xff]  }
 0x2fd   :  { %1260 = vmatpush2.bf16.msra.mxu1 %v4761_v16  ;;  %v4766_v17 = vld [vmem:[#allocation3 + $0x5cc] ss:$20 sps:$4 sm:$0xff]   ;;  %v4769_v18 = vld [vmem:[#allocation3 + $0x5d4] ss:$20 sps:$4 sm:$0xff]   ;;  %v4829_v16 = vld [vmem:[#allocation3 + $0x8c4] ss:$20 sps:$4 sm:$0xff]  }
 0x2fe   :  { %1261 = vmatprep.subr.bf16.mxu1 %v4769_v18  ;;  %v4823_v14 = vld [vmem:[#allocation3 + $0x8ec] ss:$20 sps:$4 sm:$0xff]   ;;  %v4835_v18 = vld [vmem:[#allocation3 + $0x89c] ss:$20 sps:$4 sm:$0xff]  }
 0x301   :  { %1262 = vmatpush2.bf16.msra.mxu1 %v4767_v20  ;;  %v4833_v20 = vld [vmem:[#allocation3 + $0x898] ss:$20 sps:$4 sm:$0xff]  }
 0x302   :  { %2153 = vmatprep.subr.bf16.mxu1 %v4796_v22  ;;  %v4841_v22 = vld [vmem:[#allocation3 + $0x874] ss:$20 sps:$4 sm:$0xff]  }
 0x36e   :  { %v661_v44 = vpop.permute.xlu1 %660 }
 0x36f   :  { %v663_v45 = vmax.f32 %v652_v43, %v661_v44  ;;  %v4773_v43 = vld [vmem:[#allocation3 + $0x820] ss:$20 sps:$4 sm:$0xff]  }
 0x370   :  { %v4800_v44 = vld [vmem:[#allocation3 + $0xaa0] ss:$20 sps:$4 sm:$0xff]  }
 0x371   :  { %v673_v47 = vpack.c.bf16 %v663_v45, %v663_v45  ;;  %v4778_v45 = vld [vmem:[#allocation3 + $0x7fc] ss:$20 sps:$4 sm:$0xff]  }
 0x373   :  { %4021 = vmatmul.mubr.msk.bf16.vlgmr.msra.gmra.mxu0 %vm545_vm4, %v673_v47  ;;  %v4776_v47 = vld [vmem:[#allocation3 + $0x7f8] ss:$20 sps:$4 sm:$0xff]  }
 0x374   :  { %1191 = vmatpush1.bf16.msra.mxu0 %v4674_v46  ;;  %v4808_v46 = vld [vmem:[#allocation3 + $0xa7c] ss:$20 sps:$4 sm:$0xff]  }
 0x375   :  { %1192 = vmatprep.subr.bf16.mxu0 %v4682_v49  ;;  %v4806_v49 = vld [vmem:[#allocation3 + $0xa78] ss:$20 sps:$4 sm:$0xff]  }
 0x378   :  { %1193 = vmatpush1.bf16.msra.mxu0 %v4680_v50  ;;  %v4781_v50 = vld [vmem:[#allocation3 + $0x7d4] ss:$20 sps:$4 sm:$0xff]  }
 0x379   :  { %1194 = vmatprep.subr.bf16.mxu0 %v4688_v51  ;;  %v4814_v51 = vld [vmem:[#allocation3 + $0xa54] ss:$20 sps:$4 sm:$0xff]  }
 0x37c   :  { %1195 = vmatpush1.bf16.msra.mxu0 %v4686_v53  ;;  %v4779_v53 = vld [vmem:[#allocation3 + $0x7d0] ss:$20 sps:$4 sm:$0xff]  }
 0x37d   :  { %1196 = vmatprep.subr.bf16.mxu0 %v4694_v54  ;;  %v4812_v54 = vld [vmem:[#allocation3 + $0xa50] ss:$20 sps:$4 sm:$0xff]  }
 0x380   :  { %1197 = vmatpush1.bf16.msra.mxu0 %v4692_v55  ;;  %v4784_v55 = vld [vmem:[#allocation3 + $0x7ac] ss:$20 sps:$4 sm:$0xff]  }
 0x381   :  { %1198 = vmatprep.subr.bf16.mxu0 %v4700_v56  ;;  %v4820_v56 = vld [vmem:[#allocation3 + $0xa2c] ss:$20 sps:$4 sm:$0xff]  }
 0x384   :  { %1199 = vmatpush1.bf16.msra.mxu0 %v4698_v57  ;;  %v4782_v57 = vld [vmem:[#allocation3 + $0x7a8] ss:$20 sps:$4 sm:$0xff]  }
 0x385   :  { %1200 = vmatprep.subr.bf16.mxu0 %v4706_v58  ;;  %v4818_v58 = vld [vmem:[#allocation3 + $0xa28] ss:$20 sps:$4 sm:$0xff]  }
 0x388   :  { %1201 = vmatpush1.bf16.msra.mxu0 %v4704_v59  ;;  %v4787_v59 = vld [vmem:[#allocation3 + $0x784] ss:$20 sps:$4 sm:$0xff]  }
 0x389   :  { %1202 = vmatprep.subr.bf16.mxu0 %v4712_v60  ;;  %v4826_v60 = vld [vmem:[#allocation3 + $0xa04] ss:$20 sps:$4 sm:$0xff]  }
 0x38c   :  { %1203 = vmatpush1.bf16.msra.mxu0 %v4710_v61  ;;  %v4785_v61 = vld [vmem:[#allocation3 + $0x780] ss:$20 sps:$4 sm:$0xff]  }
 0x38d   :  { %1204 = vmatprep.subr.bf16.mxu0 %v4718_v62  ;;  %v4824_v62 = vld [vmem:[#allocation3 + $0xa00] ss:$20 sps:$4 sm:$0xff]  }
 0x390   :  { %1205 = vmatpush1.bf16.msra.mxu0 %v4716_v63  ;;  %v4790_v63 = vld [vmem:[#allocation3 + $0x75c] ss:$20 sps:$4 sm:$0xff]  }
 0x391   :  { %1206 = vmatprep.subr.bf16.mxu0 %v4724_v1  ;;  %v4832_v1 = vld [vmem:[#allocation3 + $0x9dc] ss:$20 sps:$4 sm:$0xff]  }
 0x394   :  { %1207 = vmatpush2.bf16.msra.mxu0 %v4722_v2  ;;  %v4788_v2 = vld [vmem:[#allocation3 + $0x758] ss:$20 sps:$4 sm:$0xff]  }
 0x395   :  { %1208 = vmatprep.subr.bf16.mxu0 %v4730_v3  ;;  %v4830_v3 = vld [vmem:[#allocation3 + $0x9d8] ss:$20 sps:$4 sm:$0xff]  }
 0x398   :  { %1209 = vmatpush2.bf16.msra.mxu0 %v4728_v4  ;;  %v4793_v4 = vld [vmem:[#allocation3 + $0x734] ss:$20 sps:$4 sm:$0xff]  }
 0x399   :  { %1210 = vmatprep.subr.bf16.mxu0 %v4736_v5  ;;  %v4791_v5 = vld [vmem:[#allocation3 + $0x730] ss:$20 sps:$4 sm:$0xff]  }
 0x39c   :  { %1211 = vmatpush2.bf16.msra.mxu0 %v4734_v6  ;;  %v4799_v6 = vld [vmem:[#allocation3 + $0x98c] ss:$20 sps:$4 sm:$0xff]  }
 0x39d   :  { %1212 = vmatprep.subr.bf16.mxu0 %v4742_v7  ;;  %v4797_v7 = vld [vmem:[#allocation3 + $0x988] ss:$20 sps:$4 sm:$0xff]  }
 0x3a0   :  { %1213 = vmatpush2.bf16.msra.mxu0 %v4740_v8  ;;  %v4805_v8 = vld [vmem:[#allocation3 + $0x964] ss:$20 sps:$4 sm:$0xff]  }
 0x3a1   :  { %1214 = vmatprep.subr.bf16.mxu0 %v4748_v9  ;;  %v4803_v9 = vld [vmem:[#allocation3 + $0x960] ss:$20 sps:$4 sm:$0xff]  }
 0x3a4   :  { %1215 = vmatpush2.bf16.msra.mxu0 %v4746_v10  ;;  %v4811_v10 = vld [vmem:[#allocation3 + $0x93c] ss:$20 sps:$4 sm:$0xff]  }
 0x3a5   :  { %1216 = vmatprep.subr.bf16.mxu0 %v4754_v11  ;;  %v4809_v11 = vld [vmem:[#allocation3 + $0x938] ss:$20 sps:$4 sm:$0xff]  }
 0x3a8   :  { %1217 = vmatpush2.bf16.msra.mxu0 %v4752_v12  ;;  %v4817_v12 = vld [vmem:[#allocation3 + $0x914] ss:$20 sps:$4 sm:$0xff]  }
 0x3a9   :  { %1218 = vmatprep.subr.bf16.mxu0 %v4760_v13  ;;  %v4815_v13 = vld [vmem:[#allocation3 + $0x910] ss:$20 sps:$4 sm:$0xff]  }
 0x3ac   :  { %1219 = vmatpush2.bf16.msra.mxu0 %v4758_v15  ;;  %v4821_v15 = vld [vmem:[#allocation3 + $0x8e8] ss:$20 sps:$4 sm:$0xff]  }
 0x3ad   :  { %1220 = vmatprep.subr.bf16.mxu0 %v4766_v17  ;;  %v4827_v17 = vld [vmem:[#allocation3 + $0x8c0] ss:$20 sps:$4 sm:$0xff]  }
 0x3b0   :  { %1221 = vmatpush2.bf16.msra.mxu0 %v4764_v19  ;;  %v4838_v19 = vld [vmem:[#allocation3 + $0x9b4] ss:$20 sps:$4 sm:$0xff]  }
 0x3b1   :  { %2112 = vmatprep.subr.bf16.mxu0 %v4772_v21  ;;  %v4836_v21 = vld [vmem:[#allocation3 + $0x9b0] ss:$20 sps:$4 sm:$0xff]  }
 0x433   :  { %v773_v29 = vpop.f32.mrf.mxu0 }
 0x434   :  { %v774_v30 = vadd.f32 %v773_v29, %v680_v27  ;;  %v4847_v27 = vld [vmem:[#allocation3 + $0x854] ss:$20 sps:$4 sm:$0xff]  }
 0x435   :  { %v775_v31 = vpop.f32.mrf.mxu0  ;;  %v848_v29 = vld [vmem:[#allocation3 + $0x708] sm:$0x11] }
 0x436   :  { %v776_v32 = vadd.f32 %v775_v31, %v684_v28  ;;  %v780_v33 = vmax.f32 %v774_v30, 0.0  ;;  %v4850_v28 = vld [vmem:[#allocation3 + $0xad4] ss:$20 sps:$4 sm:$0xff]   ;;  %v850_v31 = vunpack.c.l.bf16 %v848_v29 }
 0x437   :  { %v777_v34 = vpop.f32.mrf.mxu0  ;;  %v849_v30 = vld [vmem:[#allocation3 + $0x710] sm:$0x11] }
 0x438   :  { %v781_v35 = vmax.f32 %v776_v32, 0.0  ;;  %v846_v40 = vpack.c.bf16 %v780_v33, %v780_v33  ;;  %v852_v32 = vunpack.c.l.bf16 %v849_v30  ;;  %v851_v33 = vunpack.c.h.bf16 %v848_v29  ;;  %v4895_v29 = vld [vmem:[#allocation3 + $0x994] ss:$20 sps:$4 sm:$0xff]  }
 0x439   :  { %v778_v36 = vpop.f32.mrf.mxu0  ;;  %v853_v34 = vunpack.c.h.bf16 %v849_v30  ;;  %v4898_v30 = vld [vmem:[#allocation3 + $0xafc] ss:$20 sps:$4 sm:$0xff]  }
 0x43a   :  { %v847_v37 = vpack.c.bf16 %v781_v35, %v781_v35  ;;  %v857_v35 = vrot.slane %v850_v31, %v5145_v52  ;;  %v865_v36 = vrot.slane %v852_v32, %v5145_v52  ;;  %v4893_v31 = vld [vmem:[#allocation3 + $0x990] ss:$20 sps:$4 sm:$0xff]   ;;  %v4896_v32 = vld [vmem:[#allocation3 + $0xaf8] ss:$20 sps:$4 sm:$0xff]  }
 0x43c   :  { %1222 = vmatprep.mubr.bf16.mxu0 %v847_v37  ;;  %1263 = vmatprep.mubr.bf16.mxu1 %v847_v37  ;;  %v861_v37 = vrot.slane %v851_v33, %v5145_v52  ;;  %v4901_v33 = vld [vmem:[#allocation3 + $0x96c] ss:$20 sps:$4 sm:$0xff]  }
 0x43d   :  { %1223 = vmatmul.mubr.bf16.vlgmr.msra.gmra.mxu0 %v846_v40  ;;  %1264 = vmatmul.mubr.bf16.vlgmr.msra.gmra.mxu1 %v846_v40 }
 0x43e   :  { %2113 = vmatpush1.bf16.msra.mxu0 %v4770_v38  ;;  %2154 = vmatpush1.bf16.msra.mxu1 %v4794_v39  ;;  %v869_v38 = vrot.slane %v853_v34, %v5145_v52  ;;  %v4902_v34 = vld [vmem:[#allocation3 + $0x998] ss:$20 sps:$4 sm:$0xff]  }
 0x43f   :  { %2114 = vmatprep.subr.bf16.mxu0 %v4775_v41  ;;  %2155 = vmatprep.subr.bf16.mxu1 %v4802_v42 }
 0x442   :  { %2115 = vmatpush1.bf16.msra.mxu0 %v4773_v43  ;;  %2156 = vmatpush1.bf16.msra.mxu1 %v4800_v44 }
 0x443   :  { %2116 = vmatprep.subr.bf16.mxu0 %v4778_v45  ;;  %2157 = vmatprep.subr.bf16.mxu1 %v4808_v46 }
 0x446   :  { %2117 = vmatpush1.bf16.msra.mxu0 %v4776_v47  ;;  %2158 = vmatpush1.bf16.msra.mxu1 %v4806_v49 }
 0x447   :  { %2118 = vmatprep.subr.bf16.mxu0 %v4781_v50  ;;  %2159 = vmatprep.subr.bf16.mxu1 %v4814_v51 }
 0x44a   :  { %2119 = vmatpush1.bf16.msra.mxu0 %v4779_v53  ;;  %2160 = vmatpush1.bf16.msra.mxu1 %v4812_v54 }
 0x44b   :  { %2120 = vmatprep.subr.bf16.mxu0 %v4784_v55  ;;  %2161 = vmatprep.subr.bf16.mxu1 %v4820_v56 }
 0x44e   :  { %2121 = vmatpush1.bf16.msra.mxu0 %v4782_v57  ;;  %2162 = vmatpush1.bf16.msra.mxu1 %v4818_v58 }
 0x44f   :  { %2122 = vmatprep.subr.bf16.mxu0 %v4787_v59  ;;  %2163 = vmatprep.subr.bf16.mxu1 %v4826_v60  ;;  %v4845_v59 = vld [vmem:[#allocation3 + $0x850] ss:$20 sps:$4 sm:$0xff]  }
 0x450   :  { %v4848_v60 = vld [vmem:[#allocation3 + $0xad0] ss:$20 sps:$4 sm:$0xff]  }
 0x452   :  { %2123 = vmatpush1.bf16.msra.mxu0 %v4785_v61  ;;  %2164 = vmatpush1.bf16.msra.mxu1 %v4824_v62 }
 0x453   :  { %2124 = vmatprep.subr.bf16.mxu0 %v4790_v63  ;;  %2165 = vmatprep.subr.bf16.mxu1 %v4832_v1  ;;  %v4853_v63 = vld [vmem:[#allocation3 + $0x82c] ss:$20 sps:$4 sm:$0xff]  }
 0x454   :  { %v4856_v1 = vld [vmem:[#allocation3 + $0xaac] ss:$20 sps:$4 sm:$0xff]  }
 0x456   :  { %2125 = vmatpush1.bf16.msra.mxu0 %v4788_v2  ;;  %2166 = vmatpush1.bf16.msra.mxu1 %v4830_v3  ;;  %v4851_v2 = vld [vmem:[#allocation3 + $0x828] ss:$20 sps:$4 sm:$0xff]  }
 0x457   :  { %2126 = vmatprep.subr.bf16.mxu0 %v4793_v4  ;;  %2167 = vmatprep.subr.bf16.mxu1 %v4838_v19  ;;  %v4854_v3 = vld [vmem:[#allocation3 + $0xaa8] ss:$20 sps:$4 sm:$0xff]   ;;  %v4859_v4 = vld [vmem:[#allocation3 + $0x804] ss:$20 sps:$4 sm:$0xff]  }
 0x458   :  { %v4878_v19 = vld [vmem:[#allocation3 + $0xa08] ss:$20 sps:$4 sm:$0xff]  }
 0x45a   :  { %2127 = vmatpush1.bf16.msra.mxu0 %v4791_v5  ;;  %2168 = vmatpush1.bf16.msra.mxu1 %v4836_v21  ;;  %v4862_v5 = vld [vmem:[#allocation3 + $0xa84] ss:$20 sps:$4 sm:$0xff]  }
 0x45b   :  { %2128 = vmatprep.subr.bf16.mxu0 %v4799_v6  ;;  %2183 = vmatprep.subr.bf16.mxu1 %v4844_v24  ;;  %v4857_v6 = vld [vmem:[#allocation3 + $0x800] ss:$20 sps:$4 sm:$0xff]   ;;  %v4886_v21 = vld [vmem:[#allocation3 + $0x9e4] ss:$20 sps:$4 sm:$0xff]  }
 0x45c   :  { %v4884_v24 = vld [vmem:[#allocation3 + $0x9e0] ss:$20 sps:$4 sm:$0xff]  }
 0x45e   :  { %2129 = vmatpush2.bf16.msra.mxu0 %v4797_v7  ;;  %2184 = vmatpush2.bf16.msra.mxu1 %v4842_v26  ;;  %v4860_v7 = vld [vmem:[#allocation3 + $0xa80] ss:$20 sps:$4 sm:$0xff]   ;;  %v4892_v26 = vld [vmem:[#allocation3 + $0x9bc] ss:$20 sps:$4 sm:$0xff]  }
 0x45f   :  { %2130 = vmatprep.subr.bf16.mxu0 %v4805_v8  ;;  %2194 = vmatprep.subr.bf16.mxu1 %v4847_v27  ;;  %v4865_v8 = vld [vmem:[#allocation3 + $0x7dc] ss:$20 sps:$4 sm:$0xff]   ;;  %v4887_v27 = vld [vmem:[#allocation3 + $0x738] ss:$20 sps:$4 sm:$0xff]  }
 0x462   :  { %2131 = vmatpush2.bf16.msra.mxu0 %v4803_v9  ;;  %v4868_v9 = vld [vmem:[#allocation3 + $0xa5c] ss:$20 sps:$4 sm:$0xff]  }
 0x463   :  { %2132 = vmatprep.subr.bf16.mxu0 %v4811_v10  ;;  %v4863_v10 = vld [vmem:[#allocation3 + $0x7d8] ss:$20 sps:$4 sm:$0xff]  }
 0x466   :  { %2133 = vmatpush2.bf16.msra.mxu0 %v4809_v11  ;;  %v4866_v11 = vld [vmem:[#allocation3 + $0xa58] ss:$20 sps:$4 sm:$0xff]  }
 0x467   :  { %2134 = vmatprep.subr.bf16.mxu0 %v4817_v12  ;;  %v4871_v12 = vld [vmem:[#allocation3 + $0x7b4] ss:$20 sps:$4 sm:$0xff]  }
 0x46a   :  { %2135 = vmatpush2.bf16.msra.mxu0 %v4815_v13  ;;  %v4874_v13 = vld [vmem:[#allocation3 + $0xa34] ss:$20 sps:$4 sm:$0xff]  }
 0x46b   :  { %2136 = vmatprep.subr.bf16.mxu0 %v4823_v14  ;;  %v4869_v14 = vld [vmem:[#allocation3 + $0x7b0] ss:$20 sps:$4 sm:$0xff]  }
 0x46e   :  { %2137 = vmatpush2.bf16.msra.mxu0 %v4821_v15  ;;  %v4872_v15 = vld [vmem:[#allocation3 + $0xa30] ss:$20 sps:$4 sm:$0xff]  }
 0x46f   :  { %2138 = vmatprep.subr.bf16.mxu0 %v4829_v16  ;;  %v4877_v16 = vld [vmem:[#allocation3 + $0x78c] ss:$20 sps:$4 sm:$0xff]  }
 0x472   :  { %2139 = vmatpush2.bf16.msra.mxu0 %v4827_v17  ;;  %v4880_v17 = vld [vmem:[#allocation3 + $0xa0c] ss:$20 sps:$4 sm:$0xff]  }
 0x473   :  { %2140 = vmatprep.subr.bf16.mxu0 %v4835_v18  ;;  %v4875_v18 = vld [vmem:[#allocation3 + $0x788] ss:$20 sps:$4 sm:$0xff]  }
 0x476   :  { %2141 = vmatpush2.bf16.msra.mxu0 %v4833_v20  ;;  %v4883_v20 = vld [vmem:[#allocation3 + $0x764] ss:$20 sps:$4 sm:$0xff]  }
 0x477   :  { %2142 = vmatprep.subr.bf16.mxu0 %v4841_v22  ;;  %v4881_v22 = vld [vmem:[#allocation3 + $0x760] ss:$20 sps:$4 sm:$0xff]  }
 0x47a   :  { %2143 = vmatpush2.bf16.msra.mxu0 %v4839_v25  ;;  %v4889_v25 = vld [vmem:[#allocation3 + $0x73c] ss:$20 sps:$4 sm:$0xff]  }
 0x47b   :  { %2235 = vmatprep.subr.bf16.mxu0 %v4850_v28  ;;  %v4890_v28 = vld [vmem:[#allocation3 + $0x9b8] ss:$20 sps:$4 sm:$0xff]  }
 0x4fd   :  { %v1224_v39 = vpop.f32.mrf.mxu0  ;;  %v1265_v40 = vpop.f32.mrf.mxu1 }
 0x4fe   :  { %v1225_v41 = vadd.f32 %v1224_v39, %v857_v35  ;;  %v1266_v42 = vadd.f32 %v1265_v40, %v865_v36  ;;  %v4899_v35 = vld [vmem:[#allocation3 + $0x968] ss:$20 sps:$4 sm:$0xff]   ;;  %v4903_v36 = vld [vmem:[#allocation3 + $0x858] ss:$20 sps:$4 sm:$0xff]   ;;  %v4904_v39 = vld [vmem:[#allocation3 + $0x940] ss:$20 sps:$4 sm:$0xff]  }
 0x4ff   :  { %v1226_v43 = vpop.f32.mrf.mxu0  ;;  %v1267_v44 = vpop.f32.mrf.mxu1  ;;  %v4908_v40 = vld [vmem:[#allocation3 + $0x830] ss:$20 sps:$4 sm:$0xff]  }
 0x500   :  { %v1227_v45 = vadd.f32 %v1226_v43, %v861_v37  ;;  %v1268_v46 = vadd.f32 %v1267_v44, %v869_v38  ;;  %v1272_v47 = vmax.f32 %v1225_v41, 0.0  ;;  %v1274_v49 = vmax.f32 %v1266_v42, 0.0  ;;  %v4906_v37 = vld [vmem:[#allocation3 + $0x944] ss:$20 sps:$4 sm:$0xff]   ;;  %v4911_v41 = vld [vmem:[#allocation3 + $0x91c] ss:$20 sps:$4 sm:$0xff]  }
 0x501   :  { %v1228_v50 = vpop.f32.mrf.mxu0  ;;  %v1269_v51 = vpop.f32.mrf.mxu1  ;;  %v4907_v38 = vld [vmem:[#allocation3 + $0x970] ss:$20 sps:$4 sm:$0xff]   ;;  %v4912_v42 = vld [vmem:[#allocation3 + $0x948] ss:$20 sps:$4 sm:$0xff]   ;;  %v4909_v43 = vld [vmem:[#allocation3 + $0x918] ss:$20 sps:$4 sm:$0xff]  }
 0x502   :  { %v1273_v53 = vmax.f32 %v1227_v45, 0.0  ;;  %v1275_v54 = vmax.f32 %v1268_v46, 0.0  ;;  %v5190_v61 = vpack.c.bf16 %v1272_v47, %v1272_v47  ;;  %v5192_v62 = vpack.c.bf16 %v1274_v49, %v1274_v49  ;;  %v4913_v44 = vld [vmem:[#allocation3 + $0x808] ss:$20 sps:$4 sm:$0xff]   ;;  %v4917_v46 = vld [vmem:[#allocation3 + $0x920] ss:$20 sps:$4 sm:$0xff]  }
 0x503   :  { %v1229_v55 = vpop.f32.mrf.mxu0  ;;  %v1270_v56 = vpop.f32.mrf.mxu1  ;;  %v4916_v45 = vld [vmem:[#allocation3 + $0x8f4] ss:$20 sps:$4 sm:$0xff]   ;;  %v4914_v47 = vld [vmem:[#allocation3 + $0x8f0] ss:$20 sps:$4 sm:$0xff]   ;;  %v4921_v50 = vld [vmem:[#allocation3 + $0x8cc] ss:$20 sps:$4 sm:$0xff]  }
 0x504   :  { %v5186_v57 = vpack.c.bf16 %v1273_v53, %v1273_v53  ;;  %v5188_v58 = vpack.c.bf16 %v1275_v54, %v1275_v54  ;;  %v4918_v49 = vld [vmem:[#allocation3 + $0x7e0] ss:$20 sps:$4 sm:$0xff]   ;;  %v4922_v51 = vld [vmem:[#allocation3 + $0x8f8] ss:$20 sps:$4 sm:$0xff]   ;;  %v4919_v53 = vld [vmem:[#allocation3 + $0x8c8] ss:$20 sps:$4 sm:$0xff]  }
 0x505   :  { %v4923_v54 = vld [vmem:[#allocation3 + $0x7b8] ss:$20 sps:$4 sm:$0xff]   ;;  %v4927_v56 = vld [vmem:[#allocation3 + $0x8d0] ss:$20 sps:$4 sm:$0xff]  }
 0x506   :  { %2144 = vmatprep.mubr.bf16.mxu0 %v5186_v57  ;;  %4211 = vmatprep.mubr.msk.bf16.mxu1 %vm2108_vm6, %v5188_v58  ;;  %v4926_v55 = vld [vmem:[#allocation3 + $0x8a4] ss:$20 sps:$4 sm:$0xff]  }
 0x507   :  { %2145 = vmatmul.mubr.bf16.vlgmr.msra.gmra.mxu0 %v5190_v61  ;;  %2186 = vmatmul.mubr.bf16.vlgmr.msra.gmra.mxu1 %v5192_v62 }
 0x508   :  { %2195 = vmatpush1.bf16.msra.mxu1 %v4845_v59  ;;  %2236 = vmatpush1.bf16.msra.mxu0 %v4848_v60  ;;  %v4928_v59 = vld [vmem:[#allocation3 + $0x790] ss:$20 sps:$4 sm:$0xff]  }
 0x509   :  { %2226 = vmatprep.mubr.bf16.mxu1 %v5186_v57  ;;  %4212 = vmatprep.mubr.msk.bf16.mxu0 %vm2108_vm6, %v5188_v58  ;;  %v4931_v60 = vld [vmem:[#allocation3 + $0x87c] ss:$20 sps:$4 sm:$0xff]  }
 0x50a   :  { %2196 = vmatprep.subr.bf16.mxu1 %v4853_v63  ;;  %2237 = vmatprep.subr.bf16.mxu0 %v4856_v1  ;;  %v4932_v63 = vld [vmem:[#allocation3 + $0x8a8] ss:$20 sps:$4 sm:$0xff]   ;;  %v4929_v1 = vld [vmem:[#allocation3 + $0x878] ss:$20 sps:$4 sm:$0xff]  }
 0x50c   :  { %2197 = vmatpush1.bf16.msra.mxu1 %v4851_v2  ;;  %2238 = vmatpush1.bf16.msra.mxu0 %v4854_v3  ;;  %v4933_v2 = vld [vmem:[#allocation3 + $0x768] ss:$20 sps:$4 sm:$0xff]   ;;  %v4934_v3 = vld [vmem:[#allocation3 + $0x880] ss:$20 sps:$4 sm:$0xff]  }
 0x50d   :  { %2198 = vmatprep.subr.bf16.mxu1 %v4859_v4  ;;  %2239 = vmatprep.subr.bf16.mxu0 %v4862_v5  ;;  %v4935_v4 = vld [vmem:[#allocation3 + $0x740] ss:$20 sps:$4 sm:$0xff]   ;;  %v4936_v5 = vld [vmem:[#allocation3 + $0xad8] ss:$20 sps:$4 sm:$0xff]  }
 0x510   :  { %2199 = vmatpush1.bf16.msra.mxu1 %v4857_v6  ;;  %2240 = vmatpush1.bf16.msra.mxu0 %v4860_v7  ;;  %v4937_v6 = vld [vmem:[#allocation3 + $0xab0] ss:$20 sps:$4 sm:$0xff]   ;;  %v4938_v7 = vld [vmem:[#allocation3 + $0xa88] ss:$20 sps:$4 sm:$0xff]  }
 0x511   :  { %2200 = vmatprep.subr.bf16.mxu1 %v4865_v8  ;;  %2241 = vmatprep.subr.bf16.mxu0 %v4868_v9  ;;  %v4939_v8 = vld [vmem:[#allocation3 + $0xa60] ss:$20 sps:$4 sm:$0xff]   ;;  %v4940_v9 = vld [vmem:[#allocation3 + $0xa38] ss:$20 sps:$4 sm:$0xff]  }
 0x514   :  { %2201 = vmatpush1.bf16.msra.mxu1 %v4863_v10  ;;  %2242 = vmatpush1.bf16.msra.mxu0 %v4866_v11  ;;  %v4942_v10 = vld [vmem:[#allocation3 + $0x9e8] ss:$20 sps:$4 sm:$0xff]   ;;  %v4944_v11 = vld [vmem:[#allocation3 + $0xb00] ss:$20 sps:$4 sm:$0xff]  }
 0x515   :  { %2202 = vmatprep.subr.bf16.mxu1 %v4871_v12  ;;  %2243 = vmatprep.subr.bf16.mxu0 %v4874_v13  ;;  %v1430_v12 = vld [vmem:[#allocation3 + $0xb18] sm:$0x11] }
 0x516   :  { %v1433_v13 = vunpack.c.l.bf16 %v1430_v12 }
 0x518   :  { %2203 = vmatpush1.bf16.msra.mxu1 %v4869_v14  ;;  %2244 = vmatpush1.bf16.msra.mxu0 %v4872_v15  ;;  %v1441_v14 = vrot.slane %v1433_v13, %v5145_v52  ;;  %v4951_v13 = vld [vmem:[#allocation5 + $0x28] sm:$0xff]  }
 0x519   :  { %2204 = vmatprep.subr.bf16.mxu1 %v4877_v16  ;;  %2245 = vmatprep.subr.bf16.mxu0 %v4880_v17 }
 0x51c   :  { %2205 = vmatpush1.bf16.msra.mxu1 %v4875_v18  ;;  %2246 = vmatpush1.bf16.msra.mxu0 %v4878_v19 }
 0x51d   :  { %2206 = vmatprep.subr.bf16.mxu1 %v4883_v20  ;;  %2247 = vmatprep.subr.bf16.mxu0 %v4886_v21 }
 0x520   :  { %2207 = vmatpush1.bf16.msra.mxu1 %v4881_v22  ;;  %2248 = vmatpush1.bf16.msra.mxu0 %v4884_v24 }
 0x521   :  { %2208 = vmatprep.subr.bf16.mxu1 %v4889_v25  ;;  %2249 = vmatprep.subr.bf16.mxu0 %v4892_v26 }
 0x524   :  { %2209 = vmatpush1.bf16.msra.mxu1 %v4887_v27  ;;  %2250 = vmatpush1.bf16.msra.mxu0 %v4890_v28 }
 0x525   :  { %2210 = vmatprep.subr.bf16.mxu1 %v4895_v29  ;;  %2265 = vmatprep.subr.bf16.mxu0 %v4898_v30  ;;  %v1434_v29 = vunpack.c.h.bf16 %v1430_v12  ;;  %v1431_v30 = vld [vmem:[#allocation3 + $0xb20] sm:$0x11]  ;;  %v4950_v12 = vld [vmem:[#allocation5 + $0x30] sm:$0xff]  }
 0x528   :  { %2211 = vmatpush2.bf16.msra.mxu1 %v4893_v31  ;;  %2266 = vmatpush2.bf16.msra.mxu0 %v4896_v32  ;;  %v1445_v31 = vrot.slane %v1434_v29, %v5145_v52  ;;  %v1435_v32 = vunpack.c.l.bf16 %v1431_v30 }
 0x529   :  { %2212 = vmatprep.subr.bf16.mxu1 %v4901_v33  ;;  %4288 = vmatprep.subr.bf16.mxu0 %v4902_v34 }
 0x52a   :  { %v1449_v34 = vrot.slane %v1435_v32, %v5145_v52 }
 0x52b   :  { %2268 = vmatmul.mubr.bf16.vlgmr.msra.gmra.mxu0 %v5192_v62 }
 0x52c   :  { %2213 = vmatpush2.bf16.msra.mxu1 %v4899_v35  ;;  %4289 = vmatpush3.bf16.msra.mxu0 %v4903_v36 }
 0x52d   :  { %2308 = vmatprep.mubr.bf16.mxu0 %v5186_v57  ;;  %2214 = vmatprep.subr.bf16.mxu1 %v4906_v37  ;;  %v4924_v57 = vld [vmem:[#allocation3 + $0x8a0] ss:$20 sps:$4 sm:$0xff]  }
 0x52e   :  { %4290 = vmatprep.subr.bf16.mxu0 %v4907_v38 }
 0x530   :  { %2215 = vmatpush2.bf16.msra.mxu1 %v4904_v39  ;;  %4291 = vmatpush3.bf16.msra.mxu0 %v4908_v40 }
 0x531   :  { %2216 = vmatprep.subr.bf16.mxu1 %v4911_v41  ;;  %4292 = vmatprep.subr.bf16.mxu0 %v4912_v42 }
 0x534   :  { %2217 = vmatpush2.bf16.msra.mxu1 %v4909_v43  ;;  %4293 = vmatpush3.bf16.msra.mxu0 %v4913_v44 }
 0x535   :  { %2218 = vmatprep.subr.bf16.mxu1 %v4916_v45  ;;  %4294 = vmatprep.subr.bf16.mxu0 %v4917_v46 }
 0x538   :  { %2219 = vmatpush2.bf16.msra.mxu1 %v4914_v47  ;;  %4295 = vmatpush3.bf16.msra.mxu0 %v4918_v49 }
 0x539   :  { %2220 = vmatprep.subr.bf16.mxu1 %v4921_v50  ;;  %4296 = vmatprep.subr.bf16.mxu0 %v4922_v51  ;;  %v1436_v50 = vunpack.c.h.bf16 %v1431_v30  ;;  %v1432_v51 = vld [vmem:[#allocation3 + $0xb28] sm:$0x1] }
 0x53c   :  { %2221 = vmatpush2.bf16.msra.mxu1 %v4919_v53  ;;  %4297 = vmatpush3.bf16.msra.mxu0 %v4923_v54  ;;  %v1453_v53 = vrot.slane %v1436_v50, %v5145_v52  ;;  %v1437_v54 = vunpack.c.l.bf16 %v1432_v51 }
 0x53d   :  { %2222 = vmatprep.subr.bf16.mxu1 %v4926_v55  ;;  %4298 = vmatprep.subr.bf16.mxu0 %v4927_v56 }
 0x540   :  { %2223 = vmatpush2.bf16.msra.mxu1 %v4924_v57  ;;  %4299 = vmatpush3.bf16.msra.mxu0 %v4928_v59  ;;  %v1457_v57 = vrot.slane %v1437_v54, %v5145_v52 }
 0x541   :  { %2224 = vmatprep.subr.bf16.mxu1 %v4931_v60  ;;  %4300 = vmatprep.subr.bf16.mxu0 %v4932_v63 }
 0x544   :  { %2225 = vmatpush2.bf16.msra.mxu1 %v4929_v1  ;;  %4301 = vmatpush3.bf16.msra.mxu0 %v4933_v2 }
 0x545   :  { %4302 = vmatprep.subr.bf16.mxu0 %v4934_v3  ;;  %2316 = vmatprep.subr.bf16.mxu1 %v5081_v23 }
 0x547   :  { %2227 = vmatmul.mubr.bf16.vlgmr.msra.gmra.mxu1 %v5190_v61 }
 0x548   :  { %4303 = vmatpush3.bf16.msra.mxu0 %v4935_v4  ;;  %2317 = vmatpush1.bf16.msra.mxu1 %v4936_v5 }
 0x549   :  { %4213 = vmatprep.mubr.msk.bf16.mxu1 %vm2108_vm6, %v5188_v58  ;;  %2318 = vmatprep.subr.bf16.mxu1 %v5081_v23  ;;  %v4941_v58 = vld [vmem:[#allocation3 + $0xa10] ss:$20 sps:$4 sm:$0xff]  }
 0x54a   :  { %2495 = vmatprep.subr.bf16.mxu0 %v5081_v23 }
 0x54b   :  { %2309 = vmatmul.mubr.bf16.vlgmr.msra.gmra.mxu0 %v5190_v61  ;;  %v4943_v61 = vld [vmem:[#allocation3 + $0x9c0] ss:$20 sps:$4 sm:$0xff]  }
 0x54c   :  { %2319 = vmatpush1.bf16.msra.mxu1 %v4937_v6 }
 0x54d   :  { %2320 = vmatprep.subr.bf16.mxu1 %v5081_v23 }
 0x550   :  { %2321 = vmatpush1.bf16.msra.mxu1 %v4938_v7  ;;  %v4945_v7 = vld [vmem:[#allocation5 + $0x58] sm:$0xff]  }
 0x551   :  { %2322 = vmatprep.subr.bf16.mxu1 %v5081_v23  ;;  %2496 = vmatpush1.bf16.msra.mxu0 %v4945_v7 }
 0x552   :  { %2497 = vmatprep.subr.bf16.mxu0 %v5081_v23 }
 0x554   :  { %2323 = vmatpush1.bf16.msra.mxu1 %v4939_v8 }
 0x555   :  { %2324 = vmatprep.subr.bf16.mxu1 %v5081_v23 }
 0x558   :  { %2325 = vmatpush1.bf16.msra.mxu1 %v4940_v9  ;;  %v5243_v9 = vld [vmem:[%s5478_s1] sm:$0xff] }
 0x559   :  { %2326 = vmatprep.subr.bf16.mxu1 %v5081_v23 }
 0x55c   :  { %2327 = vmatpush1.bf16.msra.mxu1 %v4941_v58  ;;  %v4946_v58 = vld [vmem:[#allocation5 + $0x50] sm:$0xff]  }
 0x55d   :  { %2328 = vmatprep.subr.bf16.mxu1 %v5081_v23  ;;  %2498 = vmatpush1.bf16.msra.mxu0 %v4946_v58 }
 0x55e   :  { %2499 = vmatprep.subr.bf16.mxu0 %v5081_v23 }
 0x560   :  { %2329 = vmatpush1.bf16.msra.mxu1 %v4942_v10  ;;  %v4947_v10 = vld [vmem:[#allocation5 + $0x48] sm:$0xff]  }
 0x561   :  { %2330 = vmatprep.subr.bf16.mxu1 %v5081_v23  ;;  %2500 = vmatpush1.bf16.msra.mxu0 %v4947_v10 }
 0x562   :  { %2501 = vmatprep.subr.bf16.mxu0 %v5081_v23 }
 0x564   :  { %2331 = vmatpush1.bf16.msra.mxu1 %v4943_v61  ;;  %v4948_v61 = vld [vmem:[#allocation5 + $0x40] sm:$0xff]  }
 0x565   :  { %2346 = vmatprep.subr.bf16.mxu1 %v5081_v23  ;;  %2502 = vmatpush1.bf16.msra.mxu0 %v4948_v61 }
 0x566   :  { %2503 = vmatprep.subr.bf16.mxu0 %v5081_v23 }
 0x568   :  { %2347 = vmatpush2.bf16.msra.mxu1 %v4944_v11  ;;  %v4949_v11 = vld [vmem:[#allocation5 + $0x38] sm:$0xff]  }
 0x569   :  { %4379 = vmatprep.subr.bf16.mxu1 %v5079_v0  ;;  %2504 = vmatpush1.bf16.msra.mxu0 %v4949_v11  ;;  %v4956_v11 = vld [vmem:[#allocation5 + $0x98] sm:$0xff]  }
 0x56a   :  { %2505 = vmatprep.subr.bf16.mxu0 %v5081_v23 }
 0x56b   :  { %2349 = vmatmul.mubr.bf16.vlgmr.msra.gmra.mxu1 %v5192_v62 }
 0x56c   :  { %4383 = vmatprep.mubr.msk.bf16.mxu1 %vm5080_vm0, %v5079_v0 }
 0x56d   :  { %2506 = vmatpush1.bf16.msra.mxu0 %v4950_v12  ;;  %v4957_v12 = vld [vmem:[#allocation5 + $0x90] sm:$0xff]  }
 0x56e   :  { %2507 = vmatprep.subr.bf16.mxu0 %v5081_v23 }
 0x571   :  { %2508 = vmatpush1.bf16.msra.mxu0 %v4951_v13  ;;  %v2797_v13 = vld [vmem:[#allocation5 + $0xd0] sm:$0x1] }
 0x572   :  { %2509 = vmatprep.subr.bf16.mxu0 %v5081_v23 }
 0x5c7   :  { %v2146_v15 = vpop.f32.mrf.mxu0  ;;  %v2187_v16 = vpop.f32.mrf.mxu1 }
 0x5c8   :  { %v2147_v17 = vadd.f32 %v2146_v15, %v1441_v14  ;;  %v5085_v14 = vmov 65535  }
 0x5c9   :  { %v2148_v18 = vpop.f32.mrf.mxu0  ;;  %v2189_v19 = vpop.f32.mrf.mxu1  ;;  %v2490_v15 = vsel %vm2489_vm7, 4294967295, %v5085_v14  ;;  %v2833_v14 = vunpack.c.l.bf16 %v2797_v13 }
 0x5ca   :  { %v5223_v20 = vadd.f32 %v2187_v16, %v2147_v17  ;;  %v2149_v33 = vadd.f32 %v2148_v18, %v1445_v31  ;;  %v4582_v16 = vld [vmem:[#allocation5 + $0x68] ss:$0 sps:$4 sm:$0x33]   ;;  %v4952_v17 = vld [vmem:[#allocation5 + $0x20] sm:$0xff]   ;;  %v2491_v18 = vsel %vm80_vm1, %v2490_v15, 0  ;;  %vm3229_vm1 = vcmask 465920  }
 0x5cb   :  { %v2150_v21 = vpop.f32.mrf.mxu0  ;;  %v2191_v22 = vpop.f32.mrf.mxu1  ;;  %2510 = vmatpush1.bf16.msra.mxu0 %v4952_v17  ;;  %v2837_v15 = vrot.slane %v2833_v14, %v5145_v52 }
 0x5cc   :  { %v5227_v36 = vadd.f32 %v2189_v19, %v2149_v33  ;;  %v2493_v19 = vand.u32 %v4582_v16, %v2491_v18  ;;  %2523 = vmatprep.subr.bf16.mxu0 %v5081_v23 }
 0x5cd   :  { %v2151_v24 = vpop.f32.mrf.mxu0  ;;  %v2192_v25 = vpop.f32.mrf.mxu1 }
 0x5ce   :  { %v2357_v42 = vmax.f32 %v5227_v36, 0.0  ;;  %v2356_v25 = vmax.f32 %v5223_v20, 0.0  ;;  %v48_v20 = vld [vmem:[%s5478_s1 + $0x8] sm:$0xff]  ;;  %s5087_s1 = smov 25   ;;  %v4954_v36 = vld [vmem:[#allocation5 + $0x80] sm:$0xff]  }
 0x5cf   :  { %2524 = vmatpush2.bf16.msra.mxu0 %v2493_v19  ;;  %4380 = vmatpush3.bf16.msra.mxu1 %v4954_v36 }
 0x5d0   :  { %2525 = vmatprep.subr.bf16.mxu0 %v5081_v23  ;;  %4381 = vmatprep.subr.bf16.mxu1 %v5079_v0 }
 0x5eb   :  { %v2269_v26 = vpop.f32.mrf.mxu0 }
 0x5ed   :  { %v2271_v62 = vpop.f32.mrf.mxu0 }
 0x5ef   :  { %v2273_v27 = vpop.f32.mrf.mxu0 }
 0x5f0   :  { %v4953_v27 = vld [vmem:[#allocation5 + $0x60] sm:$0xff]  }
 0x5f1   :  { %v2274_v28 = vpop.f32.mrf.mxu0  ;;  %2526 = vmatpush2.bf16.msra.mxu0 %v4953_v27 }
 0x5f2   :  { %4427 = vmatprep.subr.bf16.mxu0 %v5079_v0 }
 0x607   :  { %v2228_v35 = vpop.f32.mrf.mxu1 }
 0x608   :  { %v2229_v37 = vadd.f32 %v2228_v35, %v1449_v34 }
 0x609   :  { %v2230_v38 = vpop.f32.mrf.mxu1 }
 0x60a   :  { %v5229_v39 = vadd.f32 %v2269_v26, %v2229_v37  ;;  %v2231_v55 = vadd.f32 %v2230_v38, %v1453_v53 }
 0x60b   :  { %v2232_v40 = vpop.f32.mrf.mxu1  ;;  %v4304_v41 = vpop.f32.mrf.mxu0 }
 0x60c   :  { %v2358_v43 = vmax.f32 %v5229_v39, 0.0  ;;  %v2272_v59 = vadd.f32 %v2271_v62, %v2231_v55 }
 0x60d   :  { %v2233_v44 = vpop.f32.mrf.mxu1  ;;  %v4305_v45 = vpop.f32.mrf.mxu0 }
 0x60e   :  { %v4566_v46 = vpack.i.bf16 %v2357_v42, %v2358_v43  ;;  %v4306_v56 = vadd.f32 %v4305_v45, %v4304_v41  ;;  %v2359_v3 = vmax.f32 %v2272_v59, 0.0 }
 0x60f   :  { %v4307_v47 = vpop.f32.mrf.mxu0 }
 0x610   :  { %4567 = vrot.lane.b32.xlu0 %v4566_v46, %s5083_s30  ;;  %v2311_v60 = vadd.f32 %v4306_v56, %v1457_v57  ;;  %v2422_v56 = vld [vmem:[#allocation5 + $0x70] sm:$0x1] }
 0x611   :  { %v4308_v49 = vpop.f32.mrf.mxu0  ;;  %v2423_v57 = vunpack.c.l.bf16 %v2422_v56 }
 0x613   :  { %v2427_v59 = vrot.slane %v2423_v57, %v5145_v52 }
 0x614   :  { %2397 = vrot.lane.b32.xlu0 %v5243_v9, %s5084_s7 }
 0x62b   :  { %v2350_v63 = vpop.f32.mrf.mxu1 }
 0x62c   :  { %v2351_v1 = vadd.f32 %v2350_v63, %v2311_v60 }
 0x62d   :  { %v2352_v2 = vpop.f32.mrf.mxu1 }
 0x62e   :  { %v2360_v4 = vmax.f32 %v2351_v1, 0.0 }
 0x62f   :  { %v2353_v5 = vpop.f32.mrf.mxu1 }
 0x630   :  { %v4561_v6 = vpack.i.bf16 %v2360_v4, %v2359_v3 }
 0x631   :  { %v2354_v8 = vpop.f32.mrf.mxu1 }
 0x632   :  { %4562 = vrot.lane.b32.xlu1 %v4561_v6, %s5083_s30 }
 0x682   :  { %v4568_v21 = vpop.permute.xlu0 %4567 }
 0x683   :  { %v4570_v22 = vunpack.i.h.bf16 %v4568_v21  ;;  %v4569_v24 = vunpack.i.l.bf16 %v4568_v21  ;;  %v2541_v21 = vld [vmem:[#allocation5 + $0x88] sm:$0x1] }
 0x685   :  { %v2368_v26 = vsel %vm2367_vm8, %v4570_v22, %v4569_v24  ;;  %v2372_v35 = vmax.f32 %v2357_v42, %v4569_v24  ;;  %v4955_v42 = vld [vmem:[#allocation5 + $0x78] sm:$0xff]   ;;  %v2542_v22 = vunpack.c.l.bf16 %v2541_v21 }
 0x686   :  { %v2371_v62 = vmax.f32 %v2356_v25, %v2368_v26  ;;  %v2398_v40 = vpop.permute.xlu0 %2397  ;;  %4382 = vmatpush3.bf16.msra.mxu1 %v4955_v42  ;;  %v2798_v24 = vld [vmem:[#allocation5 + $0xd8] sm:$0x1] }
 0x687   :  { %4387 = vmatprep.subr.bf16.mxu1 %v5079_v0  ;;  %v2546_v25 = vrot.slane %v2542_v22, %v5145_v52  ;;  %v2844_v26 = vunpack.c.l.bf16 %v2798_v24 }
 0x6a4   :  { %v4563_v28 = vpop.permute.xlu1 %4562 }
 0x6a5   :  { %v4565_v29 = vunpack.i.h.bf16 %v4563_v28  ;;  %v4564_v30 = vunpack.i.l.bf16 %v4563_v28 }
 0x6a7   :  { %v2383_v31 = vmax.f32 %v2359_v3, %v4565_v29  ;;  %v2379_v32 = vsel %vm2367_vm8, %v4564_v30, %v4565_v29  ;;  %v2848_v29 = vrot.slane %v2844_v26, %v5145_v52 }
 0x6a8   :  { %v2382_v23 = vmax.f32 %v2358_v43, %v2379_v32 }
 0x6aa   :  { %v4571_v33 = vpack.i.bf16 %v2382_v23, %v2383_v31 }
 0x6ac   :  { %4572 = vrot.lane.b32.xlu1 %v4571_v33, %s5086_s8  ;;  %v4958_v33 = vld [vmem:[#allocation5 + $0xc0] sm:$0xff]  }
 0x6b0   :  { %2788 = vrot.lane.b32.xlu1 %v48_v20, %s5086_s8 }
 0x71e   :  { %v4573_v34 = vpop.permute.xlu1 %4572 }
 0x71f   :  { %v4575_v37 = vunpack.i.h.bf16 %v4573_v34  ;;  %v4574_v38 = vunpack.i.l.bf16 %v4573_v34  ;;  %v4960_v34 = vld [vmem:[#allocation5 + $0xb0] sm:$0xff]  }
 0x721   :  { %v2391_v39 = vsel %vm2390_vm9, %v4575_v37, %v4574_v38  ;;  %v2395_v41 = vmax.f32 %v2372_v35, %v4574_v38  ;;  %v4961_v35 = vld [vmem:[#allocation5 + $0xa8] sm:$0xff]  }
 0x722   :  { %v2394_v43 = vmax.f32 %v2371_v62, %v2391_v39  ;;  %v2789_v44 = vpop.permute.xlu1 %2788 }
 0x723   :  { %v5270_v45 = vadd.f32 %v5243_v9, %v2789_v44  ;;  %v5272_v46 = vadd.f32 %v2789_v44, %v48_v20  ;;  %v2400_v47 = vsel %vm2108_vm6, %v2395_v41, %v2398_v40  ;;  %v4959_v20 = vld [vmem:[#allocation5 + $0xb8] sm:$0xff]  }
 0x724   :  { %v2421_v49 = vpack.c.bf16 %v2400_v47, %v2400_v47  ;;  %v2420_v50 = vpack.c.bf16 %v2394_v43, %v2394_v43 }
 0x725   :  { %2803 = vrot.lane.b32.xlu1 %v5272_v46, %s5087_s1  ;;  %2801 = vrot.lane.b32.xlu0 %v5270_v45, %s5087_s1 }
 0x726   :  { %4224 = vmatprep.mubr.msk.bf16.mxu0 %vm2485_vm10, %v2421_v49 }
 0x727   :  { %2528 = vmatmul.mubr.bf16.vlgmr.msra.gmra.mxu0 %v2420_v50 }
 0x728   :  { %4429 = vmatprep.mubr.msk.bf16.mxu0 %vm5080_vm0, %v5079_v0 }
 0x797   :  { %v2804_v51 = vpop.permute.xlu1 %2803  ;;  %v2802_v53 = vpop.permute.xlu0 %2801 }
 0x798   :  { %v5284_v54 = vsel %vm2805_vm11, %v2802_v53, %v2804_v51 }
 0x799   :  { %v2808_v55 = vsel %vm2559_vm12, %v5284_v54, 0.0 }
 0x79a   :  { %2809 = vadd.xlane.f32.xlu0 %v2808_v55  ;;  %v2609_v55 = vld [vmem:[#allocation5 + $0xa0] sm:$0x1] }
 0x79b   :  { %v2610_v56 = vunpack.c.l.bf16 %v2609_v55 }
 0x79d   :  { %v2614_v57 = vrot.slane %v2610_v56, %v5145_v52 }
 0x7b0   :  { %2839 = vrot.lane.b32.xlu0 %v2837_v15, %s5088_s11 }
 0x7b4   :  { %2672 = vrot.lane.b32.xlu0 %v5243_v9, %s5089_s12 }
 0x7e7   :  { %v2529_v60 = vpop.f32.mrf.mxu0 }
 0x7e8   :  { %v2530_v63 = vadd.f32 %v2529_v60, %v2427_v59 }
 0x7e9   :  { %v2531_v1 = vpop.f32.mrf.mxu0 }
 0x7ea   :  { %v5289_v2 = vmax.f32 %v2530_v63, 0.0 }
 0x7eb   :  { %v2532_v3 = vpop.f32.mrf.mxu0 }
 0x7ec   :  { %v2540_v4 = vpack.c.bf16 %v5289_v2, %v5289_v2 }
 0x7ed   :  { %v2533_v5 = vpop.f32.mrf.mxu0 }
 0x7ee   :  { %4384 = vmatmul.mubr.msk.bf16.vlgmr.msra.gmra.mxu1 %vm2559_vm12, %v2540_v4 }
 0x7ef   :  { %4391 = vmatprep.mubr.msk.bf16.mxu1 %vm5080_vm0, %v5079_v0  ;;  %4388 = vmatpush3.bf16.msra.mxu1 %v4956_v11 }
 0x7f0   :  { %4389 = vmatprep.subr.bf16.mxu1 %v5079_v0 }
 0x7f3   :  { %4390 = vmatpush3.bf16.msra.mxu1 %v4957_v12 }
 0x7f4   :  { %4395 = vmatprep.subr.bf16.mxu1 %v5079_v0 }
 0x823   :  { %v2810_v6 = vpop.xlane.xlu0 %2809 }
 0x824   :  { %v2812_v7 = vmul.f32 0.03125, %v2810_v6 }
 0x826   :  { %v2813_v8 = vsub.f32 %v5270_v45, %v2812_v7  ;;  %v2814_v58 = vsub.f32 %v5272_v46, %v2812_v7 }
 0x827   :  { %v2840_v41 = vpop.permute.xlu0 %2839 }
 0x828   :  { %v2815_v10 = vmul.f32 %v2813_v8, %v2813_v8  ;;  %v2816_v61 = vmul.f32 %v2814_v58, %v2814_v58 }
 0x82a   :  { %2819 = vrot.lane.b32.xlu1 %v2815_v10, %s5087_s1  ;;  %v4963_v10 = vld [vmem:[#allocation5 + $0xe0] sm:$0xff]  }
 0x82b   :  { %v2673_v4 = vpop.permute.xlu0 %2672 }
 0x82e   :  { %2821 = vrot.lane.b32.xlu1 %v2816_v61, %s5087_s1 }
 0x89c   :  { %v2820_v16 = vpop.permute.xlu1 %2819 }
 0x8a0   :  { %v2822_v17 = vpop.permute.xlu1 %2821 }
 0x8a1   :  { %v2823_v18 = vsel %vm2805_vm11, %v2820_v16, %v2822_v17 }
 0x8a2   :  { %v2825_v19 = vsel %vm2559_vm12, %v2823_v18, 0.0 }
 0x8a3   :  { %2826 = vadd.xlane.f32.xlu1 %v2825_v19 }
 0x8ae   :  { %v2597_v62 = vpop.f32.mrf.mxu1 }
 0x8af   :  { %v2598_v27 = vadd.f32 %v2597_v62, %v2546_v25 }
 0x8b0   :  { %v4385_v28 = vpop.f32.mrf.mxu1 }
 0x8b1   :  { %v2603_v30 = vmax.f32 %v2598_v27, 0.0  ;;  %v5349_v27 = vand.u32 127, %v57_v48  ;;  %v2795_v28 = vstv %s5477_s0  ;;  %s5091_s0 = smov 48  }
 0x8b2   :  { %v2600_v31 = vpop.f32.mrf.mxu1 }
 0x8b3   :  { %v2608_v32 = vpack.c.bf16 %v2603_v30, %v2603_v30  ;;  %vm2796_vm14 = vcmp.lt.s32.totalorder %v5349_v27, %v2795_v28 }
 0x8b4   :  { %v4386_v23 = vpop.f32.mrf.mxu1  ;;  %2850 = vrot.lane.b32.xlu1 %v2848_v29, %s5088_s11 }
 0x8b5   :  { %4392 = vmatmul.mubr.msk.bf16.vlgmr.msra.gmra.mxu1 %vm2559_vm12, %v2608_v32 }
 0x8b6   :  { %4403 = vmatprep.mubr.msk.bf16.mxu1 %vm5080_vm0, %v5079_v0  ;;  %4396 = vmatpush3.bf16.msra.mxu1 %v4958_v33 }
 0x8b7   :  { %4397 = vmatprep.subr.bf16.mxu1 %v5079_v0 }
 0x8ba   :  { %4398 = vmatpush3.bf16.msra.mxu1 %v4959_v20 }
 0x8bb   :  { %4399 = vmatprep.subr.bf16.mxu1 %v5079_v0 }
 0x8be   :  { %4400 = vmatpush3.bf16.msra.mxu1 %v4960_v34 }
 0x8bf   :  { %4401 = vmatprep.subr.bf16.mxu1 %v5079_v0 }
 0x8c2   :  { %4402 = vmatpush3.bf16.msra.mxu1 %v4961_v35 }
 0x8c3   :  { %4407 = vmatprep.subr.bf16.mxu1 %v5079_v0 }
 0x92c   :  { %v2827_v37 = vpop.xlane.xlu1 %2826 }
 0x92d   :  { %v2828_v38 = vmul.f32 0.03125, %v2827_v37 }
 0x92f   :  { %v2829_v40 = vadd.f32 1e-06, %v2828_v38 }
 0x930   :  { %v2851_v47 = vpop.permute.xlu1 %2850 }
 0x931   :  { %4992 = vrsqrt.f32 %v2829_v40 }
 0x93e   :  { %v4993_v39 = vpop.eup %4992 }
 0x93f   :  { %v2831_v43 = vmul.f32 %v4993_v39, %v2813_v8  ;;  %v2832_v44 = vmul.f32 %v4993_v39, %v2814_v58  ;;  %v4962_v8 = vld [vmem:[#allocation5 + $0xe8] sm:$0xff]  }
 0x941   :  { %v2842_v49 = vmul.f32 %v2840_v41, %v2831_v43  ;;  %v2843_v50 = vmul.f32 %v2840_v41, %v2832_v44 }
 0x943   :  { %v2853_v36 = vadd.f32 %v2851_v47, %v2842_v49  ;;  %v2854_v42 = vadd.f32 %v2851_v47, %v2843_v50 }
 0x945   :  { %v2859_v51 = vpack.c.bf16 %v2853_v36, %v2853_v36  ;;  %v2860_v53 = vpack.c.bf16 %v2854_v42, %v2854_v42 }
 0x947   :  { %2863 = vrot.lane.b32.xlu0 %v2859_v51, %s5087_s1 }
 0x94b   :  { %2865 = vrot.lane.b32.xlu0 %v2860_v53, %s5087_s1 }
 0x975   :  { %v2664_v59 = vpop.f32.mrf.mxu1 }
 0x976   :  { %v2665_v60 = vadd.f32 %v2664_v59, %v2614_v57 }
 0x977   :  { %v4393_v63 = vpop.f32.mrf.mxu1 }
 0x978   :  { %v5319_v1 = vadd.f32 %v2665_v60, %v5289_v2 }
 0x979   :  { %v2667_v3 = vpop.f32.mrf.mxu1 }
 0x97a   :  { %v2671_v5 = vmax.f32 %v5319_v1, 0.0 }
 0x97b   :  { %v4394_v6 = vpop.f32.mrf.mxu1 }
 0x97c   :  { %v2675_v7 = vsel %vm2559_vm12, %v2671_v5, %v2673_v4 }
 0x97d   :  { %v2684_v58 = vpack.c.bf16 %v2675_v7, %v2675_v7  ;;  %v4964_v7 = vld [vmem:[#allocation5 + $0xf8] sm:$0xff]  }
 0x97f   :  { %4404 = vmatmul.mubr.msk.bf16.vlgmr.msra.gmra.mxu1 %vm2715_vm13, %v2684_v58 }
 0x980   :  { %4408 = vmatpush3.bf16.msra.mxu1 %v4962_v8  ;;  %4411 = vmatprep.mubr.msk.bf16.mxu1 %vm5080_vm0, %v5079_v0  ;;  %v4965_v8 = vld [vmem:[#allocation5 + $0xf0] sm:$0xff]  }
 0x981   :  { %4409 = vmatprep.subr.bf16.mxu1 %v5079_v0 }
 0x984   :  { %4410 = vmatpush3.bf16.msra.mxu1 %v4963_v10  ;;  %v4966_v10 = vld [vmem:[#allocation5 + $0x118] sm:$0xff]  }
 0x985   :  { %4415 = vmatprep.subr.bf16.mxu1 %v5079_v0 }
 0x9b9   :  { %v2864_v2 = vpop.permute.xlu0 %2863 }
 0x9bd   :  { %v2866_v61 = vpop.permute.xlu0 %2865 }
 0x9be   :  { %v2868_v11 = vsel %vm2805_vm11, %v2864_v2, %v2866_v61  ;;  %v4967_v61 = vld [vmem:[#allocation5 + $0x110] sm:$0xff]  }
 0x9bf   :  { %4412 = vmatmul.mubr.msk.bf16.vlgmr.msra.gmra.mxu1 %vm2559_vm12, %v2868_v11 }
 0x9c0   :  { %4417 = vmatprep.mubr.msk.bf16.mxu1 %vm5080_vm0, %v5079_v0 }
 0xa3f   :  { %v5334_v12 = vpop.f32.mrf.mxu1 }
 0xa41   :  { %v4405_v13 = vpop.f32.mrf.mxu1 }
 0xa43   :  { %v2756_v14 = vpop.f32.mrf.mxu1 }
 0xa44   :  { %v4968_v14 = vld [vmem:[#allocation5 + $0x108] sm:$0xff]  }
 0xa45   :  { %v4406_v15 = vpop.f32.mrf.mxu1 }
 0xa7f   :  { %v2918_v16 = vpop.f32.mrf.mxu1 }
 0xa80   :  { %v2924_v17 = vpack.c.bf16 %v2918_v16, %v2918_v16 }
 0xa81   :  { %v4413_v18 = vpop.f32.mrf.mxu1 }
 0xa82   :  { %3038 = vrot.lane.b32.xlu0 %v2924_v17, %s5090_s13  ;;  %2926 = vrot.lane.b32.xlu1 %v2924_v17, %s5086_s8 }
 0xa83   :  { %v2921_v19 = vpop.f32.mrf.mxu1 }
 0xa85   :  { %v4414_v21 = vpop.f32.mrf.mxu1 }
 0xa86   :  { %3036 = vrot.lane.b32.xlu1 %v2924_v17, %s5083_s30 }
 0xaf4   :  { %v3039_v22 = vpop.permute.xlu0 %3038  ;;  %v2927_v24 = vpop.permute.xlu1 %2926 }
 0xaf5   :  { %v3044_v25 = vsel %vm2108_vm6, %v3039_v22, 0  ;;  %v2932_v26 = vsel %vm2108_vm6, %v2927_v24, 0  ;;  %v4969_v24 = vld [vmem:[#allocation5 + $0x100] sm:$0xff]  }
 0xaf6   :  { %4416 = vmatpush3.bf16.xpose.msra.mxu1 %v2932_v26  ;;  %4428 = vmatpush3.bf16.xpose.msra.mxu0 %v3044_v25 }
 0xaf7   :  { %4421 = vmatprep.subr.bf16.mxu1 %v5079_v0  ;;  %4439 = vmatprep.subr.bf16.mxu0 %v5079_v0 }
 0xaf8   :  { %v3037_v62 = vpop.permute.xlu1 %3036 }
 0xafd   :  { %4418 = vmatmul.mubr.msk.bf16.vlgmr.msra.gmra.mxu1 %vm2108_vm6, %v2924_v17  ;;  %4430 = vmatmul.mubr.msk.bf16.vlgmr.msra.gmra.mxu0 %vm2108_vm6, %v3037_v62 }
 0xafe   :  { %4423 = vmatprep.mubr.msk.bf16.mxu1 %vm5080_vm0, %v5079_v0  ;;  %4443 = vmatprep.mubr.msk.bf16.mxu0 %vm5080_vm0, %v5079_v0 }
 0xaff   :  { %4440 = vmatpush3.bf16.msra.mxu0 %v4964_v7 }
 0xb00   :  { %4441 = vmatprep.subr.bf16.mxu0 %v5079_v0 }
 0xb03   :  { %4442 = vmatpush3.bf16.msra.mxu0 %v4965_v8 }
 0xb04   :  { %4459 = vmatprep.subr.bf16.mxu0 %v5079_v0 }
 0xbbd   :  { %v2968_v29 = vpop.f32.mrf.mxu1  ;;  %v3080_v30 = vpop.f32.mrf.mxu0 }
 0xbbe   :  { %v2974_v31 = vsel %vm2796_vm14, %v2968_v29, -1e+30  ;;  %v3086_v32 = vsel %vm2796_vm14, %v3080_v30, -1e+30 }
 0xbbf   :  { %v4419_v23 = vpop.f32.mrf.mxu1  ;;  %v4431_v33 = vpop.f32.mrf.mxu0  ;;  %v3087_v20 = vsel %vm2975_vm15, %v3086_v32, -inf  ;;  %v2976_v34 = vsel %vm2975_vm15, %v2974_v31, -inf }
 0xbc0   :  { %3088 = vmax.xlane.f32.xlu1 %v3087_v20  ;;  %2977 = vmax.xlane.f32.xlu0 %v2976_v34  ;;  %v4970_v23 = vld [vmem:[#allocation5 + $0x130] sm:$0xff]   ;;  %v4971_v33 = vld [vmem:[#allocation5 + $0x128] sm:$0xff]   ;;  %v3220_v20 = vld [vmem:[#allocation5 + $0x120] sm:$0x1] }
 0xbc1   :  { %v2971_v48 = vpop.f32.mrf.mxu1  ;;  %v3083_v35 = vpop.f32.mrf.mxu0  ;;  %v3234_v34 = vunpack.c.l.bf16 %v3220_v20 }
 0xbc3   :  { %v4420_v37 = vpop.f32.mrf.mxu1  ;;  %v4432_v38 = vpop.f32.mrf.mxu0  ;;  %v3238_v48 = vrot.slane %v3234_v34, %v5145_v52 }
 0xbd1   :  { %2988 = vrot.lane.b32.xlu1 %v2924_v17, %s5077_s25 }
 0xc49   :  { %v3089_v40 = vpop.xlane.xlu1 %3088  ;;  %v2978_v39 = vpop.xlane.xlu0 %2977 }
 0xc4a   :  { %v3090_v41 = vsub.f32 %v3086_v32, %v3089_v40  ;;  %v2979_v43 = vsub.f32 %v2974_v31, %v2978_v39 }
 0xc4c   :  { %v2980_v44 = vmul.f32 1.442695, %v2979_v43  ;;  %v3091_v47 = vmul.f32 1.442695, %v3090_v41 }
 0xc4d   :  { %v2989_v49 = vpop.permute.xlu1 %2988 }
 0xc4e   :  { %v2994_v50 = vsel %vm549_vm3, %v2989_v49, 0  ;;  %4994 = vpow2.f32 %v2980_v44 }
 0xc4f   :  { %4422 = vmatpush3.bf16.msra.mxu1 %v2994_v50  ;;  %4996 = vpow2.f32 %v3091_v47 }
 0xc50   :  { %4433 = vmatprep.subr.bf16.mxu1 %v5079_v0 }
 0xc5b   :  { %v4995_v36 = vpop.eup %4994 }
 0xc5c   :  { %v2982_v42 = vsel %vm2975_vm15, %v4995_v36, 0.0  ;;  %v4997_v51 = vpop.eup %4996 }
 0xc5d   :  { %2983 = vadd.xlane.f32.xlu0 %v2982_v42  ;;  %v3093_v53 = vsel %vm2975_vm15, %v4997_v51, 0.0 }
 0xc61   :  { %3094 = vadd.xlane.f32.xlu0 %v3093_v53 }
 0xc77   :  { %3099 = vrot.lane.b32.xlu0 %v2924_v17, %s5091_s0 }
 0xc7b   :  { %3227 = vrot.lane.b32.xlu0 %v5272_v46, %s5092_s16 }
 0xce6   :  { %v2984_v55 = vpop.xlane.xlu0 %2983 }
 0xce7   :  { %4998 = vrcp.f32 %v2984_v55 }
 0xcea   :  { %v3095_v56 = vpop.xlane.xlu0 %3094 }
 0xceb   :  { %5000 = vrcp.f32 %v3095_v56 }
 0xcee   :  { %v3100_v60 = vpop.permute.xlu0 %3099 }
 0xcef   :  { %v3105_v4 = vsel %vm549_vm3, %v3100_v60, 0  ;;  %vm3939_vm3 = vcmask 850944  }
 0xcf2   :  { %v3228_v26 = vpop.permute.xlu0 %3227 }
 0xcf4   :  { %v4999_v57 = vpop.eup %4998 }
 0xcf5   :  { %v2986_v59 = vmul.f32 %v4999_v57, %v4995_v36 }
 0xcf7   :  { %v2987_v63 = vpack.c.bf16 %v2986_v59, %v2986_v59 }
 0xcf8   :  { %v5001_v3 = vpop.eup %5000 }
 0xcf9   :  { %4424 = vmatmul.mubr.msk.bf16.vlgmr.msra.gmra.mxu1 %vm2975_vm15, %v2987_v63  ;;  %v3097_v6 = vmul.f32 %v5001_v3, %v4997_v51 }
 0xcfa   :  { %4434 = vmatpush3.bf16.msra.mxu1 %v3105_v4  ;;  %4435 = vmatprep.mubr.msk.bf16.mxu1 %vm5080_vm0, %v5079_v0 }
 0xcfb   :  { %4447 = vmatprep.subr.bf16.mxu1 %v5079_v0  ;;  %v3098_v46 = vpack.c.bf16 %v3097_v6, %v3097_v6 }
 0xd01   :  { %4436 = vmatmul.mubr.msk.bf16.vlgmr.msra.gmra.mxu1 %vm2975_vm15, %v3098_v46 }
 0xd02   :  { %4455 = vmatprep.mubr.msk.bf16.mxu1 %vm5080_vm0, %v5079_v0  ;;  %4448 = vmatpush3.bf16.msra.mxu1 %v4966_v10  ;;  %v3383_v10 = vld [vmem:[#allocation5 + $0x138] sm:$0x1] }
 0xd03   :  { %4449 = vmatprep.subr.bf16.mxu1 %v5079_v0 }
 0xd06   :  { %4450 = vmatpush3.bf16.msra.mxu1 %v4967_v61 }
 0xd07   :  { %4451 = vmatprep.subr.bf16.mxu1 %v5079_v0 }
 0xd0a   :  { %4452 = vmatpush3.bf16.msra.mxu1 %v4968_v14  ;;  %v3384_v14 = vld [vmem:[#allocation5 + $0x140] sm:$0x1] }
 0xd0b   :  { %4453 = vmatprep.subr.bf16.mxu1 %v5079_v0 }
 0xd0e   :  { %4454 = vmatpush3.bf16.msra.mxu1 %v4969_v24 }
 0xd0f   :  { %4475 = vmatprep.subr.bf16.mxu1 %v5079_v0 }
 0xdb9   :  { %v3030_v58 = vpop.f32.mrf.mxu1 }
 0xdbb   :  { %v4425_v2 = vpop.f32.mrf.mxu1 }
 0xdbc   :  { %v3406_v2 = vunpack.c.l.bf16 %v3383_v10  ;;  %v4981_v10 = vld [vmem:[#allocation5 + $0x188] sm:$0xff]  }
 0xdbd   :  { %v3033_v11 = vpop.f32.mrf.mxu1 }
 0xdbe   :  { %v3410_v61 = vrot.slane %v3406_v2, %v5145_v52  ;;  %v3505_v2 = vld [vmem:[#allocation5 + $0x180] sm:$0x1] }
 0xdbf   :  { %v4426_v13 = vpop.f32.mrf.mxu1 }
 0xdc1   :  { %v3141_v15 = vpop.f32.mrf.mxu1 }
 0xdc2   :  { %3148 = vrot.lane.b32.xlu1 %v3141_v15, %s5093_s17  ;;  %v3416_v15 = vunpack.c.l.bf16 %v3384_v14 }
 0xdc3   :  { %v4437_v16 = vpop.f32.mrf.mxu1 }
 0xdc4   :  { %v3420_v16 = vrot.slane %v3416_v15, %v5145_v52 }
 0xdc5   :  { %v3144_v17 = vpop.f32.mrf.mxu1 }
 0xdc6   :  { %3225 = vrot.lane.b32.xlu1 %v5270_v45, %s5092_s16  ;;  %v4972_v17 = vld [vmem:[#allocation5 + $0x150] sm:$0xff]  }
 0xdc7   :  { %v4438_v18 = vpop.f32.mrf.mxu1 }
 0xdc8   :  { %v4973_v18 = vld [vmem:[#allocation5 + $0x148] sm:$0xff]  }
 0xe34   :  { %v3149_v19 = vpop.permute.xlu1 %3148 }
 0xe35   :  { %v3151_v21 = vsel %vm2108_vm6, %v3030_v58, %v3149_v19 }
 0xe36   :  { %v3156_v22 = vpack.c.bf16 %v3151_v21, %v3151_v21 }
 0xe38   :  { %4444 = vmatmul.mubr.msk.bf16.vlgmr.msra.gmra.mxu0 %vm2559_vm12, %v3156_v22  ;;  %v3226_v25 = vpop.permute.xlu1 %3225  ;;  %v2685_v22 = vld [vmem:[#allocation5 + $0xc8] sm:$0x1] }
 0xe39   :  { %4463 = vmatprep.mubr.msk.bf16.mxu0 %vm5080_vm0, %v5079_v0  ;;  %v3230_v62 = vsel %vm3229_vm1, %v3226_v25, %v3228_v26  ;;  %4460 = vmatpush3.bf16.msra.mxu0 %v4970_v23  ;;  %v2686_v25 = vunpack.c.l.bf16 %v2685_v22 }
 0xe3a   :  { %4461 = vmatprep.subr.bf16.mxu0 %v5079_v0 }
 0xe3b   :  { %v2690_v26 = vrot.slane %v2686_v25, %v5145_v52 }
 0xe3d   :  { %4462 = vmatpush3.bf16.msra.mxu0 %v4971_v33 }
 0xe3e   :  { %4467 = vmatprep.subr.bf16.mxu0 %v5079_v0 }
 0xef8   :  { %v3206_v28 = vpop.f32.mrf.mxu0 }
 0xef9   :  { %v3232_v45 = vsel %vm2559_vm12, %v3206_v28, %v3230_v62 }
 0xefa   :  { %v3233_v29 = vpack.c.bf16 %v3232_v45, %v3232_v45  ;;  %v4445_v30 = vpop.f32.mrf.mxu0 }
 0xefc   :  { %v3209_v31 = vpop.f32.mrf.mxu0  ;;  %4456 = vmatmul.mubr.msk.bf16.vlgmr.msra.gmra.mxu1 %vm2715_vm13, %v3233_v29 }
 0xefd   :  { %4483 = vmatprep.mubr.msk.bf16.mxu1 %vm5080_vm0, %v5079_v0 }
 0xefe   :  { %v4446_v32 = vpop.f32.mrf.mxu0 }
 0xfbc   :  { %v3300_v35 = vpop.f32.mrf.mxu1 }
 0xfbd   :  { %v3301_v37 = vadd.f32 %v3300_v35, %v3238_v48 }
 0xfbe   :  { %v4457_v38 = vpop.f32.mrf.mxu1 }
 0xfbf   :  { %v4252_v40 = vmul.f32 -1.442695, %v3301_v37  ;;  %v4974_v38 = vld [vmem:[#allocation5 + $0x178] sm:$0xff]  }
 0xfc0   :  { %v3303_v39 = vpop.f32.mrf.mxu1  ;;  %4476 = vmatpush3.bf16.msra.mxu1 %v4974_v38  ;;  %v4985_v38 = vld [vmem:[#allocation5 + $0x1e0] sm:$0xff]  }
 0xfc1   :  { %5002 = vpow2.f32 %v4252_v40  ;;  %v4975_v40 = vld [vmem:[#allocation5 + $0x170] sm:$0xff]   ;;  %4477 = vmatprep.subr.bf16.mxu1 %v5079_v0  ;;  %v4976_v39 = vld [vmem:[#allocation5 + $0x168] sm:$0xff]  }
 0xfc2   :  { %v4458_v41 = vpop.f32.mrf.mxu1 }
 0xfc3   :  { %v4977_v41 = vld [vmem:[#allocation5 + $0x160] sm:$0xff]  }
 0xfc4   :  { %4478 = vmatpush3.bf16.msra.mxu1 %v4975_v40  ;;  %v4986_v40 = vld [vmem:[#allocation5 + $0x1d8] sm:$0xff]  }
 0xfc5   :  { %4479 = vmatprep.subr.bf16.mxu1 %v5079_v0 }
 0xfc8   :  { %4480 = vmatpush3.bf16.msra.mxu1 %v4976_v39  ;;  %v4987_v39 = vld [vmem:[#allocation5 + $0x1d0] sm:$0xff]  }
 0xfc9   :  { %4481 = vmatprep.subr.bf16.mxu1 %v5079_v0 }
 0xfcc   :  { %4482 = vmatpush3.bf16.msra.mxu1 %v4977_v41  ;;  %v4988_v41 = vld [vmem:[#allocation5 + $0x1c8] sm:$0xff]  }
 0xfcd   :  { %4499 = vmatprep.subr.bf16.mxu1 %v5079_v0 }
 0xfce   :  { %v5003_v43 = vpop.eup %5002 }
 0xfcf   :  { %v3309_v44 = vadd.f32 1.0, %v5003_v43 }
 0xfd1   :  { %5004 = vrcp.f32 %v3309_v44 }
 0xfde   :  { %v5005_v47 = vpop.eup %5004 }
 0xfdf   :  { %v3312_v49 = vmul.f32 %v5005_v47, %v5284_v54  ;;  %v3375_v59 = vsub.f32 1.0, %v5005_v47 }
 0xfe1   :  { %v3313_v50 = vpack.c.bf16 %v3312_v49, %v3312_v49  ;;  %v3376_v60 = vmul.f32 %v3375_v59, %v3230_v62  ;;  %v2754_v62 = vadd.f32 %v5334_v12, %v2690_v26 }
 0xfe3   :  { %4464 = vmatmul.mubr.msk.bf16.vlgmr.msra.gmra.mxu0 %vm2559_vm12, %v3313_v50  ;;  %v4236_v33 = vmul.f32 -1.442695, %v2754_v62 }
 0xfe4   :  { %4471 = vmatprep.mubr.msk.bf16.mxu0 %vm5080_vm0, %v5079_v0  ;;  %4468 = vmatpush3.bf16.msra.mxu0 %v4972_v17 }
 0xfe5   :  { %4469 = vmatprep.subr.bf16.mxu0 %v5079_v0 }
 0xfe8   :  { %4470 = vmatpush3.bf16.msra.mxu0 %v4973_v18  ;;  %v4982_v18 = vld [vmem:[#allocation5 + $0x1b8] sm:$0xff]  }
 0xfe9   :  { %4487 = vmatprep.subr.bf16.mxu0 %v5079_v0 }
0x10a3   :  { %v3363_v36 = vpop.f32.mrf.mxu0 }
0x10a4   :  { %3370 = vrot.lane.b32.xlu1 %v3363_v36, %s5077_s25  ;;  %v3431_v36 = vld [vmem:[#allocation5 + $0x158] sm:$0x1] }
0x10a5   :  { %v4465_v42 = vpop.f32.mrf.mxu0 }
0x10a6   :  { %v3432_v42 = vunpack.c.l.bf16 %v3431_v36 }
0x10a7   :  { %v3366_v51 = vpop.f32.mrf.mxu0 }
0x10a8   :  { %v3436_v51 = vrot.slane %v3432_v42, %v5145_v52 }
0x10a9   :  { %v4466_v53 = vpop.f32.mrf.mxu0 }
0x1116   :  { %v3371_v55 = vpop.permute.xlu1 %3370 }
0x1117   :  { %v3373_v56 = vadd.f32 %v3371_v55, %v3301_v37 }
0x1119   :  { %5006 = vtanh.f32 %v3373_v56 }
0x1126   :  { %v5007_v57 = vpop.eup %5006 }
0x1127   :  { %3378 = vrot.lane.b32.xlu0 %v5007_v57, %s5086_s8 }
0x1199   :  { %v3379_v54 = vpop.permute.xlu0 %3378 }
0x119a   :  { %v3381_v63 = vmul.f32 %v5005_v47, %v3379_v54 }
0x119c   :  { %v5397_v3 = vadd.f32 %v3381_v63, %v3376_v60  ;;  %v4978_v63 = vld [vmem:[#allocation5 + $0x1a0] sm:$0xff]  }
0x119e   :  { %3386 = vrot.lane.b32.xlu1 %v5397_v3, %s5086_s8 }
0x1210   :  { %v5401_v4 = vpop.permute.xlu1 %3386 }
0x1211   :  { %v3389_v6 = vsel %vm2559_vm12, %v5401_v4, 0.0 }
0x1212   :  { %3390 = vadd.xlane.f32.xlu0 %v3389_v6  ;;  %v4979_v6 = vld [vmem:[#allocation5 + $0x198] sm:$0xff]  }
0x1228   :  { %3412 = vrot.lane.b32.xlu0 %v3410_v61, %s5094_s18  ;;  %v3506_v61 = vunpack.c.l.bf16 %v3505_v2 }
0x129b   :  { %v3391_v46 = vpop.xlane.xlu0 %3390 }
0x129c   :  { %v3392_v7 = vmul.f32 0.03125, %v3391_v46 }
0x129e   :  { %v3393_v8 = vsub.f32 %v5397_v3, %v3392_v7 }
0x129f   :  { %v3413_v28 = vpop.permute.xlu0 %3412 }
0x12a0   :  { %v3394_v58 = vmul.f32 %v3393_v8, %v3393_v8 }
0x12a2   :  { %3396 = vrot.lane.b32.xlu1 %v3394_v58, %s5086_s8 }
0x1314   :  { %v3397_v11 = vpop.permute.xlu1 %3396 }
0x1315   :  { %v3399_v13 = vsel %vm2559_vm12, %v3397_v11, 0.0  ;;  %v3510_v11 = vrot.slane %v3506_v61, %v5145_v52 }
0x1316   :  { %3400 = vadd.xlane.f32.xlu1 %v3399_v13 }
0x1327   :  { %3422 = vrot.lane.b32.xlu1 %v3420_v16, %s5094_s18 }
0x132b   :  { %2766 = vrot.lane.b32.xlu1 %v5243_v9, %s5095_s19 }
0x139f   :  { %v3401_v19 = vpop.xlane.xlu1 %3400 }
0x13a0   :  { %v3402_v21 = vmul.f32 0.03125, %v3401_v19  ;;  %v4983_v19 = vld [vmem:[#allocation5 + $0x1b0] sm:$0xff]  }
0x13a2   :  { %v3403_v24 = vadd.f32 1e-06, %v3402_v21  ;;  %v3586_v21 = vld [vmem:[#allocation5 + $0x1a8] sm:$0x1] }
0x13a3   :  { %v3423_v30 = vpop.permute.xlu1 %3422  ;;  %v3593_v22 = vunpack.c.l.bf16 %v3586_v21 }
0x13a4   :  { %5008 = vrsqrt.f32 %v3403_v24 }
0x13a5   :  { %5010 = vtanh.f32 %v2754_v62  ;;  %v3597_v24 = vrot.slane %v3593_v22, %v5145_v52 }
0x13a6   :  { %5012 = vpow2.f32 %v4236_v33 }
0x13a7   :  { %v2767_v43 = vpop.permute.xlu1 %2766 }
0x13b1   :  { %v5009_v9 = vpop.eup %5008 }
0x13b2   :  { %v3405_v45 = vmul.f32 %v5009_v9, %v3393_v8  ;;  %v5011_v23 = vpop.eup %5010  ;;  %v4980_v8 = vld [vmem:[#allocation5 + $0x190] sm:$0xff]  }
0x13b3   :  { %v5013_v20 = vpop.eup %5012 }
0x13b4   :  { %v3415_v29 = vmul.f32 %v3413_v28, %v3405_v45  ;;  %v2762_v34 = vadd.f32 1.0, %v5013_v20 }
0x13b6   :  { %v3425_v31 = vadd.f32 %v3423_v30, %v3415_v29  ;;  %5014 = vrcp.f32 %v2762_v34 }
0x13b8   :  { %v3430_v32 = vpack.c.bf16 %v3425_v31, %v3425_v31 }
0x13ba   :  { %3438 = vrot.lane.b32.xlu0 %v3430_v32, %s5086_s8 }
0x13be   :  { %2771 = vrot.lane.b32.xlu0 %v5011_v23, %s5077_s25 }
0x13c3   :  { %v5015_v12 = vpop.eup %5014 }
0x13c4   :  { %v2769_v44 = vmul.f32 %v5015_v12, %v2767_v43  ;;  %v4989_v43 = vld [vmem:[#allocation5 + $0x1c0] sm:$0xff]  }
0x142c   :  { %v3439_v48 = vpop.permute.xlu0 %3438 }
0x142d   :  { %4472 = vmatmul.mubr.msk.bf16.vlgmr.msra.gmra.mxu0 %vm2559_vm12, %v3439_v48 }
0x142e   :  { %4495 = vmatprep.mubr.msk.bf16.mxu0 %vm5080_vm0, %v5079_v0  ;;  %4488 = vmatpush3.bf16.msra.mxu0 %v4978_v63 }
0x142f   :  { %4489 = vmatprep.subr.bf16.mxu0 %v5079_v0 }
0x1430   :  { %v2772_v35 = vpop.permute.xlu0 %2771 }
0x1431   :  { %v2774_v37 = vmul.f32 %v5015_v12, %v2772_v35 }
0x1432   :  { %4490 = vmatpush3.bf16.msra.mxu0 %v4979_v6 }
0x1433   :  { %2776 = vrot.lane.b32.xlu1 %v2774_v37, %s5094_s18  ;;  %4491 = vmatprep.subr.bf16.mxu0 %v5079_v0  ;;  %v4984_v37 = vld [vmem:[#allocation5 + $0x1e8] sm:$0xff]  }
0x1436   :  { %4492 = vmatpush3.bf16.msra.mxu0 %v4980_v8 }
0x1437   :  { %4493 = vmatprep.subr.bf16.mxu0 %v5079_v0 }
0x143a   :  { %4494 = vmatpush3.bf16.msra.mxu0 %v4981_v10 }
0x143b   :  { %4507 = vmatprep.subr.bf16.mxu0 %v5079_v0 }
0x14a5   :  { %v2777_v47 = vpop.permute.xlu1 %2776 }
0x14a6   :  { %v2779_v49 = vadd.f32 %v2777_v47, %v2769_v44 }
0x14a8   :  { %5016 = vtanh.f32 %v2779_v49 }
0x14b5   :  { %v5017_v50 = vpop.eup %5016 }
0x14b6   :  { %2782 = vrot.lane.b32.xlu1 %v5017_v50, %s5077_s25 }
0x14ed   :  { %v3489_v53 = vpop.f32.mrf.mxu0 }
0x14ee   :  { %v3490_v55 = vadd.f32 %v3489_v53, %v3436_v51 }
0x14ef   :  { %v4473_v56 = vpop.f32.mrf.mxu0 }
0x14f0   :  { %v3495_v57 = vmax.f32 %v3490_v55, 0.0 }
0x14f1   :  { %v3492_v59 = vpop.f32.mrf.mxu0 }
0x14f2   :  { %v3504_v54 = vpack.c.bf16 %v3495_v57, %v3495_v57 }
0x14f3   :  { %v4474_v60 = vpop.f32.mrf.mxu0 }
0x14f4   :  { %4484 = vmatmul.mubr.msk.bf16.vlgmr.msra.gmra.mxu1 %vm2715_vm13, %v3504_v54  ;;  %v4990_v54 = vld [vmem:[#allocation5 + $0x200] sm:$0xff]   ;;  %v3769_v60 = vld [vmem:[#allocation5 + $0x1f0] sm:$0x1] }
0x14f5   :  { %4503 = vmatprep.mubr.msk.bf16.mxu1 %vm5080_vm0, %v5079_v0  ;;  %4500 = vmatpush3.bf16.msra.mxu1 %v4982_v18  ;;  %v3770_v63 = vunpack.c.l.bf16 %v3769_v60 }
0x14f6   :  { %4501 = vmatprep.subr.bf16.mxu1 %v5079_v0 }
0x14f7   :  { %v3774_v6 = vrot.slane %v3770_v63, %v5145_v52 }
0x14f9   :  { %4502 = vmatpush3.bf16.msra.mxu1 %v4983_v19 }
0x14fa   :  { %4523 = vmatprep.subr.bf16.mxu1 %v5079_v0 }
0x1528   :  { %v2783_v46 = vpop.permute.xlu1 %2782 }
0x1529   :  { %v5433_v7 = vmul.f32 %v5015_v12, %v2783_v46 }
0x152b   :  { %v4576_v58 = vpack.i.bf16 %v2671_v5, %v5433_v7 }
0x152d   :  { %4577 = vrot.lane.b32.xlu1 %v4576_v58, %s5077_s25 }
0x1531   :  { %3933 = vrot.lane.b32.xlu1 %v2779_v49, %s5096_s20 }
0x159f   :  { %v4578_v42 = vpop.permute.xlu1 %4577 }
0x15a0   :  { %v4579_v51 = vunpack.i.l.bf16 %v4578_v42  ;;  %v4580_v53 = vunpack.i.h.bf16 %v4578_v42 }
0x15b4   :  { %v3572_v13 = vpop.f32.mrf.mxu1 }
0x15b5   :  { %v3573_v14 = vadd.f32 %v3572_v13, %v3510_v11  ;;  %v3860_v11 = vld [vmem:[#allocation5 + $0x208] sm:$0x1] }
0x15b6   :  { %v4485_v15 = vpop.f32.mrf.mxu1  ;;  %v3861_v13 = vunpack.c.l.bf16 %v3860_v11 }
0x15b7   :  { %v3591_v1 = vsel %vm2559_vm12, %v3573_v14, %v5397_v3 }
0x15b8   :  { %v3592_v5 = vpack.c.bf16 %v3591_v1, %v3591_v1  ;;  %v3575_v16 = vpop.f32.mrf.mxu1  ;;  %v3865_v14 = vrot.slane %v3861_v13, %v5145_v52 }
0x15ba   :  { %v4486_v17 = vpop.f32.mrf.mxu1  ;;  %4496 = vmatmul.mubr.msk.bf16.vlgmr.msra.gmra.mxu0 %vm2715_vm13, %v3592_v5 }
0x15bb   :  { %4519 = vmatprep.mubr.msk.bf16.mxu0 %vm5080_vm0, %v5079_v0  ;;  %4508 = vmatpush3.bf16.msra.mxu0 %v4984_v37 }
0x15bc   :  { %4509 = vmatprep.subr.bf16.mxu0 %v5079_v0 }
0x15bf   :  { %4510 = vmatpush3.bf16.msra.mxu0 %v4985_v38 }
0x15c0   :  { %4511 = vmatprep.subr.bf16.mxu0 %v5079_v0 }
0x15c3   :  { %4512 = vmatpush3.bf16.msra.mxu0 %v4986_v40 }
0x15c4   :  { %4513 = vmatprep.subr.bf16.mxu0 %v5079_v0 }
0x15c7   :  { %4514 = vmatpush3.bf16.msra.mxu0 %v4987_v39 }
0x15c8   :  { %4515 = vmatprep.subr.bf16.mxu0 %v5079_v0 }
0x15cb   :  { %4516 = vmatpush3.bf16.msra.mxu0 %v4988_v41 }
0x15cc   :  { %4517 = vmatprep.subr.bf16.mxu0 %v5079_v0 }
0x15cf   :  { %4518 = vmatpush3.bf16.msra.mxu0 %v4989_v43 }
0x167a   :  { %v3659_v25 = vpop.f32.mrf.mxu0 }
0x167b   :  { %v3660_v26 = vadd.f32 %v3659_v25, %v3597_v24  ;;  %v3934_v25 = vpop.permute.xlu1 %3933 }
0x167c   :  { %v4497_v62 = vpop.f32.mrf.mxu0 }
0x167d   :  { %v4269_v9 = vmul.f32 -1.442695, %v3660_v26 }
0x167e   :  { %v3662_v28 = vpop.f32.mrf.mxu0 }
0x167f   :  { %5018 = vpow2.f32 %v4269_v9 }
0x1680   :  { %v4498_v45 = vpop.f32.mrf.mxu0 }
0x168c   :  { %v5019_v29 = vpop.eup %5018 }
0x168d   :  { %v3668_v30 = vadd.f32 1.0, %v5019_v29 }
0x168f   :  { %5020 = vrcp.f32 %v3668_v30 }
0x169c   :  { %v5021_v31 = vpop.eup %5020 }
0x169d   :  { %v3671_v32 = vmul.f32 %v5021_v31, %v5401_v4  ;;  %v3734_v44 = vsub.f32 1.0, %v5021_v31 }
0x169f   :  { %v3672_v23 = vpack.c.bf16 %v3671_v32, %v3671_v32  ;;  %v3735_v49 = vmul.f32 %v3734_v44, %v5397_v3  ;;  %v4991_v3 = vld [vmem:[#allocation5 + $0x1f8] sm:$0xff]  }
0x16a1   :  { %4504 = vmatmul.mubr.msk.bf16.vlgmr.msra.gmra.mxu1 %vm2559_vm12, %v3672_v23 }
0x16a2   :  { %4527 = vmatprep.mubr.msk.bf16.mxu1 %vm5080_vm0, %v5079_v0  ;;  %4524 = vmatpush3.bf16.msra.mxu1 %v4990_v54  ;;  %vm3921_vm0 = vcmp.eq.s32.totalorder %v5349_v27, 7 }
0x16a3   :  { %4525 = vmatprep.subr.bf16.mxu1 %v5079_v0 }
0x16a6   :  { %4526 = vmatpush3.bf16.msra.mxu1 %v4991_v3 }
0x1761   :  { %v3722_v33 = vpop.f32.mrf.mxu1 }
0x1762   :  { %3729 = vrot.lane.b32.xlu0 %v3722_v33, %s5077_s25 }
0x1763   :  { %v4505_v20 = vpop.f32.mrf.mxu1 }
0x1765   :  { %v3725_v34 = vpop.f32.mrf.mxu1 }
0x1767   :  { %v4506_v48 = vpop.f32.mrf.mxu1 }
0x17d4   :  { %v3730_v12 = vpop.permute.xlu0 %3729 }
0x17d5   :  { %v3732_v35 = vadd.f32 %v3730_v12, %v3660_v26 }
0x17d7   :  { %5022 = vtanh.f32 %v3732_v35 }
0x17e4   :  { %v5023_v4 = vpop.eup %5022 }
0x17e5   :  { %3737 = vrot.lane.b32.xlu0 %v5023_v4, %s5086_s8 }
0x1857   :  { %v3738_v47 = vpop.permute.xlu0 %3737 }
0x1858   :  { %v3740_v50 = vmul.f32 %v5021_v31, %v3738_v47 }
0x185a   :  { %v3741_v36 = vadd.f32 %v3740_v50, %v3735_v49 }
0x185c   :  { %3743 = vrot.lane.b32.xlu0 %v3741_v36, %s5086_s8 }
0x1860   :  { %3929 = vrot.lane.b32.xlu0 %v5433_v7, %s5097_s21 }
0x18ce   :  { %v3744_v55 = vpop.permute.xlu0 %3743 }
0x18cf   :  { %v3754_v56 = vsel %vm2559_vm12, %v3744_v55, %v4579_v51 }
0x18d0   :  { %v3755_v57 = vsel %vm2715_vm13, %v3754_v56, %v4580_v53 }
0x18d1   :  { %v3768_v59 = vpack.c.bf16 %v3755_v57, %v3755_v57 }
0x18d2   :  { %v3930_v22 = vpop.permute.xlu0 %3929 }
0x18d3   :  { %4520 = vmatmul.mubr.msk.bf16.vlgmr.msra.gmra.mxu0 %vm2390_vm9, %v3768_v59 }
0x1993   :  { %v3848_v46 = vpop.f32.mrf.mxu0 }
0x1994   :  { %v3849_v7 = vadd.f32 %v3848_v46, %v3774_v6 }
0x1995   :  { %v4521_v8 = vpop.f32.mrf.mxu0 }
0x1996   :  { %v3854_v58 = vmax.f32 %v3849_v7, 0.0 }
0x1997   :  { %v3851_v10 = vpop.f32.mrf.mxu0 }
0x1998   :  { %v3859_v2 = vpack.c.bf16 %v3854_v58, %v3854_v58 }
0x1999   :  { %v4522_v61 = vpop.f32.mrf.mxu0 }
0x199a   :  { %4528 = vmatmul.mubr.msk.bf16.vlgmr.msra.gmra.mxu1 %vm2559_vm12, %v3859_v2 }
0x1a5a   :  { %v3915_v0 = vpop.f32.mrf.mxu1 }
0x1a5b   :  { %v3916_v15 = vadd.f32 %v3915_v0, %v3865_v14 }
0x1a5c   :  { %v4529_v1 = vpop.f32.mrf.mxu1 }
0x1a5d   :  { %v4283_v5 = vmul.f32 -1.442695, %v3916_v15 }
0x1a5e   :  { %v3918_v16 = vpop.f32.mrf.mxu1 }
0x1a5f   :  { %5024 = vpow2.f32 %v4283_v5 }
0x1a60   :  { %v4530_v17 = vpop.f32.mrf.mxu1 }
0x1a6c   :  { %v5025_v18 = vpop.eup %5024 }
0x1a6d   :  { %v3925_v19 = vadd.f32 1.0, %v5025_v18 }
0x1a6f   :  { %5026 = vrcp.f32 %v3925_v19 }
0x1a7c   :  { %v5027_v21 = vpop.eup %5026 }
0x1a7d   :  { %v3928_v24 = vsel %vm3921_vm0, %v5027_v21, %v3916_v15 }
0x1a7e   :  { %v3937_v26 = vsel %vm3936_vm2, %v3928_v24, %v3930_v22 }
0x1a7f   :  { %v3938_v52 = vsel %vm545_vm4, %v3937_v26, %v3934_v25 }
0x1a80   :  { %v3940_v62 = vsel %vm3939_vm3, %v3938_v52, 0.0 }
0x1a81   :  { %3941 = vst [vmem:[%s5481_s4] sm:$0xff] %v3940_v62 }
0x1a82   :  { %3946 = vsyncpa [#allocation4], 1 }
0x1a83   :  { %3947 = vsyncpa [#allocation6], 1 }

</bundles_post_ra>
